<compile_context>
chip_gen: v7x
topology: tpu7x:2x2x1
jax: 0.10.0
libtpu: 0.0.40
codegen_flags: <defaults>
</compile_context>

<pallas_src>
import numpy as np
import jax
import jax.numpy as jnp
from jax.experimental import pallas as pl
from jax.experimental.pallas import tpu as pltpu


# ----------------------------------------------------------------------------
# Fused forward kernel (one grid step == Bb graphs)
# ----------------------------------------------------------------------------

def fused_forward_kernel(
    adj_ref, x_ref, g2t_ref, mark_ref, amask_ref,
    atom_ref, right_ref, opt_ref,
    wcat0_ref, b0_ref, wcatr_ref, br_ref,
    wemb_ref, bemb_ref,
    w1_ref, b1_ref, w2_ref, b2_ref, wl_ref, bl_ref,
    out_ref):
  f32 = jnp.float32
  bf16 = jnp.bfloat16

  Bb, N, _ = adj_ref.shape
  TV = g2t_ref.shape[2]
  V = amask_ref.shape[2]
  T = TV // V
  rows = Bb * N

  adj = adj_ref[...]                                    # [Bb,N,N] bf16 (0/1)
  dn_adj = (((2,), (1,)), ((0,), (0,)))                 # per-graph A @ h

  # ---- GNN message passing: relu([h ; A@h] @ [Ws ; Wn] + b) -----------------
  def mp_layer(h3, wcat, b):
    h_bf = h3.astype(bf16)                              # [Bb,N,F]
    agg = jax.lax.dot_general(adj, h_bf, dn_adj,
                              preferred_element_type=f32)        # [Bb,N,F]
    cat = jnp.concatenate([h_bf, agg.astype(bf16)], axis=-1)     # [Bb,N,2F]
    out = jnp.dot(cat.reshape(rows, cat.shape[-1]), wcat.astype(bf16),
                  preferred_element_type=f32) + b                # [rows,H]
    return jax.nn.relu(out).reshape(Bb, N, -1)

  h3 = mp_layer(x_ref[...], wcat0_ref[...], b0_ref[...])
  # static unroll: num_layers is small (<=3); switch to lax.fori_loop(unroll=True)
  # with dynamic wcatr_ref[l] indexing if the layer count grows.
  for l in range(wcatr_ref.shape[0]):
    h3 = mp_layer(h3, wcatr_ref[l], br_ref[l])

  # ---- node embeddings z (VMEM/vreg-resident for both heads) ----------------
  h_flat = h3.reshape(rows, h3.shape[-1]).astype(bf16)           # [rows,H]
  z = jnp.dot(h_flat, wemb_ref[...].astype(bf16),
              preferred_element_type=f32) + bemb_ref[...]        # [rows,E]
  z3_bf = z.astype(bf16).reshape(Bb, N, -1)                      # [Bb,N,E]

  # ---- G2T gather as an exact 0/1 one-hot batched matmul --------------------
  idx3 = g2t_ref[...]                                            # [Bb,1,TV] i32
  iota3 = jax.lax.broadcasted_iota(jnp.int32, (Bb, N, TV), 1)
  onehot = (idx3 == iota3).astype(bf16)                          # [Bb,N,TV]
  tf3 = jax.lax.dot_general(onehot, z3_bf, (((1,), (1,)), ((0,), (0,))),
                            preferred_element_type=f32)          # [Bb,TV,E]

  # ---- trace head MLP (first layer flattened over Bb*T*V rows) --------------
  tf2 = tf3.reshape(Bb * TV, tf3.shape[-1]).astype(bf16)
  hid = jax.nn.relu(
      jnp.dot(tf2, w1_ref[...].astype(bf16), preferred_element_type=f32)
      + b1_ref[...])                                             # [Bb*TV,M]
  # second layer: VPU multiply + lane reduce (no degenerate [*,1] matmul)
  hidv = hid.reshape(Bb * T, V, hid.shape[-1])                   # [Bb*T,V,M]
  w2v = w2_ref[...].reshape(1, 1, -1)                            # [1,1,M]
  logit = jnp.sum(hidv * w2v, axis=-1) + b2_ref[...]             # [Bb*T,V]
  amask = amask_ref[...]                                         # [Bb,1,V]
  state3 = jax.nn.sigmoid(logit).reshape(Bb, T, V) * amask       # [Bb,T,V]

  # ---- loop head: masked mean readout -> softmax over trace positions -------
  mark = mark_ref[...]                                           # [Bb,1,N] f32
  denom = jnp.sum(mark, axis=2, keepdims=True) + 1e-6            # [Bb,1,1]
  readout = jax.lax.dot_general(mark.astype(bf16), z3_bf,
                                (((2,), (1,)), ((0,), (0,))),
                                preferred_element_type=f32) / denom  # [Bb,1,E]
  readout2 = readout.reshape(Bb, readout.shape[-1]).astype(bf16)     # [Bb,E]
  loop_logits = jnp.dot(readout2, wl_ref[...].astype(bf16),
                        preferred_element_type=f32) + bl_ref[...]    # [Bb,T]
  loop_row = jax.nn.softmax(loop_logits, axis=-1)                    # [Bb,T]

  # ---- min/max soft trace check (batched, no transposes) --------------------
  # TODO(synk): check consumes the *masked* state; trace positions beyond the
  # per-example trace length are not masked (reference convention unknown).
  state_bf = state3.astype(bf16)
  dn_chk = (((2,), (2,)), ((0,), (0,)))
  left = jax.lax.dot_general(state_bf, atom_ref[...], dn_chk,
                             preferred_element_type=f32)             # [Bb,T,V]
  rightv = jax.lax.dot_general(state_bf, right_ref[...], dn_chk,
                               preferred_element_type=f32)           # [Bb,T,V]
  opt = opt_ref[...]                                                 # [Bb,3,V]
  sat_le = jnp.clip(1.0 - jax.nn.relu(left - rightv), 0.0, 1.0)
  sat_ge = jnp.clip(1.0 - jax.nn.relu(rightv - left), 0.0, 1.0)
  sat_eq = jnp.minimum(sat_le, sat_ge)
  atom_sat = (sat_le * opt[:, 0:1, :] + sat_ge * opt[:, 1:2, :]
              + sat_eq * opt[:, 2:3, :])                             # [Bb,T,V]
  # masked-off atom slots must not affect the AND over atoms
  atom_sat = atom_sat * amask + (1.0 - amask)
  step_sat = jnp.min(atom_sat, axis=-1)                              # [Bb,T] AND
  p = jnp.max(jnp.minimum(step_sat, loop_row),
              axis=-1, keepdims=True)                                # [Bb,1] OR

  # ---- single lane-dense output slab: [state | loop | p] --------------------
  slab = jnp.concatenate([state3.reshape(Bb, T * V), loop_row, p], axis=-1)
  out_ref[...] = slab[:, None, :].astype(out_ref.dtype)              # [Bb,1,OUT]


# ----------------------------------------------------------------------------
# pallas_call wrapper
# ----------------------------------------------------------------------------

def _pick_block_batch(B, N, target_rows=256):
  """Largest divisor Bb of B with Bb*N <= target_rows and grid length >= 2."""
  best = 1
  for bb in range(1, B + 1):
    if B % bb:
      continue
    if bb * N > target_rows:
      continue
    if bb == B and B > 1:        # keep grid >= 2 for v7x megacore
      continue
    best = bb
  return best


def sat_vscnet_tg_fused(params, adj, x, g2t, mark, amask, atom, right, op_t,
                        block_batch=None):
  B, N, _ = adj.shape
  C_in = x.shape[2]
  V = amask.shape[2]
  T = params['bl'].shape[1]
  TV = T * V
  H = params['ws0'].shape[1]
  E = params['w_emb'].shape[1]
  M = params['w1'].shape[1]
  Lm1 = params['ws_r'].shape[0]
  OUT = TV + T + 1

  Bb = block_batch if block_batch is not None else _pick_block_batch(B, N)
  assert B % Bb == 0

  # glue: concat [Ws ; Wn] per layer, present w2 as a row vector
  wcat0 = jnp.concatenate([params['ws0'], params['wn0']], axis=0)   # [2*C_in,H]
  wcat_r = jnp.concatenate([params['ws_r'], params['wn_r']], axis=1)  # [Lm1,2H,H]
  w2_row = jnp.transpose(params['w2'])                              # [1,M]

  bmap = lambda i: (i, 0, 0)
  smap2 = lambda i: (0, 0)
  smap3 = lambda i: (0, 0, 0)

  in_specs = [
      pl.BlockSpec((Bb, N, N), bmap),            # adj (bf16)
      pl.BlockSpec((Bb, N, C_in), bmap),         # x   (bf16)
      pl.BlockSpec((Bb, 1, TV), bmap),           # g2t indices (int32, lane-dense)
      pl.BlockSpec((Bb, 1, N), bmap),            # example mark (f32)
      pl.BlockSpec((Bb, 1, V), bmap),            # atom mask (f32)
      pl.BlockSpec((Bb, V, V), bmap),            # atom_chose (bf16)
      pl.BlockSpec((Bb, V, V), bmap),            # right_chose (bf16)
      pl.BlockSpec((Bb, 3, V), bmap),            # op_chose (pre-transposed, f32)
      pl.BlockSpec((2 * C_in, H), smap2),        # [ws0 ; wn0]
      pl.BlockSpec((1, H), smap2),               # b0
      pl.BlockSpec((Lm1, 2 * H, H), smap3),      # [ws_r ; wn_r] stacked
      pl.BlockSpec((Lm1, 1, H), smap3),          # b_r stacked
      pl.BlockSpec((H, E), smap2),               # w_emb
      pl.BlockSpec((1, E), smap2),               # b_emb
      pl.BlockSpec((E, M), smap2),               # w1
      pl.BlockSpec((1, M), smap2),               # b1
      pl.BlockSpec((1, M), smap2),               # w2 (row)
      pl.BlockSpec((1, 1), smap2),               # b2
      pl.BlockSpec((E, T), smap2),               # wl
      pl.BlockSpec((1, T), smap2),               # bl
  ]
  out_specs = pl.BlockSpec((Bb, 1, OUT), bmap)
  out_shape = jax.ShapeDtypeStruct((B, 1, OUT), jnp.float32)

  slab = pl.pallas_call(
      fused_forward_kernel,
      out_shape=out_shape,
      grid=(B // Bb,),
      in_specs=in_specs,
      out_specs=out_specs,
      compiler_params=pltpu.CompilerParams(
          dimension_semantics=("parallel",)),      # v7x: blocks across TCs
  )(adj, x, g2t, mark, amask, atom, right, op_t,
    wcat0, params['b0'], wcat_r, params['b_r'],
    params['w_emb'], params['b_emb'],
    params['w1'], params['b1'], w2_row, params['b2'],
    params['wl'], params['bl'])

  state = slab[:, 0, :TV].reshape(B, T, V)
  loop = slab[:, 0, TV:TV + T]
  p = slab[:, 0, TV + T]
  return p, state, loop


# ----------------------------------------------------------------------------
# Parameter construction (deterministic, kaiming_uniform with a=sqrt(5))
# Master weights stay f32; bf16 casts happen inside the kernel.
# ----------------------------------------------------------------------------

def kaiming_uniform(key, shape):
  fan_in = shape[0]
  bound = 1.0 / np.sqrt(fan_in)
  return jax.random.uniform(key, shape, jnp.float32, -bound, bound)


def init_params(key, in_channels, hidden, embed, mlp, num_layers, max_trace_len):
  keys = jax.random.split(key, 2 * num_layers + 4)
  ki = iter(keys)
  ws0 = kaiming_uniform(next(ki), (in_channels, hidden))
  wn0 = kaiming_uniform(next(ki), (in_channels, hidden))
  ws_r, wn_r, b_r = [], [], []
  for _ in range(num_layers - 1):
    ws_r.append(kaiming_uniform(next(ki), (hidden, hidden)))
    wn_r.append(kaiming_uniform(next(ki), (hidden, hidden)))
    b_r.append(jnp.zeros((1, hidden), jnp.float32))
  return {
      'ws0': ws0, 'wn0': wn0, 'b0': jnp.zeros((1, hidden), jnp.float32),
      'ws_r': jnp.stack(ws_r), 'wn_r': jnp.stack(wn_r), 'b_r': jnp.stack(b_r),
      'w_emb': kaiming_uniform(next(ki), (hidden, embed)),
      'b_emb': jnp.zeros((1, embed), jnp.float32),
      'w1': kaiming_uniform(next(ki), (embed, mlp)),
      'b1': jnp.zeros((1, mlp), jnp.float32),
      'w2': kaiming_uniform(next(ki), (mlp, 1)),
      'b2': jnp.zeros((1, 1), jnp.float32),
      'wl': kaiming_uniform(next(ki), (embed, max_trace_len)),
      'bl': jnp.zeros((1, max_trace_len), jnp.float32),
  }


# ----------------------------------------------------------------------------
# Forward pass (mirrors SatVSCNet_TG.forward)
# ----------------------------------------------------------------------------

def sat_vscnet_tg_forward(params, x_batch, edge_index_batch, u_index_batch,
                          g2t_index_batch, example_mark_batch, atom_mask_batch,
                          op_chose_batch, atom_chose_batch, right_chose_batch):
  del u_index_batch  # not used in the reference forward()
  B, N, _ = x_batch.shape
  T, V = g2t_index_batch.shape[1], g2t_index_batch.shape[2]

  # dense adjacency via O(B*E) scatter (cheap glue)
  # TODO(synk): reference adjacency convention (self loops / symmetrization /
  # normalization) is unknown; raw directed 0/1 adjacency is used here.
  b_idx = jnp.arange(B, dtype=jnp.int32)[:, None]
  src = edge_index_batch[:, 0, :]
  dst = edge_index_batch[:, 1, :]
  adj = jnp.zeros((B, N, N), jnp.float32).at[b_idx, src, dst].set(1.0)

  adj_bf = adj.astype(jnp.bfloat16)                                 # exact 0/1
  x_bf = x_batch.astype(jnp.bfloat16)
  g2t = g2t_index_batch.reshape(B, 1, T * V).astype(jnp.int32)      # lane-dense
  mark3 = example_mark_batch.reshape(B, 1, N).astype(jnp.float32)
  amask3 = atom_mask_batch.reshape(B, 1, V).astype(jnp.float32)
  op_t = jnp.transpose(op_chose_batch, (0, 2, 1)).astype(jnp.float32)  # [B,3,V]

  p, state, loop = sat_vscnet_tg_fused(
      params, adj_bf, x_bf, g2t, mark3, amask3,
      atom_chose_batch.astype(jnp.bfloat16),
      right_chose_batch.astype(jnp.bfloat16), op_t)
  return p, state, loop


# ----------------------------------------------------------------------------
# main
# ----------------------------------------------------------------------------

if __name__ == "__main__":
  # small shapes consistent with the module's constructor (in_channels=12)
  B, N, C_IN = 16, 16, 12
  HIDDEN, EMBED, MLP = 32, 16, 32
  NUM_LAYERS, T, V = 3, 5, 8
  N_EDGES = N

  key = jax.random.PRNGKey(0)
  k_par, k_x, k_g2t, k_am, k_op, k_atom, k_right = jax.random.split(key, 7)

  params = init_params(k_par, C_IN, HIDDEN, EMBED, MLP, NUM_LAYERS, T)

  x_batch = jax.random.normal(k_x, (B, N, C_IN), jnp.float32)
  # simple ring graph per example
  src = jnp.arange(N_EDGES, dtype=jnp.int32)
  dst = (src + 1) % N
  edge_index_batch = jnp.broadcast_to(jnp.stack([src, dst])[None], (B, 2, N_EDGES))
  u_index_batch = jnp.zeros((B,), jnp.int32)
  g2t_index_batch = jax.random.randint(k_g2t, (B, T, V), 0, N, jnp.int32)
  example_mark_batch = jnp.ones((B, N), jnp.float32)
  atom_mask_batch = (jax.random.uniform(k_am, (B, V)) > 0.2).astype(jnp.float32)
  op_chose_batch = jax.nn.softmax(jax.random.normal(k_op, (B, V, 3)), axis=-1)
  atom_chose_batch = jax.nn.softmax(jax.random.normal(k_atom, (B, V, V)), axis=-1)
  right_chose_batch = jax.nn.softmax(jax.random.normal(k_right, (B, V, V)), axis=-1)

  forward = jax.jit(sat_vscnet_tg_forward)
  p_sv, state_seq, loop = forward(
      params, x_batch, edge_index_batch, u_index_batch, g2t_index_batch,
      example_mark_batch, atom_mask_batch, op_chose_batch,
      atom_chose_batch, right_chose_batch)

  jax.block_until_ready((p_sv, state_seq, loop))
  assert p_sv.shape == (B,)
  assert state_seq.shape == (B, T, V)
  assert loop.shape == (B, T)
  assert bool(jnp.all(jnp.isfinite(p_sv)))
  assert bool(jnp.all(jnp.isfinite(state_seq)))
  assert bool(jnp.all(jnp.isfinite(loop)))
  print("KERNEL_OK")
</pallas_src>

<mosaic_0001>
module attributes {stable_mosaic.version = 11 : i64} {
  func.func @fused_forward_kernel(%arg0: i32, %arg1: memref<8x16x16xbf16, #tpu.memory_space<vmem>>, %arg2: memref<8x16x12xbf16, #tpu.memory_space<vmem>>, %arg3: memref<8x1x40xi32, #tpu.memory_space<vmem>>, %arg4: memref<8x1x16xf32, #tpu.memory_space<vmem>>, %arg5: memref<8x1x8xf32, #tpu.memory_space<vmem>>, %arg6: memref<8x8x8xbf16, #tpu.memory_space<vmem>>, %arg7: memref<8x8x8xbf16, #tpu.memory_space<vmem>>, %arg8: memref<8x3x8xf32, #tpu.memory_space<vmem>>, %arg9: memref<24x32xf32, #tpu.memory_space<vmem>>, %arg10: memref<1x32xf32, #tpu.memory_space<vmem>>, %arg11: memref<2x64x32xf32, #tpu.memory_space<vmem>>, %arg12: memref<2x1x32xf32, #tpu.memory_space<vmem>>, %arg13: memref<32x16xf32, #tpu.memory_space<vmem>>, %arg14: memref<1x16xf32, #tpu.memory_space<vmem>>, %arg15: memref<16x32xf32, #tpu.memory_space<vmem>>, %arg16: memref<1x32xf32, #tpu.memory_space<vmem>>, %arg17: memref<1x32xf32, #tpu.memory_space<vmem>>, %arg18: memref<1x1xf32, #tpu.memory_space<vmem>>, %arg19: memref<16x5xf32, #tpu.memory_space<vmem>>, %arg20: memref<1x5xf32, #tpu.memory_space<vmem>>, %arg21: memref<8x1x46xf32, #tpu.memory_space<vmem>>) attributes {dimension_semantics = [#tpu.dimension_semantics<parallel>], iteration_bounds = array<i64: 2>, scalar_prefetch = 0 : i64, scratch_operands = 0 : i64, tpu.core_type = #tpu.core_type<tc>, window_params = [{transform_indices = @transform_0, window_bounds = array<i64: 8, 16, 16>}, {transform_indices = @transform_1, window_bounds = array<i64: 8, 16, 12>}, {transform_indices = @transform_2, window_bounds = array<i64: 8, 1, 40>}, {transform_indices = @transform_3, window_bounds = array<i64: 8, 1, 16>}, {transform_indices = @transform_4, window_bounds = array<i64: 8, 1, 8>}, {transform_indices = @transform_5, window_bounds = array<i64: 8, 8, 8>}, {transform_indices = @transform_6, window_bounds = array<i64: 8, 8, 8>}, {transform_indices = @transform_7, window_bounds = array<i64: 8, 3, 8>}, {pipeline_mode = #tpu.pipeline_mode<synchronous>, transform_indices = @transform_8, window_bounds = array<i64: 24, 32>}, {pipeline_mode = #tpu.pipeline_mode<synchronous>, transform_indices = @transform_9, window_bounds = array<i64: 1, 32>}, {pipeline_mode = #tpu.pipeline_mode<synchronous>, transform_indices = @transform_10, window_bounds = array<i64: 2, 64, 32>}, {pipeline_mode = #tpu.pipeline_mode<synchronous>, transform_indices = @transform_11, window_bounds = array<i64: 2, 1, 32>}, {pipeline_mode = #tpu.pipeline_mode<synchronous>, transform_indices = @transform_12, window_bounds = array<i64: 32, 16>}, {pipeline_mode = #tpu.pipeline_mode<synchronous>, transform_indices = @transform_13, window_bounds = array<i64: 1, 16>}, {pipeline_mode = #tpu.pipeline_mode<synchronous>, transform_indices = @transform_14, window_bounds = array<i64: 16, 32>}, {pipeline_mode = #tpu.pipeline_mode<synchronous>, transform_indices = @transform_15, window_bounds = array<i64: 1, 32>}, {pipeline_mode = #tpu.pipeline_mode<synchronous>, transform_indices = @transform_16, window_bounds = array<i64: 1, 32>}, {pipeline_mode = #tpu.pipeline_mode<synchronous>, transform_indices = @transform_17, window_bounds = array<i64: 1, 1>}, {pipeline_mode = #tpu.pipeline_mode<synchronous>, transform_indices = @transform_18, window_bounds = array<i64: 16, 5>}, {pipeline_mode = #tpu.pipeline_mode<synchronous>, transform_indices = @transform_19, window_bounds = array<i64: 1, 5>}, {transform_indices = @transform_20, window_bounds = array<i64: 8, 1, 46>}]} {
    %c0 = arith.constant 0 : index
    %c0_0 = arith.constant 0 : index
    %c0_1 = arith.constant 0 : index
    %0 = vector.load %arg1[%c0, %c0_0, %c0_1] : memref<8x16x16xbf16, #tpu.memory_space<vmem>>, vector<8x16x16xbf16>
    %c0_2 = arith.constant 0 : index
    %c0_3 = arith.constant 0 : index
    %c0_4 = arith.constant 0 : index
    %1 = vector.load %arg2[%c0_2, %c0_3, %c0_4] : memref<8x16x12xbf16, #tpu.memory_space<vmem>>, vector<8x16x12xbf16>
    %c0_5 = arith.constant 0 : index
    %c0_6 = arith.constant 0 : index
    %2 = vector.load %arg9[%c0_5, %c0_6] : memref<24x32xf32, #tpu.memory_space<vmem>>, vector<24x32xf32>
    %c0_7 = arith.constant 0 : index
    %c0_8 = arith.constant 0 : index
    %3 = vector.load %arg10[%c0_7, %c0_8] : memref<1x32xf32, #tpu.memory_space<vmem>>, vector<1x32xf32>
    %cst = arith.constant dense<0.000000e+00> : vector<8x16x12xf32>
    %4 = tpu.matmul %0, %1, %cst {dimension_numbers = #tpu.dot_dimension_numbers<[2], [1], [1], [2], [0, 0, 0, 1, 1, 2], [0], [0]>} : vector<8x16x16xbf16>, vector<8x16x12xbf16>, vector<8x16x12xf32> -> vector<8x16x12xf32>
    %5 = arith.truncf %4 : vector<8x16x12xf32> to vector<8x16x12xbf16>
    %6 = tpu.concatenate %1, %5 in 2 : vector<8x16x12xbf16>, vector<8x16x12xbf16> -> vector<8x16x24xbf16>
    %7 = vector.shape_cast %6 : vector<8x16x24xbf16> to vector<128x24xbf16>
    %8 = arith.truncf %2 : vector<24x32xf32> to vector<24x32xbf16>
    %cst_9 = arith.constant dense<0.000000e+00> : vector<128x32xf32>
    %9 = tpu.matmul %7, %8, %cst_9 {dimension_numbers = #tpu.dot_dimension_numbers<[1], [0], [0], [1], [0, 0, 1, 1], [], []>} : vector<128x24xbf16>, vector<24x32xbf16>, vector<128x32xf32> -> vector<128x32xf32>
    %10 = vector.broadcast %3 : vector<1x32xf32> to vector<128x32xf32>
    %11 = arith.addf %9, %10 : vector<128x32xf32>
    %cst_10 = arith.constant 0.000000e+00 : f32
    %12 = vector.broadcast %cst_10 : f32 to vector<128x32xf32>
    %13 = arith.maximumf %11, %12 : vector<128x32xf32>
    %14 = vector.shape_cast %13 : vector<128x32xf32> to vector<8x16x32xf32>
    %c0_11 = arith.constant 0 : index
    %c0_12 = arith.constant 0 : index
    %c0_13 = arith.constant 0 : index
    %15 = vector.load %arg11[%c0_11, %c0_12, %c0_13] : memref<2x64x32xf32, #tpu.memory_space<vmem>>, vector<1x64x32xf32>
    %16 = vector.shape_cast %15 : vector<1x64x32xf32> to vector<64x32xf32>
    %c0_14 = arith.constant 0 : index
    %c0_15 = arith.constant 0 : index
    %c0_16 = arith.constant 0 : index
    %17 = vector.load %arg12[%c0_14, %c0_15, %c0_16] : memref<2x1x32xf32, #tpu.memory_space<vmem>>, vector<1x1x32xf32>
    %18 = vector.shape_cast %17 : vector<1x1x32xf32> to vector<1x32xf32>
    %19 = arith.truncf %14 : vector<8x16x32xf32> to vector<8x16x32xbf16>
    %cst_17 = arith.constant dense<0.000000e+00> : vector<8x16x32xf32>
    %20 = tpu.matmul %0, %19, %cst_17 {dimension_numbers = #tpu.dot_dimension_numbers<[2], [1], [1], [2], [0, 0, 0, 1, 1, 2], [0], [0]>} : vector<8x16x16xbf16>, vector<8x16x32xbf16>, vector<8x16x32xf32> -> vector<8x16x32xf32>
    %21 = arith.truncf %20 : vector<8x16x32xf32> to vector<8x16x32xbf16>
    %22 = tpu.concatenate %19, %21 in 2 : vector<8x16x32xbf16>, vector<8x16x32xbf16> -> vector<8x16x64xbf16>
    %23 = vector.shape_cast %22 : vector<8x16x64xbf16> to vector<128x64xbf16>
    %24 = arith.truncf %16 : vector<64x32xf32> to vector<64x32xbf16>
    %cst_18 = arith.constant dense<0.000000e+00> : vector<128x32xf32>
    %25 = tpu.matmul %23, %24, %cst_18 {dimension_numbers = #tpu.dot_dimension_numbers<[1], [0], [0], [1], [0, 0, 1, 1], [], []>} : vector<128x64xbf16>, vector<64x32xbf16>, vector<128x32xf32> -> vector<128x32xf32>
    %26 = vector.broadcast %18 : vector<1x32xf32> to vector<128x32xf32>
    %27 = arith.addf %25, %26 : vector<128x32xf32>
    %cst_19 = arith.constant 0.000000e+00 : f32
    %28 = vector.broadcast %cst_19 : f32 to vector<128x32xf32>
    %29 = arith.maximumf %27, %28 : vector<128x32xf32>
    %30 = vector.shape_cast %29 : vector<128x32xf32> to vector<8x16x32xf32>
    %c1 = arith.constant 1 : index
    %c0_20 = arith.constant 0 : index
    %c0_21 = arith.constant 0 : index
    %31 = vector.load %arg11[%c1, %c0_20, %c0_21] : memref<2x64x32xf32, #tpu.memory_space<vmem>>, vector<1x64x32xf32>
    %32 = vector.shape_cast %31 : vector<1x64x32xf32> to vector<64x32xf32>
    %c1_22 = arith.constant 1 : index
    %c0_23 = arith.constant 0 : index
    %c0_24 = arith.constant 0 : index
    %33 = vector.load %arg12[%c1_22, %c0_23, %c0_24] : memref<2x1x32xf32, #tpu.memory_space<vmem>>, vector<1x1x32xf32>
    %34 = vector.shape_cast %33 : vector<1x1x32xf32> to vector<1x32xf32>
    %35 = arith.truncf %30 : vector<8x16x32xf32> to vector<8x16x32xbf16>
    %cst_25 = arith.constant dense<0.000000e+00> : vector<8x16x32xf32>
    %36 = tpu.matmul %0, %35, %cst_25 {dimension_numbers = #tpu.dot_dimension_numbers<[2], [1], [1], [2], [0, 0, 0, 1, 1, 2], [0], [0]>} : vector<8x16x16xbf16>, vector<8x16x32xbf16>, vector<8x16x32xf32> -> vector<8x16x32xf32>
    %37 = arith.truncf %36 : vector<8x16x32xf32> to vector<8x16x32xbf16>
    %38 = tpu.concatenate %35, %37 in 2 : vector<8x16x32xbf16>, vector<8x16x32xbf16> -> vector<8x16x64xbf16>
    %39 = vector.shape_cast %38 : vector<8x16x64xbf16> to vector<128x64xbf16>
    %40 = arith.truncf %32 : vector<64x32xf32> to vector<64x32xbf16>
    %cst_26 = arith.constant dense<0.000000e+00> : vector<128x32xf32>
    %41 = tpu.matmul %39, %40, %cst_26 {dimension_numbers = #tpu.dot_dimension_numbers<[1], [0], [0], [1], [0, 0, 1, 1], [], []>} : vector<128x64xbf16>, vector<64x32xbf16>, vector<128x32xf32> -> vector<128x32xf32>
    %42 = vector.broadcast %34 : vector<1x32xf32> to vector<128x32xf32>
    %43 = arith.addf %41, %42 : vector<128x32xf32>
    %cst_27 = arith.constant 0.000000e+00 : f32
    %44 = vector.broadcast %cst_27 : f32 to vector<128x32xf32>
    %45 = arith.maximumf %43, %44 : vector<128x32xf32>
    %46 = vector.shape_cast %45 : vector<128x32xf32> to vector<8x16x32xf32>
    %47 = vector.shape_cast %46 : vector<8x16x32xf32> to vector<128x32xf32>
    %48 = arith.truncf %47 : vector<128x32xf32> to vector<128x32xbf16>
    %c0_28 = arith.constant 0 : index
    %c0_29 = arith.constant 0 : index
    %49 = vector.load %arg13[%c0_28, %c0_29] : memref<32x16xf32, #tpu.memory_space<vmem>>, vector<32x16xf32>
    %50 = arith.truncf %49 : vector<32x16xf32> to vector<32x16xbf16>
    %cst_30 = arith.constant dense<0.000000e+00> : vector<128x16xf32>
    %51 = tpu.matmul %48, %50, %cst_30 {dimension_numbers = #tpu.dot_dimension_numbers<[1], [0], [0], [1], [0, 0, 1, 1], [], []>} : vector<128x32xbf16>, vector<32x16xbf16>, vector<128x16xf32> -> vector<128x16xf32>
    %c0_31 = arith.constant 0 : index
    %c0_32 = arith.constant 0 : index
    %52 = vector.load %arg14[%c0_31, %c0_32] : memref<1x16xf32, #tpu.memory_space<vmem>>, vector<1x16xf32>
    %53 = vector.broadcast %52 : vector<1x16xf32> to vector<128x16xf32>
    %54 = arith.addf %51, %53 : vector<128x16xf32>
    %55 = arith.truncf %54 : vector<128x16xf32> to vector<128x16xbf16>
    %56 = vector.shape_cast %55 : vector<128x16xbf16> to vector<8x16x16xbf16>
    %c0_33 = arith.constant 0 : index
    %c0_34 = arith.constant 0 : index
    %c0_35 = arith.constant 0 : index
    %57 = vector.load %arg3[%c0_33, %c0_34, %c0_35] : memref<8x1x40xi32, #tpu.memory_space<vmem>>, vector<8x1x40xi32>
    %58 = tpu.iota {dimensions = array<i32: 1>} : vector<8x16x40xi32>
    %59 = vector.broadcast %57 : vector<8x1x40xi32> to vector<8x16x40xi32>
    %60 = arith.cmpi eq, %59, %58 : vector<8x16x40xi32>
    %61 = arith.extui %60 : vector<8x16x40xi1> to vector<8x16x40xi32>
    %62 = arith.sitofp %61 : vector<8x16x40xi32> to vector<8x16x40xf32>
    %63 = arith.truncf %62 : vector<8x16x40xf32> to vector<8x16x40xbf16>
    %cst_36 = arith.constant dense<0.000000e+00> : vector<8x40x16xf32>
    %64 = tpu.matmul %63, %56, %cst_36 {dimension_numbers = #tpu.dot_dimension_numbers<[1], [1], [2], [2], [0, 0, 0, 2, 1, 2], [0], [0]>} : vector<8x16x40xbf16>, vector<8x16x16xbf16>, vector<8x40x16xf32> -> vector<8x40x16xf32>
    %65 = vector.shape_cast %64 : vector<8x40x16xf32> to vector<320x16xf32>
    %66 = arith.truncf %65 : vector<320x16xf32> to vector<320x16xbf16>
    %c0_37 = arith.constant 0 : index
    %c0_38 = arith.constant 0 : index
    %67 = vector.load %arg15[%c0_37, %c0_38] : memref<16x32xf32, #tpu.memory_space<vmem>>, vector<16x32xf32>
    %68 = arith.truncf %67 : vector<16x32xf32> to vector<16x32xbf16>
    %cst_39 = arith.constant dense<0.000000e+00> : vector<320x32xf32>
    %69 = tpu.matmul %66, %68, %cst_39 {dimension_numbers = #tpu.dot_dimension_numbers<[1], [0], [0], [1], [0, 0, 1, 1], [], []>} : vector<320x16xbf16>, vector<16x32xbf16>, vector<320x32xf32> -> vector<320x32xf32>
    %c0_40 = arith.constant 0 : index
    %c0_41 = arith.constant 0 : index
    %70 = vector.load %arg16[%c0_40, %c0_41] : memref<1x32xf32, #tpu.memory_space<vmem>>, vector<1x32xf32>
    %71 = vector.broadcast %70 : vector<1x32xf32> to vector<320x32xf32>
    %72 = arith.addf %69, %71 : vector<320x32xf32>
    %cst_42 = arith.constant 0.000000e+00 : f32
    %73 = vector.broadcast %cst_42 : f32 to vector<320x32xf32>
    %74 = arith.maximumf %72, %73 : vector<320x32xf32>
    %75 = vector.shape_cast %74 : vector<320x32xf32> to vector<40x8x32xf32>
    %c0_43 = arith.constant 0 : index
    %c0_44 = arith.constant 0 : index
    %76 = vector.load %arg17[%c0_43, %c0_44] : memref<1x32xf32, #tpu.memory_space<vmem>>, vector<1x32xf32>
    %77 = vector.shape_cast %76 : vector<1x32xf32> to vector<1x1x32xf32>
    %78 = vector.broadcast %77 : vector<1x1x32xf32> to vector<40x8x32xf32>
    %79 = arith.mulf %75, %78 : vector<40x8x32xf32>
    %cst_45 = arith.constant dense<0.000000e+00> : vector<40x8xf32>
    %80 = vector.multi_reduction <add>, %79, %cst_45 [2] : vector<40x8x32xf32> to vector<40x8xf32>
    %c0_46 = arith.constant 0 : index
    %c0_47 = arith.constant 0 : index
    %81 = vector.load %arg18[%c0_46, %c0_47] : memref<1x1xf32, #tpu.memory_space<vmem>>, vector<1x1xf32>
    %82 = vector.broadcast %81 : vector<1x1xf32> to vector<40x8xf32>
    %83 = arith.addf %80, %82 : vector<40x8xf32>
    %c0_48 = arith.constant 0 : index
    %c0_49 = arith.constant 0 : index
    %c0_50 = arith.constant 0 : index
    %84 = vector.load %arg5[%c0_48, %c0_49, %c0_50] : memref<8x1x8xf32, #tpu.memory_space<vmem>>, vector<8x1x8xf32>
    %85 = arith.negf %83 : vector<40x8xf32>
    %86 = math.exp %85 : vector<40x8xf32>
    %cst_51 = arith.constant 1.000000e+00 : f32
    %87 = vector.broadcast %cst_51 : f32 to vector<40x8xf32>
    %88 = arith.addf %87, %86 : vector<40x8xf32>
    %89 = arith.divf %87, %88 : vector<40x8xf32>
    %90 = vector.shape_cast %89 : vector<40x8xf32> to vector<8x5x8xf32>
    %91 = vector.broadcast %84 : vector<8x1x8xf32> to vector<8x5x8xf32>
    %92 = arith.mulf %90, %91 : vector<8x5x8xf32>
    %c0_52 = arith.constant 0 : index
    %c0_53 = arith.constant 0 : index
    %c0_54 = arith.constant 0 : index
    %93 = vector.load %arg4[%c0_52, %c0_53, %c0_54] : memref<8x1x16xf32, #tpu.memory_space<vmem>>, vector<8x1x16xf32>
    %cst_55 = arith.constant dense<0.000000e+00> : vector<8x1xf32>
    %94 = vector.multi_reduction <add>, %93, %cst_55 [2] : vector<8x1x16xf32> to vector<8x1xf32>
    %95 = vector.shape_cast %94 : vector<8x1xf32> to vector<8x1x1xf32>
    %cst_56 = arith.constant 9.99999997E-7 : f32
    %96 = vector.broadcast %cst_56 : f32 to vector<8x1x1xf32>
    %97 = arith.addf %95, %96 : vector<8x1x1xf32>
    %98 = arith.truncf %93 : vector<8x1x16xf32> to vector<8x1x16xbf16>
    %cst_57 = arith.constant dense<0.000000e+00> : vector<8x1x16xf32>
    %99 = tpu.matmul %98, %56, %cst_57 {dimension_numbers = #tpu.dot_dimension_numbers<[2], [1], [1], [2], [0, 0, 0, 1, 1, 2], [0], [0]>} : vector<8x1x16xbf16>, vector<8x16x16xbf16>, vector<8x1x16xf32> -> vector<8x1x16xf32>
    %100 = vector.broadcast %97 : vector<8x1x1xf32> to vector<8x1x16xf32>
    %101 = arith.divf %99, %100 : vector<8x1x16xf32>
    %102 = vector.shape_cast %101 : vector<8x1x16xf32> to vector<8x16xf32>
    %103 = arith.truncf %102 : vector<8x16xf32> to vector<8x16xbf16>
    %c0_58 = arith.constant 0 : index
    %c0_59 = arith.constant 0 : index
    %104 = vector.load %arg19[%c0_58, %c0_59] : memref<16x5xf32, #tpu.memory_space<vmem>>, vector<16x5xf32>
    %105 = arith.truncf %104 : vector<16x5xf32> to vector<16x5xbf16>
    %cst_60 = arith.constant dense<0.000000e+00> : vector<8x5xf32>
    %106 = tpu.matmul %103, %105, %cst_60 {dimension_numbers = #tpu.dot_dimension_numbers<[1], [0], [0], [1], [0, 0, 1, 1], [], []>} : vector<8x16xbf16>, vector<16x5xbf16>, vector<8x5xf32> -> vector<8x5xf32>
    %c0_61 = arith.constant 0 : index
    %c0_62 = arith.constant 0 : index
    %107 = vector.load %arg20[%c0_61, %c0_62] : memref<1x5xf32, #tpu.memory_space<vmem>>, vector<1x5xf32>
    %108 = vector.broadcast %107 : vector<1x5xf32> to vector<8x5xf32>
    %109 = arith.addf %106, %108 : vector<8x5xf32>
    %cst_63 = arith.constant dense<0xFF800000> : vector<8xf32>
    %110 = vector.multi_reduction <maximumf>, %109, %cst_63 [1] : vector<8x5xf32> to vector<8xf32>
    %cst_64 = arith.constant 0xFF800000 : f32
    %111 = vector.broadcast %cst_64 : f32 to vector<8xf32>
    %112 = arith.maximumf %111, %110 : vector<8xf32>
    %113 = vector.shape_cast %112 : vector<8xf32> to vector<8x1xf32>
    %114 = vector.broadcast %113 : vector<8x1xf32> to vector<8x5xf32>
    %115 = arith.subf %109, %114 : vector<8x5xf32>
    %116 = math.exp %115 : vector<8x5xf32>
    %cst_65 = arith.constant dense<0.000000e+00> : vector<8xf32>
    %117 = vector.multi_reduction <add>, %116, %cst_65 [1] : vector<8x5xf32> to vector<8xf32>
    %118 = vector.shape_cast %117 : vector<8xf32> to vector<8x1xf32>
    %119 = vector.broadcast %118 : vector<8x1xf32> to vector<8x5xf32>
    %120 = arith.divf %116, %119 : vector<8x5xf32>
    %121 = arith.truncf %92 : vector<8x5x8xf32> to vector<8x5x8xbf16>
    %c0_66 = arith.constant 0 : index
    %c0_67 = arith.constant 0 : index
    %c0_68 = arith.constant 0 : index
    %122 = vector.load %arg6[%c0_66, %c0_67, %c0_68] : memref<8x8x8xbf16, #tpu.memory_space<vmem>>, vector<8x8x8xbf16>
    %cst_69 = arith.constant dense<0.000000e+00> : vector<8x5x8xf32>
    %123 = tpu.matmul %121, %122, %cst_69 {dimension_numbers = #tpu.dot_dimension_numbers<[2], [2], [1], [1], [0, 0, 0, 1, 1, 1], [0], [0]>} : vector<8x5x8xbf16>, vector<8x8x8xbf16>, vector<8x5x8xf32> -> vector<8x5x8xf32>
    %c0_70 = arith.constant 0 : index
    %c0_71 = arith.constant 0 : index
    %c0_72 = arith.constant 0 : index
    %124 = vector.load %arg7[%c0_70, %c0_71, %c0_72] : memref<8x8x8xbf16, #tpu.memory_space<vmem>>, vector<8x8x8xbf16>
    %cst_73 = arith.constant dense<0.000000e+00> : vector<8x5x8xf32>
    %125 = tpu.matmul %121, %124, %cst_73 {dimension_numbers = #tpu.dot_dimension_numbers<[2], [2], [1], [1], [0, 0, 0, 1, 1, 1], [0], [0]>} : vector<8x5x8xbf16>, vector<8x8x8xbf16>, vector<8x5x8xf32> -> vector<8x5x8xf32>
    %c0_74 = arith.constant 0 : index
    %c0_75 = arith.constant 0 : index
    %c0_76 = arith.constant 0 : index
    %126 = vector.load %arg8[%c0_74, %c0_75, %c0_76] : memref<8x3x8xf32, #tpu.memory_space<vmem>>, vector<8x3x8xf32>
    %127 = arith.subf %123, %125 : vector<8x5x8xf32>
    %cst_77 = arith.constant 0.000000e+00 : f32
    %128 = vector.broadcast %cst_77 : f32 to vector<8x5x8xf32>
    %129 = arith.maximumf %127, %128 : vector<8x5x8xf32>
    %cst_78 = arith.constant 1.000000e+00 : f32
    %130 = vector.broadcast %cst_78 : f32 to vector<8x5x8xf32>
    %131 = arith.subf %130, %129 : vector<8x5x8xf32>
    %cst_79 = arith.constant 0.000000e+00 : f32
    %cst_80 = arith.constant 1.000000e+00 : f32
    %132 = vector.broadcast %cst_79 : f32 to vector<8x5x8xf32>
    %133 = arith.maximumf %132, %131 : vector<8x5x8xf32>
    %134 = vector.broadcast %cst_80 : f32 to vector<8x5x8xf32>
    %135 = arith.minimumf %134, %133 : vector<8x5x8xf32>
    %136 = arith.subf %125, %123 : vector<8x5x8xf32>
    %cst_81 = arith.constant 0.000000e+00 : f32
    %137 = vector.broadcast %cst_81 : f32 to vector<8x5x8xf32>
    %138 = arith.maximumf %136, %137 : vector<8x5x8xf32>
    %cst_82 = arith.constant 1.000000e+00 : f32
    %139 = vector.broadcast %cst_82 : f32 to vector<8x5x8xf32>
    %140 = arith.subf %139, %138 : vector<8x5x8xf32>
    %cst_83 = arith.constant 0.000000e+00 : f32
    %cst_84 = arith.constant 1.000000e+00 : f32
    %141 = vector.broadcast %cst_83 : f32 to vector<8x5x8xf32>
    %142 = arith.maximumf %141, %140 : vector<8x5x8xf32>
    %143 = vector.broadcast %cst_84 : f32 to vector<8x5x8xf32>
    %144 = arith.minimumf %143, %142 : vector<8x5x8xf32>
    %145 = arith.minimumf %135, %144 : vector<8x5x8xf32>
    %146 = vector.extract_strided_slice %126 {offsets = [0, 0, 0], sizes = [8, 1, 8], strides = [1, 1, 1]} : vector<8x3x8xf32> to vector<8x1x8xf32>
    %147 = vector.broadcast %146 : vector<8x1x8xf32> to vector<8x5x8xf32>
    %148 = arith.mulf %135, %147 : vector<8x5x8xf32>
    %149 = vector.extract_strided_slice %126 {offsets = [0, 1, 0], sizes = [8, 1, 8], strides = [1, 1, 1]} : vector<8x3x8xf32> to vector<8x1x8xf32>
    %150 = vector.broadcast %149 : vector<8x1x8xf32> to vector<8x5x8xf32>
    %151 = arith.mulf %144, %150 : vector<8x5x8xf32>
    %152 = arith.addf %148, %151 : vector<8x5x8xf32>
    %153 = vector.extract_strided_slice %126 {offsets = [0, 2, 0], sizes = [8, 1, 8], strides = [1, 1, 1]} : vector<8x3x8xf32> to vector<8x1x8xf32>
    %154 = vector.broadcast %153 : vector<8x1x8xf32> to vector<8x5x8xf32>
    %155 = arith.mulf %145, %154 : vector<8x5x8xf32>
    %156 = arith.addf %152, %155 : vector<8x5x8xf32>
    %157 = vector.broadcast %84 : vector<8x1x8xf32> to vector<8x5x8xf32>
    %158 = arith.mulf %156, %157 : vector<8x5x8xf32>
    %cst_85 = arith.constant 1.000000e+00 : f32
    %159 = vector.broadcast %cst_85 : f32 to vector<8x1x8xf32>
    %160 = arith.subf %159, %84 : vector<8x1x8xf32>
    %161 = vector.broadcast %160 : vector<8x1x8xf32> to vector<8x5x8xf32>
    %162 = arith.addf %158, %161 : vector<8x5x8xf32>
    %cst_86 = arith.constant dense<0x7F800000> : vector<8x5xf32>
    %163 = vector.multi_reduction <minimumf>, %162, %cst_86 [2] : vector<8x5x8xf32> to vector<8x5xf32>
    %164 = arith.minimumf %163, %120 : vector<8x5xf32>
    %cst_87 = arith.constant dense<0xFF800000> : vector<8xf32>
    %165 = vector.multi_reduction <maximumf>, %164, %cst_87 [1] : vector<8x5xf32> to vector<8xf32>
    %166 = vector.shape_cast %165 : vector<8xf32> to vector<8x1xf32>
    %167 = vector.shape_cast %92 : vector<8x5x8xf32> to vector<8x40xf32>
    %168 = tpu.concatenate %167, %120, %166 in 1 : vector<8x40xf32>, vector<8x5xf32>, vector<8x1xf32> -> vector<8x46xf32>
    %169 = vector.shape_cast %168 : vector<8x46xf32> to vector<8x1x46xf32>
    %c0_88 = arith.constant 0 : index
    %c0_89 = arith.constant 0 : index
    %c0_90 = arith.constant 0 : index
    %170 = vector.load %arg21[%c0_88, %c0_89, %c0_90] : memref<8x1x46xf32, #tpu.memory_space<vmem>>, vector<8x1x46xf32>
    tpu.vector_store %arg21[%c0_88, %c0_89, %c0_90], %169 {strides = array<i32>} : memref<8x1x46xf32, #tpu.memory_space<vmem>>, vector<8x1x46xf32>,
    return
  }
  func.func @transform_0(%arg0: i32) -> (i32, i32, i32) {
    %c0_i32 = arith.constant 0 : i32
    %c0_i32_0 = arith.constant 0 : i32
    %c0_i32_1 = arith.constant 0 : i32
    return %arg0, %c0_i32, %c0_i32_0 : i32, i32, i32
  }
  func.func @transform_1(%arg0: i32) -> (i32, i32, i32) {
    %c0_i32 = arith.constant 0 : i32
    %c0_i32_0 = arith.constant 0 : i32
    %c0_i32_1 = arith.constant 0 : i32
    return %arg0, %c0_i32, %c0_i32_0 : i32, i32, i32
  }
  func.func @transform_2(%arg0: i32) -> (i32, i32, i32) {
    %c0_i32 = arith.constant 0 : i32
    %c0_i32_0 = arith.constant 0 : i32
    %c0_i32_1 = arith.constant 0 : i32
    return %arg0, %c0_i32, %c0_i32_0 : i32, i32, i32
  }
  func.func @transform_3(%arg0: i32) -> (i32, i32, i32) {
    %c0_i32 = arith.constant 0 : i32
    %c0_i32_0 = arith.constant 0 : i32
    %c0_i32_1 = arith.constant 0 : i32
    return %arg0, %c0_i32, %c0_i32_0 : i32, i32, i32
  }
  func.func @transform_4(%arg0: i32) -> (i32, i32, i32) {
    %c0_i32 = arith.constant 0 : i32
    %c0_i32_0 = arith.constant 0 : i32
    %c0_i32_1 = arith.constant 0 : i32
    return %arg0, %c0_i32, %c0_i32_0 : i32, i32, i32
  }
  func.func @transform_5(%arg0: i32) -> (i32, i32, i32) {
    %c0_i32 = arith.constant 0 : i32
    %c0_i32_0 = arith.constant 0 : i32
    %c0_i32_1 = arith.constant 0 : i32
    return %arg0, %c0_i32, %c0_i32_0 : i32, i32, i32
  }
  func.func @transform_6(%arg0: i32) -> (i32, i32, i32) {
    %c0_i32 = arith.constant 0 : i32
    %c0_i32_0 = arith.constant 0 : i32
    %c0_i32_1 = arith.constant 0 : i32
    return %arg0, %c0_i32, %c0_i32_0 : i32, i32, i32
  }
  func.func @transform_7(%arg0: i32) -> (i32, i32, i32) {
    %c0_i32 = arith.constant 0 : i32
    %c0_i32_0 = arith.constant 0 : i32
    %c0_i32_1 = arith.constant 0 : i32
    return %arg0, %c0_i32, %c0_i32_0 : i32, i32, i32
  }
  func.func @transform_8(%arg0: i32) -> (i32, i32) {
    %c0_i32 = arith.constant 0 : i32
    %c0_i32_0 = arith.constant 0 : i32
    %c0_i32_1 = arith.constant 0 : i32
    return %c0_i32, %c0_i32_0 : i32, i32
  }
  func.func @transform_9(%arg0: i32) -> (i32, i32) {
    %c0_i32 = arith.constant 0 : i32
    %c0_i32_0 = arith.constant 0 : i32
    %c0_i32_1 = arith.constant 0 : i32
    return %c0_i32, %c0_i32_0 : i32, i32
  }
  func.func @transform_10(%arg0: i32) -> (i32, i32, i32) {
    %c0_i32 = arith.constant 0 : i32
    %c0_i32_0 = arith.constant 0 : i32
    %c0_i32_1 = arith.constant 0 : i32
    %c0_i32_2 = arith.constant 0 : i32
    return %c0_i32, %c0_i32_0, %c0_i32_1 : i32, i32, i32
  }
  func.func @transform_11(%arg0: i32) -> (i32, i32, i32) {
    %c0_i32 = arith.constant 0 : i32
    %c0_i32_0 = arith.constant 0 : i32
    %c0_i32_1 = arith.constant 0 : i32
    %c0_i32_2 = arith.constant 0 : i32
    return %c0_i32, %c0_i32_0, %c0_i32_1 : i32, i32, i32
  }
  func.func @transform_12(%arg0: i32) -> (i32, i32) {
    %c0_i32 = arith.constant 0 : i32
    %c0_i32_0 = arith.constant 0 : i32
    %c0_i32_1 = arith.constant 0 : i32
    return %c0_i32, %c0_i32_0 : i32, i32
  }
  func.func @transform_13(%arg0: i32) -> (i32, i32) {
    %c0_i32 = arith.constant 0 : i32
    %c0_i32_0 = arith.constant 0 : i32
    %c0_i32_1 = arith.constant 0 : i32
    return %c0_i32, %c0_i32_0 : i32, i32
  }
  func.func @transform_14(%arg0: i32) -> (i32, i32) {
    %c0_i32 = arith.constant 0 : i32
    %c0_i32_0 = arith.constant 0 : i32
    %c0_i32_1 = arith.constant 0 : i32
    return %c0_i32, %c0_i32_0 : i32, i32
  }
  func.func @transform_15(%arg0: i32) -> (i32, i32) {
    %c0_i32 = arith.constant 0 : i32
    %c0_i32_0 = arith.constant 0 : i32
    %c0_i32_1 = arith.constant 0 : i32
    return %c0_i32, %c0_i32_0 : i32, i32
  }
  func.func @transform_16(%arg0: i32) -> (i32, i32) {
    %c0_i32 = arith.constant 0 : i32
    %c0_i32_0 = arith.constant 0 : i32
    %c0_i32_1 = arith.constant 0 : i32
    return %c0_i32, %c0_i32_0 : i32, i32
  }
  func.func @transform_17(%arg0: i32) -> (i32, i32) {
    %c0_i32 = arith.constant 0 : i32
    %c0_i32_0 = arith.constant 0 : i32
    %c0_i32_1 = arith.constant 0 : i32
    return %c0_i32, %c0_i32_0 : i32, i32
  }
  func.func @transform_18(%arg0: i32) -> (i32, i32) {
    %c0_i32 = arith.constant 0 : i32
    %c0_i32_0 = arith.constant 0 : i32
    %c0_i32_1 = arith.constant 0 : i32
    return %c0_i32, %c0_i32_0 : i32, i32
  }
  func.func @transform_19(%arg0: i32) -> (i32, i32) {
    %c0_i32 = arith.constant 0 : i32
    %c0_i32_0 = arith.constant 0 : i32
    %c0_i32_1 = arith.constant 0 : i32
    return %c0_i32, %c0_i32_0 : i32, i32
  }
  func.func @transform_20(%arg0: i32) -> (i32, i32, i32) {
    %c0_i32 = arith.constant 0 : i32
    %c0_i32_0 = arith.constant 0 : i32
    %c0_i32_1 = arith.constant 0 : i32
    return %arg0, %c0_i32, %c0_i32_0 : i32, i32, i32
  }
}

</mosaic_0001>

<bundles_post_ra>
// kernel: sat_vscnet_tg_forward.1
= control target key start
LH: loop header
LB: loop body
LE: loop exit
PB: predicated region body
PF: predicated region fallthrough
CT: control target
= control target key end

     0   :  { %s8555_s23 = smov 0   ;;  %s10436_s0 = inlined_call_operand.vmem [shape: bf16[16,16,16], index: 0, kind: input, shape index: {}]   ;;  %s10437_s1 = inlined_call_operand.vmem [shape: bf16[16,16,12], index: 1, kind: input, shape index: {}]   ;;  %s10438_s2 = inlined_call_operand.vmem [shape: s32[16,1,40], index: 2, kind: input, shape index: {}]   ;;  %s10439_s3 = inlined_call_operand.vmem [shape: f32[16,1,16], index: 3, kind: input, shape index: {}]   ;;  %s10440_s4 = inlined_call_operand.vmem [shape: f32[16,1,8], index: 4, kind: input, shape index: {}]   ;;  %s10441_s5 = inlined_call_operand.vmem [shape: bf16[16,8,8], index: 5, kind: input, shape index: {}]   ;;  %s10442_s6 = inlined_call_operand.vmem [shape: bf16[16,8,8], index: 6, kind: input, shape index: {}]   ;;  %s10443_s7 = inlined_call_operand.vmem [shape: f32[16,3,8], index: 7, kind: input, shape index: {}]   ;;  %s10444_s8 = inlined_call_operand.vmem [shape: f32[24,32], index: 8, kind: input, shape index: {}]   ;;  %s10445_s9 = inlined_call_operand.vmem [shape: f32[1,32], index: 9, kind: input, shape index: {}]   ;;  %s10446_s10 = inlined_call_operand.vmem [shape: f32[2,64,32], index: 10, kind: input, shape index: {}]   ;;  %s10447_s11 = inlined_call_operand.vmem [shape: f32[2,1,32], index: 11, kind: input, shape index: {}]   ;;  %s10448_s12 = inlined_call_operand.vmem [shape: f32[32,16], index: 12, kind: input, shape index: {}]   ;;  %s10449_s13 = inlined_call_operand.vmem [shape: f32[1,16], index: 13, kind: input, shape index: {}]   ;;  %s10450_s14 = inlined_call_operand.vmem [shape: f32[16,32], index: 14, kind: input, shape index: {}]   ;;  %s10451_s15 = inlined_call_operand.vmem [shape: f32[1,32], index: 15, kind: input, shape index: {}]   ;;  %s10452_s16 = inlined_call_operand.vmem [shape: f32[1,32], index: 16, kind: input, shape index: {}]   ;;  %s10453_s17 = inlined_call_operand.<no memory space> [shape: f32[1,1], index: 17, kind: input, shape index: {}]   ;;  %s10454_s18 = inlined_call_operand.vmem [shape: f32[16,5], index: 18, kind: input, shape index: {}]   ;;  %s10455_s19 = inlined_call_operand.vmem [shape: f32[1,5], index: 19, kind: input, shape index: {}]   ;;  %s10456_s20 = inlined_call_operand.vmem [shape: f32[16,1,46], index: 20, kind: output, shape index: {}]  }
   0x1   :  { %10471 = sst [smem:[#allocation21_spill]] %s10436_s0  ;;  %v25_v0 = vstv %s10453_s17 }
   0x2   :  { %10472 = sst [smem:[#allocation22_spill]] %s10437_s1  ;;  %26 = vst [vmem:[#allocation2] sm:$0x1] %v25_v0 }
   0x3   :  { %10473 = sst [smem:[#allocation23_spill]] %s10438_s2 }
   0x4   :  { %10474 = sst [smem:[#allocation24_spill]] %s10439_s3 }
   0x5   :  { %10475 = sst [smem:[#allocation25_spill]] %s10440_s4 }
   0x6 LB: > { %s7214_s24 = sadd.s32 4294967295, %s8433_s23   ;;  %p7218_p0 = scmp.ge.s32.totalorder %s8433_s23, 1  ;;  %s8433_s23 = sphi %s8555_s23, %s32_s23  }
   0x7   : > { %p641_p1 = scmp.lt.s32.totalorder %s8433_s23, 3 }
   0x9   : > { %p642_p2 = pnand %p7218_p0, %p641_p1 }
   0xb   : > { %645 = sbr.rel (%p642_p2) target bundleno = 3556 (0xde4), region = 100 }
  0x12   : > { %s7219_s2 = sshll.u32 %s7214_s24, 3  ;;  %v10457_v1 = vmov 0.0   ;;  %vm8436_vm0 = vmmov 0   ;;  %s10476_s26 = sld [smem:[#allocation21_spill]]  ;;  %vm832_vm1 = vcmask 130048   ;;  %v817_v18 = vld [vmem:[%s10444_s8] sm:$0xff] }
  0x13   : > { %7656 = vmatprep.subr.bf16.mxu0 %v10457_v1  ;;  %p733_p3 = scmp.lt.s32.totalorder %s7219_s2, 15  ;;  %7662 = vmatprep.subr.bf16.mxu1 %v10457_v1  ;;  %s10477_s29 = sld [smem:[#allocation22_spill]]  ;;  %v818_v19 = vld [vmem:[%s10444_s8 + $0x8] sm:$0xff]  ;;  %v819_v21 = vld [vmem:[%s10444_s8 + $0x10] sm:$0xff]  ;;  %vm1344_vm2 = vcmask 1043456   ;;  %vm1294_vm3 = vcmask 97280  }
  0x14   : > { %7658 = vmatprep.mubr.msk.bf16.mxu0 %vm8436_vm0, %v10457_v1  ;;  %7664 = vmatprep.mubr.msk.bf16.mxu1 %vm8436_vm0, %v10457_v1  ;;  %v1319_v20 = vpack.c.bf16 %v818_v19, %v817_v18  ;;  %v1320_v22 = vpack.c.bf16 %v819_v21, %v819_v21  ;;  %s8437_s25 = smov 12   ;;  %vm1327_vm4 = vcmask 195584   ;;  %s8438_s4 = smov 32   ;;  %vm1838_vm5 = vcmask 261120  }
  0x15   : > { %s10541_s2 = smov (!%p733_p3, %s7219_s2), 15  ;;  %vm1873_vm6 = vcmask 523264   ;;  %s10478_s0 = sld [smem:[#allocation23_spill]] }
  0x16   : > { %s7459_s17 = sshll.u32 %s10541_s2, 3  ;;  %v1346_v23 = vsel %vm1344_vm2, %v1320_v22, 0  ;;  %s10481_s22 = sld [smem:[#allocation25_spill]] }
  0x18   : > { %s8575_s27 = scalar_lea.vmem %s10476_s26, %s7459_s17  ;;  %s10480_s26 = sld [smem:[#allocation24_spill]] }
  0x19   : > { %s8580_s30 = scalar_lea.vmem %s10477_s29, %s7459_s17  ;;  %v8590_v4 = vld [vmem:[%s8575_s27] sm:$0xff]   ;;  %v8594_v5 = vld [vmem:[%s8575_s27 + $0x8] sm:$0xff]   ;;  %v8614_v8 = vld [vmem:[%s8575_s27 + $0x10] sm:$0xff]   ;;  %s782_s17 = scalar_lea.vmem %s10456_s20, %s10541_s2 }
  0x1a   : > { %v8583_v2 = vld [vmem:[%s8580_s30] sm:$0xff]   ;;  %v8586_v3 = vld [vmem:[%s8580_s30 + $0x8] sm:$0xff]   ;;  %v8598_v6 = vld [vmem:[%s8580_s30 + $0x10] sm:$0xff]  }
  0x1b   : > { %7657 = vmatpush3.bf16.msra.mxu0 %v8583_v2  ;;  %7663 = vmatpush3.bf16.msra.mxu1 %v8586_v3  ;;  %v8607_v7 = vld [vmem:[%s8580_s30 + $0x18] sm:$0xff]   ;;  %v8623_v10 = vld [vmem:[%s8580_s30 + $0x20] sm:$0xff]   ;;  %v8626_v11 = vld [vmem:[%s8580_s30 + $0x28] sm:$0xff]   ;;  %s9015_s21 = scalar_lea.vmem %s10478_s0, %s10541_s2  ;;  %s9543_s0 = sshll.u32 %s10541_s2, 2 }
  0x1c   : > { %7668 = vmatprep.subr.bf16.mxu0 %v10457_v1  ;;  %7674 = vmatprep.subr.bf16.mxu1 %v10457_v1  ;;  %v8619_v9 = vld [vmem:[%s8575_s27 + $0x18] sm:$0xff]   ;;  %v8640_v12 = vld [vmem:[%s8575_s27 + $0x20] sm:$0xff]   ;;  %v8644_v13 = vld [vmem:[%s8575_s27 + $0x28] sm:$0xff]   ;;  %s9261_s24 = scalar_lea.vmem %s10481_s22, %s10541_s2  ;;  %s9549_s22 = scalar_lea.vmem %s10441_s5, %s9543_s0 }
  0x1d   : > { %v8647_v14 = vld [vmem:[%s8580_s30 + $0x30] sm:$0xff]   ;;  %v8650_v15 = vld [vmem:[%s8580_s30 + $0x38] sm:$0xff]   ;;  %s10055_s30 = scalar_lea.vmem %s10443_s7, %s9543_s0 }
  0x1e   : > { %7659 = vmatmul.mubr.msk.bf16.vlgmr.msra.gmra.mrb[0].mxu0 %vm832_vm1, %v8590_v4  ;;  %7665 = vmatmul.mubr.msk.bf16.vlgmr.msra.gmra.mrb[0].mxu1 %vm832_vm1, %v8594_v5  ;;  %v8664_v16 = vld [vmem:[%s8575_s27 + $0x30] sm:$0xff]   ;;  %v8667_v17 = vld [vmem:[%s8575_s27 + $0x38] sm:$0xff]   ;;  %s9190_s27 = scalar_lea.vmem %s10480_s26, %s10541_s2 }
  0x1f   : > { %7669 = vmatpush3.bf16.msra.mxu0 %v8598_v6  ;;  %7670 = vmatprep.mubr.msk.bf16.mxu0 %vm8436_vm0, %v10457_v1 }
  0x20   : > { %7676 = vmatprep.mubr.msk.bf16.mxu1 %vm8436_vm0, %v10457_v1  ;;  %7675 = vmatpush3.bf16.msra.mxu1 %v8607_v7 }
  0x21   : > { %7680 = vmatprep.subr.bf16.mxu0 %v10457_v1  ;;  %7686 = vmatprep.subr.bf16.mxu1 %v10457_v1 }
  0x26   : > { %7671 = vmatmul.mubr.msk.bf16.vlgmr.msra.gmra.mrb[4].mxu0 %vm832_vm1, %v8614_v8  ;;  %7677 = vmatmul.mubr.msk.bf16.vlgmr.msra.gmra.mrb[4].mxu1 %vm832_vm1, %v8619_v9 }
  0x27   : > { %7681 = vmatpush3.bf16.msra.mxu0 %v8623_v10  ;;  %7687 = vmatpush3.bf16.msra.mxu1 %v8626_v11 }
  0x28   : > { %7682 = vmatprep.mubr.msk.bf16.mxu0 %vm8436_vm0, %v10457_v1  ;;  %7688 = vmatprep.mubr.msk.bf16.mxu1 %vm8436_vm0, %v10457_v1 }
  0x29   : > { %7692 = vmatprep.subr.bf16.mxu0 %v10457_v1  ;;  %7698 = vmatprep.subr.bf16.mxu1 %v10457_v1 }
  0x2e   : > { %7683 = vmatmul.mubr.msk.bf16.vlgmr.msra.gmra.mrb[8].mxu0 %vm832_vm1, %v8640_v12  ;;  %7689 = vmatmul.mubr.msk.bf16.vlgmr.msra.gmra.mrb[8].mxu1 %vm832_vm1, %v8644_v13 }
  0x2f   : > { %7693 = vmatpush3.bf16.msra.mxu0 %v8647_v14  ;;  %7699 = vmatpush3.bf16.msra.mxu1 %v8650_v15 }
  0x30   : > { %7694 = vmatprep.mubr.msk.bf16.mxu0 %vm8436_vm0, %v10457_v1  ;;  %7700 = vmatprep.mubr.msk.bf16.mxu1 %vm8436_vm0, %v10457_v1 }
  0x31   : > { %7724 = vmatprep.subr.bf16.mxu1 %v10457_v1  ;;  %7704 = vmatprep.subr.bf16.mxu0 %v1319_v20 }
  0x36   : > { %7695 = vmatmul.mubr.msk.bf16.vlgmr.msra.gmra.mrb[12].mxu0 %vm832_vm1, %v8664_v16  ;;  %7701 = vmatmul.mubr.msk.bf16.vlgmr.msra.gmra.mrb[12].mxu1 %vm832_vm1, %v8667_v17 }
  0x37   : > { %7726 = vmatprep.mubr.msk.bf16.mxu1 %vm8436_vm0, %v10457_v1  ;;  %7705 = vmatpush3.bf16.msra.mxu0 %v1319_v20 }
  0x38   : > { %8192 = vmatprep.subr.msk.bf16.mxu0 %vm1344_vm2, %v1320_v22 }
  0x3b   : > { %7707 = vmatpush3.bf16.msra.mxu0 %v1346_v23 }
  0x3c   : > { %7748 = vmatprep.subr.bf16.mxu0 %v10457_v1 }
  0xf1   : > { %v870_v24 = vpop.f32.mrb[0].mxu0  ;;  %v925_v26 = vpop.f32.mrb[0].mxu1 }
  0xf2   : > { %v7660_v25 = vpop.f32.mrb[1].mxu0  ;;  %v7666_v28 = vpop.f32.mrb[1].mxu1 }
  0xf3   : > { %v873_v27 = vpop.f32.mrb[2].mxu0  ;;  %v928_v31 = vpop.f32.mrb[2].mxu1 }
  0xf4   : > { %v1262_v29 = vpack.c.bf16 %v873_v27, %v870_v24  ;;  %v7661_v30 = vpop.f32.mrb[3].mxu0  ;;  %v1263_v32 = vpack.c.bf16 %v928_v31, %v925_v26  ;;  %v7667_v33 = vpop.f32.mrb[3].mxu1 }
  0xf6   : > { %1278 = vrot.lane.b32.xlu0 %v1262_v29, %s8437_s25 }
  0xf9   : > { %v980_v34 = vpop.f32.mrb[4].mxu0  ;;  %v1035_v36 = vpop.f32.mrb[4].mxu1 }
  0xfa   : > { %1280 = vrot.lane.b32.xlu0 %v1263_v32, %s8437_s25  ;;  %v7672_v35 = vpop.f32.mrb[5].mxu0  ;;  %v7678_v38 = vpop.f32.mrb[5].mxu1 }
  0xfb   : > { %v983_v37 = vpop.f32.mrb[6].mxu0  ;;  %v1038_v40 = vpop.f32.mrb[6].mxu1 }
  0xfc   : > { %v1264_v39 = vpack.c.bf16 %v983_v37, %v980_v34  ;;  %v7673_v41 = vpop.f32.mrb[7].mxu0  ;;  %v1265_v42 = vpack.c.bf16 %v1038_v40, %v1035_v36  ;;  %v7679_v43 = vpop.f32.mrb[7].mxu1 }
  0xfe   : > { %1282 = vrot.lane.b32.xlu1 %v1264_v39, %s8437_s25 }
 0x101   : > { %v1090_v44 = vpop.f32.mrb[8].mxu0  ;;  %v1145_v46 = vpop.f32.mrb[8].mxu1 }
 0x102   : > { %1284 = vrot.lane.b32.xlu1 %v1265_v42, %s8437_s25  ;;  %v7684_v45 = vpop.f32.mrb[9].mxu0  ;;  %v7690_v48 = vpop.f32.mrb[9].mxu1 }
 0x103   : > { %v1093_v47 = vpop.f32.mrb[10].mxu0  ;;  %v1148_v50 = vpop.f32.mrb[10].mxu1 }
 0x104   : > { %v1266_v49 = vpack.c.bf16 %v1093_v47, %v1090_v44  ;;  %v7685_v51 = vpop.f32.mrb[11].mxu0  ;;  %v1267_v52 = vpack.c.bf16 %v1148_v50, %v1145_v46  ;;  %v7691_v53 = vpop.f32.mrb[11].mxu1 }
 0x106   : > { %1286 = vrot.lane.b32.xlu0 %v1266_v49, %s8437_s25  ;;  %1288 = vrot.lane.b32.xlu1 %v1267_v52, %s8437_s25 }
 0x109   : > { %v1200_v54 = vpop.f32.mrb[12].mxu0  ;;  %v1255_v56 = vpop.f32.mrb[12].mxu1 }
 0x10a   : > { %v7696_v55 = vpop.f32.mrb[13].mxu0  ;;  %v7702_v58 = vpop.f32.mrb[13].mxu1 }
 0x10b   : > { %v1203_v57 = vpop.f32.mrb[14].mxu0  ;;  %v1258_v60 = vpop.f32.mrb[14].mxu1 }
 0x10c   : > { %v1268_v59 = vpack.c.bf16 %v1203_v57, %v1200_v54  ;;  %v7697_v61 = vpop.f32.mrb[15].mxu0  ;;  %v1269_v62 = vpack.c.bf16 %v1258_v60, %v1255_v56  ;;  %v7703_v63 = vpop.f32.mrb[15].mxu1 }
 0x10e   : > { %1290 = vrot.lane.b32.xlu0 %v1268_v59, %s8437_s25  ;;  %1292 = vrot.lane.b32.xlu1 %v1269_v62, %s8437_s25 }
 0x168   : > { %v1279_v0 = vpop.permute.xlu0 %1278 }
 0x169   : > { %v1297_v18 = vsel %vm1294_vm3, %v8583_v2, %v1279_v0 }
 0x16a   : > { %7708 = vmatprep.mubr.msk.bf16.mxu0 %vm1327_vm4, %v1297_v18 }
 0x16c   : > { %v1281_v19 = vpop.permute.xlu0 %1280 }
 0x16d   : > { %v1300_v20 = vsel %vm1294_vm3, %v8586_v3, %v1281_v19 }
 0x16e   : > { %7709 = vmatmul.mubr.msk.bf16.vlgmr.msra.gmra.mrb[16].mxu0 %vm1327_vm4, %v1300_v20 }
 0x170   : > { %v1283_v21 = vpop.permute.xlu1 %1282 }
 0x171   : > { %v1303_v22 = vsel %vm1294_vm3, %v8598_v6, %v1283_v21 }
 0x172   : > { %7712 = vmatprep.mubr.msk.bf16.mxu0 %vm1327_vm4, %v1303_v22 }
 0x174   : > { %v1285_v23 = vpop.permute.xlu1 %1284 }
 0x175   : > { %v1306_v24 = vsel %vm1294_vm3, %v8607_v7, %v1285_v23 }
 0x176   : > { %7713 = vmatmul.mubr.msk.bf16.gmra.mrb[20].mxu0 %vm1327_vm4, %v1306_v24 }
 0x178   : > { %v1287_v2 = vpop.permute.xlu0 %1286  ;;  %v1289_v26 = vpop.permute.xlu1 %1288 }
 0x179   : > { %v1309_v25 = vsel %vm1294_vm3, %v8623_v10, %v1287_v2  ;;  %v1312_v3 = vsel %vm1294_vm3, %v8626_v11, %v1289_v26  ;;  %v8722_v10 = vld [vmem:[%s10445_s9] ss:$0 sm:$0xff] }
 0x17a   : > { %7716 = vmatprep.mubr.msk.bf16.mxu0 %vm1327_vm4, %v1309_v25 }
 0x17e   : > { %7717 = vmatmul.mubr.msk.bf16.gmra.mrb[24].mxu0 %vm1327_vm4, %v1312_v3 }
 0x180   : > { %v1291_v6 = vpop.permute.xlu0 %1290  ;;  %v1293_v28 = vpop.permute.xlu1 %1292 }
 0x181   : > { %v1315_v27 = vsel %vm1294_vm3, %v8647_v14, %v1291_v6  ;;  %v1318_v7 = vsel %vm1294_vm3, %v8650_v15, %v1293_v28 }
 0x182   : > { %7720 = vmatprep.mubr.msk.bf16.mxu0 %vm1327_vm4, %v1315_v27 }
 0x186   : > { %7721 = vmatmul.mubr.msk.bf16.gmra.mrb[28].mxu0 %vm1327_vm4, %v1318_v7 }
 0x187   : > { %7750 = vmatprep.mubr.msk.bf16.mxu0 %vm8436_vm0, %v10457_v1 }
 0x241   : > { %v7710_v11 = vpop.f32.mrb[16].mxu0 }
 0x242   : > { %v1391_v29 = vadd.f32 %v7710_v11, %v8722_v10  ;;  %v1382_v14 = vpop.f32.mrb[17].mxu0 }
 0x243   : > { %v1383_v30 = vadd.f32 %v8722_v10, %v1382_v14  ;;  %v7711_v31 = vpop.f32.mrb[18].mxu0  ;;  %v1462_v14 = vld [vmem:[%s10446_s10 + $0x8] sm:$0xff] }
 0x244   : > { %v1394_v32 = vadd.f32 %v7711_v31, %v8722_v10  ;;  %v1385_v15 = vpop.f32.mrb[19].mxu0  ;;  %v1447_v34 = vmax.f32 %v1391_v29, 0.0  ;;  %v1461_v29 = vld [vmem:[%s10446_s10] sm:$0xff] }
 0x245   : > { %v1386_v33 = vadd.f32 %v8722_v10, %v1385_v15  ;;  %v1445_v36 = vmax.f32 %v1383_v30, 0.0  ;;  %v1463_v30 = vld [vmem:[%s10446_s10 + $0x10] sm:$0xff]  ;;  %v1863_v31 = vpack.c.bf16 %v1462_v14, %v1461_v29 }
 0x246   : > { %v1448_v35 = vmax.f32 %v1394_v32, 0.0  ;;  %v1464_v32 = vld [vmem:[%s10446_s10 + $0x18] sm:$0xff] }
 0x247   : > { %v1446_v37 = vmax.f32 %v1386_v33, 0.0  ;;  %v1864_v15 = vpack.c.bf16 %v1464_v32, %v1463_v30  ;;  %v1465_v33 = vld [vmem:[%s10446_s10 + $0x20] sm:$0xff] }
 0x248   : > { %v8728_v38 = vpack.c.bf16 %v1448_v35, %v1447_v34  ;;  %v1466_v34 = vld [vmem:[%s10446_s10 + $0x28] sm:$0xff] }
 0x249   : > { %v8730_v39 = vpack.c.bf16 %v1446_v37, %v1445_v36  ;;  %v7714_v40 = vpop.f32.mrb[20].mxu0  ;;  %v1865_v35 = vpack.c.bf16 %v1466_v34, %v1465_v33  ;;  %v1467_v36 = vld [vmem:[%s10446_s10 + $0x30] sm:$0xff]  ;;  %v1468_v37 = vld [vmem:[%s10446_s10 + $0x38] sm:$0xff] }
 0x24a   : > { %v1407_v41 = vadd.f32 %v7714_v40, %v8722_v10  ;;  %v1398_v42 = vpop.f32.mrb[21].mxu0  ;;  %v1866_v40 = vpack.c.bf16 %v1468_v37, %v1467_v36 }
 0x24b   : > { %7725 = vmatpush3.bf16.msra.mxu1 %v8730_v39  ;;  %v1399_v43 = vadd.f32 %v8722_v10, %v1398_v42  ;;  %v7715_v44 = vpop.f32.mrb[22].mxu0 }
 0x24c   : > { %v1451_v45 = vmax.f32 %v1407_v41, 0.0  ;;  %7730 = vmatprep.subr.bf16.mxu1 %v10457_v1  ;;  %v1410_v46 = vadd.f32 %v7715_v44, %v8722_v10  ;;  %v1401_v47 = vpop.f32.mrb[23].mxu0 }
 0x24d   : > { %v1449_v48 = vmax.f32 %v1399_v43, 0.0  ;;  %v1402_v49 = vadd.f32 %v8722_v10, %v1401_v47 }
 0x24e   : > { %7727 = vmatmul.mubr.msk.bf16.vlgmr.msra.gmra.mrb[16].mxu1 %vm832_vm1, %v8590_v4  ;;  %v1452_v50 = vmax.f32 %v1410_v46, 0.0 }
 0x24f   : > { %7731 = vmatpush3.bf16.msra.mxu1 %v8728_v38  ;;  %v1450_v51 = vmax.f32 %v1402_v49, 0.0  ;;  %7732 = vmatprep.mubr.msk.bf16.mxu1 %vm8436_vm0, %v10457_v1 }
 0x250   : > { %v8743_v52 = vpack.c.bf16 %v1452_v50, %v1451_v45  ;;  %7736 = vmatprep.subr.bf16.mxu1 %v10457_v1 }
 0x251   : > { %v8746_v53 = vpack.c.bf16 %v1450_v51, %v1449_v48  ;;  %v7718_v54 = vpop.f32.mrb[24].mxu0 }
 0x252   : > { %v1423_v55 = vadd.f32 %v7718_v54, %v8722_v10  ;;  %v1414_v56 = vpop.f32.mrb[25].mxu0 }
 0x253   : > { %v1415_v57 = vadd.f32 %v8722_v10, %v1414_v56  ;;  %v7719_v58 = vpop.f32.mrb[26].mxu0 }
 0x254   : > { %v1455_v59 = vmax.f32 %v1423_v55, 0.0  ;;  %v1426_v60 = vadd.f32 %v7719_v58, %v8722_v10  ;;  %v1417_v61 = vpop.f32.mrb[27].mxu0 }
 0x255   : > { %v1453_v62 = vmax.f32 %v1415_v57, 0.0  ;;  %v1418_v63 = vadd.f32 %v8722_v10, %v1417_v61 }
 0x256   : > { %v1456_v0 = vmax.f32 %v1426_v60, 0.0  ;;  %7733 = vmatmul.mubr.msk.bf16.vlgmr.msra.gmra.mrb[20].mxu1 %vm832_vm1, %v8594_v5 }
 0x257   : > { %v1454_v18 = vmax.f32 %v1418_v63, 0.0  ;;  %7737 = vmatpush3.bf16.msra.mxu1 %v8746_v53  ;;  %7738 = vmatprep.mubr.msk.bf16.mxu1 %vm8436_vm0, %v10457_v1 }
 0x258   : > { %v8757_v19 = vpack.c.bf16 %v1456_v0, %v1455_v59  ;;  %7742 = vmatprep.subr.bf16.mxu1 %v10457_v1 }
 0x259   : > { %v8760_v20 = vpack.c.bf16 %v1454_v18, %v1453_v62  ;;  %v7722_v21 = vpop.f32.mrb[28].mxu0 }
 0x25a   : > { %v1439_v22 = vadd.f32 %v7722_v21, %v8722_v10  ;;  %v1430_v23 = vpop.f32.mrb[29].mxu0 }
 0x25b   : > { %v1431_v24 = vadd.f32 %v8722_v10, %v1430_v23  ;;  %v7723_v2 = vpop.f32.mrb[30].mxu0  ;;  %7749 = vmatpush3.bf16.msra.mxu0 %v8760_v20 }
 0x25c   : > { %v1459_v25 = vmax.f32 %v1439_v22, 0.0  ;;  %v1442_v26 = vadd.f32 %v7723_v2, %v8722_v10  ;;  %v1433_v3 = vpop.f32.mrb[31].mxu0  ;;  %7760 = vmatprep.subr.bf16.mxu0 %v10457_v1 }
 0x25d   : > { %v1457_v6 = vmax.f32 %v1431_v24, 0.0  ;;  %v1434_v27 = vadd.f32 %v8722_v10, %v1433_v3 }
 0x25e   : > { %v1460_v28 = vmax.f32 %v1442_v26, 0.0  ;;  %7739 = vmatmul.mubr.msk.bf16.vlgmr.msra.gmra.mrb[24].mxu1 %vm832_vm1, %v8614_v8  ;;  %7751 = vmatmul.mubr.msk.bf16.vlgmr.msra.gmra.mrb[32].mxu0 %vm832_vm1, %v8640_v12 }
 0x25f   : > { %v1458_v7 = vmax.f32 %v1434_v27, 0.0  ;;  %7743 = vmatpush3.bf16.msra.mxu1 %v8743_v52  ;;  %7744 = vmatprep.mubr.msk.bf16.mxu1 %vm8436_vm0, %v10457_v1 }
 0x260   : > { %v8775_v11 = vpack.c.bf16 %v1460_v28, %v1459_v25  ;;  %7762 = vmatprep.mubr.msk.bf16.mxu0 %vm8436_vm0, %v10457_v1  ;;  %7754 = vmatprep.subr.bf16.mxu1 %v10457_v1 }
 0x261   : > { %v8780_v10 = vpack.c.bf16 %v1458_v7, %v1457_v6 }
 0x263   : > { %7761 = vmatpush3.bf16.msra.mxu0 %v8780_v10 }
 0x264   : > { %7772 = vmatprep.subr.bf16.mxu0 %v1863_v31 }
 0x266   : > { %7745 = vmatmul.mubr.msk.bf16.vlgmr.msra.gmra.mrb[28].mxu1 %vm832_vm1, %v8619_v9  ;;  %7763 = vmatmul.mubr.msk.bf16.vlgmr.msra.gmra.mrb[36].mxu0 %vm832_vm1, %v8664_v16 }
 0x267   : > { %7755 = vmatpush3.bf16.msra.mxu1 %v8757_v19  ;;  %7756 = vmatprep.mubr.msk.bf16.mxu1 %vm8436_vm0, %v10457_v1 }
 0x268   : > { %7766 = vmatprep.subr.bf16.mxu1 %v10457_v1  ;;  %7773 = vmatpush3.bf16.msra.mxu0 %v1863_v31 }
 0x269   : > { %7774 = vmatprep.subr.bf16.mxu0 %v1864_v15 }
 0x26c   : > { %7775 = vmatpush3.bf16.msra.mxu0 %v1864_v15 }
 0x26d   : > { %7776 = vmatprep.subr.bf16.mxu0 %v1865_v35 }
 0x26e   : > { %7757 = vmatmul.mubr.msk.bf16.vlgmr.msra.gmra.mrb[32].mxu1 %vm832_vm1, %v8644_v13 }
 0x26f   : > { %7767 = vmatpush3.bf16.msra.mxu1 %v8775_v11  ;;  %7768 = vmatprep.mubr.msk.bf16.mxu1 %vm8436_vm0, %v10457_v1 }
 0x270   : > { %7796 = vmatprep.subr.bf16.mxu1 %v10457_v1  ;;  %7777 = vmatpush3.bf16.msra.mxu0 %v1865_v35 }
 0x271   : > { %7778 = vmatprep.subr.bf16.mxu0 %v1866_v40 }
 0x274   : > { %7779 = vmatpush3.bf16.msra.mxu0 %v1866_v40 }
 0x275   : > { %7826 = vmatprep.subr.bf16.mxu0 %v10457_v1 }
 0x276   : > { %7769 = vmatmul.mubr.msk.bf16.vlgmr.msra.gmra.mrb[36].mxu1 %vm832_vm1, %v8667_v17 }
 0x277   : > { %7798 = vmatprep.mubr.msk.bf16.mxu1 %vm8436_vm0, %v10457_v1 }
 0x321   : > { %v1512_v41 = vpop.f32.mrb[16].mxu1 }
 0x322   : > { %v7728_v42 = vpop.f32.mrb[17].mxu1 }
 0x323   : > { %v1515_v43 = vpop.f32.mrb[18].mxu1 }
 0x324   : > { %v1806_v44 = vpack.c.bf16 %v1515_v43, %v1512_v41  ;;  %v7729_v45 = vpop.f32.mrb[19].mxu1 }
 0x326   : > { %1822 = vrot.lane.b32.xlu0 %v1806_v44, %s8438_s4 }
 0x329   : > { %v1553_v46 = vpop.f32.mrb[20].mxu1 }
 0x32a   : > { %v7734_v47 = vpop.f32.mrb[21].mxu1 }
 0x32b   : > { %v1556_v48 = vpop.f32.mrb[22].mxu1 }
 0x32c   : > { %v1807_v49 = vpack.c.bf16 %v1556_v48, %v1553_v46  ;;  %v7735_v50 = vpop.f32.mrb[23].mxu1 }
 0x32e   : > { %1824 = vrot.lane.b32.xlu1 %v1807_v49, %s8438_s4 }
 0x331   : > { %v1594_v51 = vpop.f32.mrb[24].mxu1  ;;  %v1676_v54 = vpop.f32.mrb[32].mxu0 }
 0x332   : > { %v7740_v55 = vpop.f32.mrb[25].mxu1  ;;  %v7752_v56 = vpop.f32.mrb[33].mxu0 }
 0x333   : > { %v1597_v57 = vpop.f32.mrb[26].mxu1  ;;  %v1679_v58 = vpop.f32.mrb[34].mxu0 }
 0x334   : > { %v1808_v59 = vpack.c.bf16 %v1597_v57, %v1594_v51  ;;  %v1810_v60 = vpack.c.bf16 %v1679_v58, %v1676_v54  ;;  %v7741_v61 = vpop.f32.mrb[27].mxu1  ;;  %v7753_v62 = vpop.f32.mrb[35].mxu0 }
 0x336   : > { %1826 = vrot.lane.b32.xlu0 %v1808_v59, %s8438_s4 }
 0x339   : > { %v1635_v63 = vpop.f32.mrb[28].mxu1  ;;  %v1758_v0 = vpop.f32.mrb[36].mxu0 }
 0x33a   : > { %v7764_v18 = vpop.f32.mrb[37].mxu0  ;;  %1830 = vrot.lane.b32.xlu0 %v1810_v60, %s8438_s4  ;;  %v7746_v21 = vpop.f32.mrb[29].mxu1 }
 0x33b   : > { %v1638_v22 = vpop.f32.mrb[30].mxu1  ;;  %v1761_v23 = vpop.f32.mrb[38].mxu0 }
 0x33c   : > { %v1809_v24 = vpack.c.bf16 %v1638_v22, %v1635_v63  ;;  %v1812_v2 = vpack.c.bf16 %v1761_v23, %v1758_v0  ;;  %v7747_v25 = vpop.f32.mrb[31].mxu1  ;;  %v7765_v26 = vpop.f32.mrb[39].mxu0 }
 0x33e   : > { %1834 = vrot.lane.b32.xlu0 %v1812_v2, %s8438_s4  ;;  %1828 = vrot.lane.b32.xlu1 %v1809_v24, %s8438_s4 }
 0x341   : > { %v1717_v3 = vpop.f32.mrb[32].mxu1 }
 0x342   : > { %v7758_v6 = vpop.f32.mrb[33].mxu1 }
 0x343   : > { %v1720_v27 = vpop.f32.mrb[34].mxu1 }
 0x344   : > { %v1811_v28 = vpack.c.bf16 %v1720_v27, %v1717_v3  ;;  %v7759_v7 = vpop.f32.mrb[35].mxu1 }
 0x346   : > { %1832 = vrot.lane.b32.xlu1 %v1811_v28, %s8438_s4 }
 0x349   : > { %v1799_v29 = vpop.f32.mrb[36].mxu1 }
 0x34a   : > { %v7770_v14 = vpop.f32.mrb[37].mxu1 }
 0x34b   : > { %v1802_v30 = vpop.f32.mrb[38].mxu1 }
 0x34c   : > { %v1813_v31 = vpack.c.bf16 %v1802_v30, %v1799_v29  ;;  %v7771_v32 = vpop.f32.mrb[39].mxu1 }
 0x34e   : > { %1836 = vrot.lane.b32.xlu1 %v1813_v31, %s8438_s4 }
 0x398   : > { %v1823_v15 = vpop.permute.xlu0 %1822 }
 0x399   : > { %v1841_v33 = vsel %vm1838_vm5, %v8730_v39, %v1823_v15 }
 0x39a   : > { %7780 = vmatprep.mubr.msk.bf16.mxu0 %vm1873_vm6, %v1841_v33 }
 0x3a0   : > { %v1825_v34 = vpop.permute.xlu1 %1824 }
 0x3a1   : > { %v1844_v35 = vsel %vm1838_vm5, %v8728_v38, %v1825_v34 }
 0x3a2   : > { %7781 = vmatmul.mubr.msk.bf16.vlgmr.msra.gmra.mrb[40].mxu0 %vm1873_vm6, %v1844_v35 }
 0x3a8   : > { %v1827_v36 = vpop.permute.xlu0 %1826 }
 0x3a9   : > { %v1847_v37 = vsel %vm1838_vm5, %v8746_v53, %v1827_v36 }
 0x3aa   : > { %7784 = vmatprep.mubr.msk.bf16.mxu0 %vm1873_vm6, %v1847_v37 }
 0x3ac   : > { %v1831_v40 = vpop.permute.xlu0 %1830 }
 0x3ad   : > { %v1853_v39 = vsel %vm1838_vm5, %v8760_v20, %v1831_v40 }
 0x3b0   : > { %v1829_v41 = vpop.permute.xlu1 %1828  ;;  %v1835_v38 = vpop.permute.xlu0 %1834 }
 0x3b1   : > { %v1850_v42 = vsel %vm1838_vm5, %v8743_v52, %v1829_v41  ;;  %v1859_v53 = vsel %vm1838_vm5, %v8780_v10, %v1835_v38 }
 0x3b2   : > { %7785 = vmatmul.mubr.msk.bf16.gmra.mrb[44].mxu0 %vm1873_vm6, %v1850_v42 }
 0x3b3   : > { %7788 = vmatprep.mubr.msk.bf16.mxu0 %vm1873_vm6, %v1853_v39 }
 0x3b8   : > { %v1833_v43 = vpop.permute.xlu1 %1832 }
 0x3b9   : > { %v1856_v44 = vsel %vm1838_vm5, %v8757_v19, %v1833_v43  ;;  %v8863_v19 = vld [vmem:[%s10447_s11] ss:$0 sm:$0xff] }
 0x3ba   : > { %7789 = vmatmul.mubr.msk.bf16.gmra.mrb[48].mxu0 %vm1873_vm6, %v1856_v44 }
 0x3bb   : > { %7792 = vmatprep.mubr.msk.bf16.mxu0 %vm1873_vm6, %v1859_v53 }
 0x3c0   : > { %v1837_v52 = vpop.permute.xlu1 %1836 }
 0x3c1   : > { %v1862_v20 = vsel %vm1838_vm5, %v8775_v11, %v1837_v52  ;;  %v7286_v52 = vld [vmem:[%s10446_s10 + $0x48] sm:$0xff] }
 0x3c2   : > { %7793 = vmatmul.mubr.msk.bf16.gmra.mrb[52].mxu0 %vm1873_vm6, %v1862_v20  ;;  %v7288_v20 = vld [vmem:[%s10446_s10 + $0x58] sm:$0xff] }
 0x3c3   : > { %7828 = vmatprep.mubr.msk.bf16.mxu0 %vm8436_vm0, %v10457_v1 }
 0x475   : > { %v7782_v45 = vpop.f32.mrb[40].mxu0 }
 0x476   : > { %v1933_v10 = vadd.f32 %v7782_v45, %v8863_v19  ;;  %v1924_v46 = vpop.f32.mrb[41].mxu0  ;;  %v7290_v45 = vld [vmem:[%s10446_s10 + $0x68] sm:$0xff] }
 0x477   : > { %v1925_v47 = vadd.f32 %v8863_v19, %v1924_v46  ;;  %v7783_v48 = vpop.f32.mrb[42].mxu0  ;;  %v7291_v46 = vld [vmem:[%s10446_s10 + $0x70] sm:$0xff] }
 0x478   : > { %v1936_v49 = vadd.f32 %v7783_v48, %v8863_v19  ;;  %v1927_v11 = vpop.f32.mrb[43].mxu0  ;;  %v1989_v51 = vmax.f32 %v1933_v10, 0.0 }
 0x479   : > { %v1928_v50 = vadd.f32 %v8863_v19, %v1927_v11  ;;  %v1987_v55 = vmax.f32 %v1925_v47, 0.0  ;;  %v7292_v47 = vld [vmem:[%s10446_s10 + $0x78] sm:$0xff] }
 0x47a   : > { %v1990_v54 = vmax.f32 %v1936_v49, 0.0  ;;  %v2409_v48 = vpack.c.bf16 %v7292_v47, %v7291_v46  ;;  %v2556_v46 = vld [vmem:[%s10448_s12 + $0x18] sm:$0xff] }
 0x47b   : > { %v1988_v56 = vmax.f32 %v1928_v50, 0.0 }
 0x47c   : > { %v8869_v57 = vpack.c.bf16 %v1990_v54, %v1989_v51 }
 0x47d   : > { %v8871_v58 = vpack.c.bf16 %v1988_v56, %v1987_v55 }
 0x47f   : > { %7797 = vmatpush3.bf16.msra.mxu1 %v8871_v58 }
 0x480   : > { %7802 = vmatprep.subr.bf16.mxu1 %v10457_v1 }
 0x482   : > { %7799 = vmatmul.mubr.msk.bf16.vlgmr.msra.gmra.mrb[40].mxu1 %vm832_vm1, %v8590_v4 }
 0x483   : > { %7803 = vmatpush3.bf16.msra.mxu1 %v8869_v57  ;;  %7804 = vmatprep.mubr.msk.bf16.mxu1 %vm8436_vm0, %v10457_v1 }
 0x484   : > { %7808 = vmatprep.subr.bf16.mxu1 %v10457_v1 }
 0x485   : > { %v7786_v59 = vpop.f32.mrb[44].mxu0 }
 0x486   : > { %v1949_v60 = vadd.f32 %v7786_v59, %v8863_v19  ;;  %v1940_v61 = vpop.f32.mrb[45].mxu0 }
 0x487   : > { %v1941_v62 = vadd.f32 %v8863_v19, %v1940_v61  ;;  %v7787_v63 = vpop.f32.mrb[46].mxu0 }
 0x488   : > { %v1952_v0 = vadd.f32 %v7787_v63, %v8863_v19  ;;  %v1943_v18 = vpop.f32.mrb[47].mxu0  ;;  %v1993_v4 = vmax.f32 %v1949_v60, 0.0 }
 0x489   : > { %v1944_v21 = vadd.f32 %v8863_v19, %v1943_v18  ;;  %v1991_v23 = vmax.f32 %v1941_v62, 0.0 }
 0x48a   : > { %v1994_v22 = vmax.f32 %v1952_v0, 0.0  ;;  %7805 = vmatmul.mubr.msk.bf16.vlgmr.msra.gmra.mrb[44].mxu1 %vm832_vm1, %v8594_v5 }
 0x48b   : > { %v1992_v24 = vmax.f32 %v1944_v21, 0.0  ;;  %7810 = vmatprep.mubr.msk.bf16.mxu1 %vm8436_vm0, %v10457_v1 }
 0x48c   : > { %v8889_v2 = vpack.c.bf16 %v1994_v22, %v1993_v4 }
 0x48d   : > { %v8891_v25 = vpack.c.bf16 %v1992_v24, %v1991_v23  ;;  %v7790_v26 = vpop.f32.mrb[48].mxu0 }
 0x48e   : > { %v1965_v3 = vadd.f32 %v7790_v26, %v8863_v19  ;;  %v1956_v6 = vpop.f32.mrb[49].mxu0 }
 0x48f   : > { %v1957_v27 = vadd.f32 %v8863_v19, %v1956_v6  ;;  %v7791_v28 = vpop.f32.mrb[50].mxu0  ;;  %7809 = vmatpush3.bf16.msra.mxu1 %v8891_v25 }
 0x490   : > { %v1968_v5 = vadd.f32 %v7791_v28, %v8863_v19  ;;  %v1959_v7 = vpop.f32.mrb[51].mxu0  ;;  %7814 = vmatprep.subr.bf16.mxu1 %v10457_v1  ;;  %v1997_v14 = vmax.f32 %v1965_v3, 0.0 }
 0x491   : > { %v1960_v29 = vadd.f32 %v8863_v19, %v1959_v7  ;;  %v1995_v31 = vmax.f32 %v1957_v27, 0.0 }
 0x492   : > { %v1998_v30 = vmax.f32 %v1968_v5, 0.0  ;;  %7811 = vmatmul.mubr.msk.bf16.vlgmr.msra.gmra.mrb[48].mxu1 %vm832_vm1, %v8614_v8 }
 0x493   : > { %v1996_v32 = vmax.f32 %v1960_v29, 0.0  ;;  %7815 = vmatpush3.bf16.msra.mxu1 %v8889_v2  ;;  %7816 = vmatprep.mubr.msk.bf16.mxu1 %vm8436_vm0, %v10457_v1 }
 0x494   : > { %v8904_v15 = vpack.c.bf16 %v1998_v30, %v1997_v14  ;;  %7820 = vmatprep.subr.bf16.mxu1 %v10457_v1 }
 0x495   : > { %v8907_v33 = vpack.c.bf16 %v1996_v32, %v1995_v31  ;;  %v7794_v34 = vpop.f32.mrb[52].mxu0 }
 0x496   : > { %v1981_v35 = vadd.f32 %v7794_v34, %v8863_v19  ;;  %v1972_v36 = vpop.f32.mrb[53].mxu0  ;;  %7827 = vmatpush3.bf16.msra.mxu0 %v8904_v15 }
 0x497   : > { %v1973_v8 = vadd.f32 %v8863_v19, %v1972_v36  ;;  %v7795_v37 = vpop.f32.mrb[54].mxu0  ;;  %7838 = vmatprep.subr.bf16.mxu0 %v10457_v1 }
 0x498   : > { %v1984_v40 = vadd.f32 %v7795_v37, %v8863_v19  ;;  %v1975_v41 = vpop.f32.mrb[55].mxu0  ;;  %v2001_v39 = vmax.f32 %v1981_v35, 0.0 }
 0x499   : > { %v1976_v42 = vadd.f32 %v8863_v19, %v1975_v41  ;;  %7829 = vmatmul.mubr.msk.bf16.vlgmr.msra.gmra.mrb[56].mxu0 %vm832_vm1, %v8644_v13  ;;  %v1999_v43 = vmax.f32 %v1973_v8, 0.0 }
 0x49a   : > { %v2002_v38 = vmax.f32 %v1984_v40, 0.0  ;;  %7817 = vmatmul.mubr.msk.bf16.vlgmr.msra.gmra.mrb[52].mxu1 %vm832_vm1, %v8619_v9  ;;  %7840 = vmatprep.mubr.msk.bf16.mxu0 %vm8436_vm0, %v10457_v1  ;;  %v7285_v9 = vld [vmem:[%s10446_s10 + $0x40] sm:$0xff] }
 0x49b   : > { %v2000_v44 = vmax.f32 %v1976_v42, 0.0  ;;  %7821 = vmatpush3.bf16.msra.mxu1 %v8907_v33  ;;  %7822 = vmatprep.mubr.msk.bf16.mxu1 %vm8436_vm0, %v10457_v1 }
 0x49c   : > { %v8924_v53 = vpack.c.bf16 %v2002_v38, %v2001_v39  ;;  %7832 = vmatprep.subr.bf16.mxu1 %v10457_v1 }
 0x49d   : > { %v8927_v13 = vpack.c.bf16 %v2000_v44, %v1999_v43 }
 0x49e   : > { %7839 = vmatpush3.bf16.msra.mxu0 %v8924_v53 }
 0x4a1   : > { %7841 = vmatmul.mubr.msk.bf16.vlgmr.msra.gmra.mrb[60].mxu0 %vm832_vm1, %v8667_v17  ;;  %v2406_v17 = vpack.c.bf16 %v7286_v52, %v7285_v9 }
 0x4a2   : > { %7823 = vmatmul.mubr.msk.bf16.vlgmr.msra.gmra.mrb[56].mxu1 %vm832_vm1, %v8640_v12  ;;  %v7287_v12 = vld [vmem:[%s10446_s10 + $0x50] sm:$0xff] }
 0x4a3   : > { %7833 = vmatpush3.bf16.msra.mxu1 %v8927_v13  ;;  %7834 = vmatprep.mubr.msk.bf16.mxu1 %vm8436_vm0, %v10457_v1  ;;  %v2407_v19 = vpack.c.bf16 %v7288_v20, %v7287_v12 }
 0x4a4   : > { %7844 = vmatprep.subr.bf16.mxu1 %v2406_v17 }
 0x4aa   : > { %7835 = vmatmul.mubr.msk.bf16.vlgmr.msra.gmra.mrb[60].mxu1 %vm832_vm1, %v8664_v16  ;;  %v7289_v16 = vld [vmem:[%s10446_s10 + $0x60] sm:$0xff] }
 0x4ab   : > { %7845 = vmatpush3.bf16.msra.mxu1 %v2406_v17  ;;  %v2408_v10 = vpack.c.bf16 %v7290_v45, %v7289_v16 }
 0x4ac   : > { %7846 = vmatprep.subr.bf16.mxu1 %v2407_v19 }
 0x4af   : > { %7847 = vmatpush3.bf16.msra.mxu1 %v2407_v19 }
 0x4b0   : > { %7848 = vmatprep.subr.bf16.mxu1 %v2408_v10 }
 0x4b3   : > { %7849 = vmatpush3.bf16.msra.mxu1 %v2408_v10 }
 0x4b4   : > { %7850 = vmatprep.subr.bf16.mxu1 %v2409_v48 }
 0x4b7   : > { %7851 = vmatpush3.bf16.msra.mxu1 %v2409_v48  ;;  %v2703_v48 = vlaneseq }
 0x4b8   : > { %7902 = vmatprep.subr.bf16.mxu1 %v10457_v1 }
 0x555   : > { %v2056_v49 = vpop.f32.mrb[40].mxu1 }
 0x556   : > { %v7800_v11 = vpop.f32.mrb[41].mxu1 }
 0x557   : > { %v2059_v50 = vpop.f32.mrb[42].mxu1  ;;  %v7320_v11 = vld [vmem:[%s9015_s21] ss:$0 sm:$0xff] }
 0x558   : > { %v2350_v51 = vpack.c.bf16 %v2059_v50, %v2056_v49  ;;  %v7801_v54 = vpop.f32.mrb[43].mxu1  ;;  %v7321_v49 = vld [vmem:[%s9015_s21 + $0x1] ss:$0 sm:$0xff]  ;;  %v9020_v50 = vshrl.u32 %v2703_v48, 7 }
 0x55a   : > { %2366 = vrot.lane.b32.xlu0 %v2350_v51, %s8438_s4  ;;  %10479 = vst [vmem:[#allocation3_spill] sm:$0xff] %v9020_v50  ;;  %v2705_v51 = vadd.s32 8, %v9020_v50  ;;  %vm2740_vm7 = vcmp.eq.s32.totalorder %v7321_v49, %v9020_v50  ;;  %vm2738_vm8 = vcmp.eq.s32.totalorder %v7320_v11, %v9020_v50 }
 0x55b   : > { %v7330_v54 = vsel %vm2740_vm7, 1.0, %v10457_v1 }
 0x55c   : > { %vm2741_vm9 = vcmp.eq.s32.totalorder %v7321_v49, %v2705_v51  ;;  %vm2739_vm10 = vcmp.eq.s32.totalorder %v7320_v11, %v2705_v51 }
 0x55d   : > { %v2097_v55 = vpop.f32.mrb[44].mxu1 }
 0x55e   : > { %v7806_v56 = vpop.f32.mrb[45].mxu1 }
 0x55f   : > { %v2100_v59 = vpop.f32.mrb[46].mxu1  ;;  %v7323_v56 = vld [vmem:[%s9015_s21 + $0x3] ss:$0 sm:$0xff] }
 0x560   : > { %v2351_v60 = vpack.c.bf16 %v2100_v59, %v2097_v55  ;;  %v7807_v61 = vpop.f32.mrb[47].mxu1  ;;  %v7328_v55 = vsel %vm2738_vm8, 1.0, %v10457_v1  ;;  %v7322_v59 = vld [vmem:[%s9015_s21 + $0x2] ss:$0 sm:$0xff]  ;;  %vm2744_vm11 = vcmp.eq.s32.totalorder %v7323_v56, %v9020_v50  ;;  %vm2745_vm12 = vcmp.eq.s32.totalorder %v7323_v56, %v2705_v51 }
 0x561   : > { %v7329_v61 = vsel %vm2739_vm10, 1.0, %v10457_v1  ;;  %vm2742_vm13 = vcmp.eq.s32.totalorder %v7322_v59, %v9020_v50  ;;  %vm2743_vm14 = vcmp.eq.s32.totalorder %v7322_v59, %v2705_v51 }
 0x562   : > { %2368 = vrot.lane.b32.xlu1 %v2351_v60, %s8438_s4  ;;  %v7331_v60 = vsel %vm2741_vm9, 1.0, %v10457_v1 }
 0x565   : > { %v2138_v62 = vpop.f32.mrb[48].mxu1 }
 0x566   : > { %v7812_v63 = vpop.f32.mrb[49].mxu1 }
 0x567   : > { %v2141_v0 = vpop.f32.mrb[50].mxu1  ;;  %v2786_v63 = vpack.c.bf16 %v7329_v61, %v7328_v55 }
 0x568   : > { %v2352_v18 = vpack.c.bf16 %v2141_v0, %v2138_v62  ;;  %v7813_v21 = vpop.f32.mrb[51].mxu1  ;;  %v2787_v62 = vpack.c.bf16 %v7331_v60, %v7330_v54  ;;  %v7334_v0 = vsel %vm2744_vm11, 1.0, %v10457_v1  ;;  %vm4358_vm11 = vcmask 122880  }
 0x569   : > { %v7332_v21 = vsel %vm2742_vm13, 1.0, %v10457_v1  ;;  %vm4797_vm13 = vcmask 1042434  }
 0x56a   : > { %2370 = vrot.lane.b32.xlu0 %v2352_v18, %s8438_s4  ;;  %v7335_v18 = vsel %vm2745_vm12, 1.0, %v10457_v1  ;;  %vm4794_vm12 = vcmask 1041409  }
 0x56c   : > { %v2261_v4 = vpop.f32.mrb[56].mxu0 }
 0x56d   : > { %v2179_v22 = vpop.f32.mrb[52].mxu1  ;;  %v7830_v23 = vpop.f32.mrb[57].mxu0 }
 0x56e   : > { %v7818_v24 = vpop.f32.mrb[53].mxu1  ;;  %v2264_v26 = vpop.f32.mrb[58].mxu0 }
 0x56f   : > { %v2182_v3 = vpop.f32.mrb[54].mxu1  ;;  %v2355_v6 = vpack.c.bf16 %v2264_v26, %v2261_v4  ;;  %v7831_v27 = vpop.f32.mrb[59].mxu0  ;;  %v7333_v4 = vsel %vm2743_vm14, 1.0, %v10457_v1  ;;  %v7325_v24 = vld [vmem:[%s9015_s21 + $0x5] ss:$0 sm:$0xff]  ;;  %vm4800_vm14 = vcmask 1043459  }
 0x570   : > { %v2353_v28 = vpack.c.bf16 %v2182_v3, %v2179_v22  ;;  %v7819_v5 = vpop.f32.mrb[55].mxu1  ;;  %v2789_v22 = vpack.c.bf16 %v7335_v18, %v7334_v0  ;;  %v2788_v23 = vpack.c.bf16 %v7333_v4, %v7332_v21  ;;  %v7324_v26 = vld [vmem:[%s9015_s21 + $0x4] ss:$0 sm:$0xff]  ;;  %vm2748_vm15 = vcmp.eq.s32.totalorder %v7325_v24, %v9020_v50 }
 0x571   : > { %vm2749_vm2 = vcmp.eq.s32.totalorder %v7325_v24, %v2705_v51  ;;  %vm2746_vm3 = vcmp.eq.s32.totalorder %v7324_v26, %v9020_v50  ;;  %v7338_v3 = vsel %vm2748_vm15, 1.0, %v10457_v1  ;;  %vm4803_vm15 = vcmask 1044484  }
 0x572   : > { %2372 = vrot.lane.b32.xlu1 %v2353_v28, %s8438_s4  ;;  %v7336_v27 = vsel %vm2746_vm3, 1.0, %v10457_v1  ;;  %vm4809_vm3 = vcmask 1046534  }
 0x574   : > { %v2343_v7 = vpop.f32.mrb[60].mxu0 }
 0x575   : > { %v2220_v29 = vpop.f32.mrb[56].mxu1  ;;  %v7842_v14 = vpop.f32.mrb[61].mxu0 }
 0x576   : > { %2376 = vrot.lane.b32.xlu1 %v2355_v6, %s8438_s4  ;;  %v7824_v30 = vpop.f32.mrb[57].mxu1  ;;  %v2346_v31 = vpop.f32.mrb[62].mxu0  ;;  %v7339_v6 = vsel %vm2749_vm2, 1.0, %v10457_v1  ;;  %v7326_v14 = vld [vmem:[%s9015_s21 + $0x6] ss:$0 sm:$0xff]  ;;  %vm4806_vm2 = vcmask 1045509  }
 0x577   : > { %v2223_v32 = vpop.f32.mrb[58].mxu1  ;;  %v2357_v34 = vpack.c.bf16 %v2346_v31, %v2343_v7  ;;  %v7843_v35 = vpop.f32.mrb[63].mxu0  ;;  %v2791_v5 = vpack.c.bf16 %v7339_v6, %v7338_v3  ;;  %vm2750_vm9 = vcmp.eq.s32.totalorder %v7326_v14, %v9020_v50  ;;  %vm2751_vm10 = vcmp.eq.s32.totalorder %v7326_v14, %v2705_v51 }
 0x578   : > { %v2354_v36 = vpack.c.bf16 %v2223_v32, %v2220_v29  ;;  %v7825_v8 = vpop.f32.mrb[59].mxu1  ;;  %v7327_v29 = vld [vmem:[%s9015_s21 + $0x7] ss:$0 sm:$0xff]  ;;  %v7340_v32 = vsel %vm2750_vm9, 1.0, %v10457_v1  ;;  %s8444_s21 = smov 24   ;;  %vm7018_vm9 = vcmask 326656  }
 0x579   : > { %vm2752_vm7 = vcmp.eq.s32.totalorder %v7327_v29, %v9020_v50  ;;  %vm2753_vm8 = vcmp.eq.s32.totalorder %v7327_v29, %v2705_v51  ;;  %v7302_v8 = vld [vmem:[%s10447_s11 + $0x1] ss:$0 sm:$0xff] }
 0x57a   : > { %2380 = vrot.lane.b32.xlu1 %v2357_v34, %s8438_s4  ;;  %2374 = vrot.lane.b32.xlu0 %v2354_v36, %s8438_s4  ;;  %v7342_v30 = vsel %vm2752_vm7, 1.0, %v10457_v1  ;;  %v7343_v31 = vsel %vm2753_vm8, 1.0, %v10457_v1  ;;  %v7341_v34 = vsel %vm2751_vm10, 1.0, %v10457_v1  ;;  %vm4970_vm7 = vcmask 64512  }
 0x57b   : > { %v2793_v35 = vpack.c.bf16 %v7343_v31, %v7342_v30  ;;  %v2792_v36 = vpack.c.bf16 %v7341_v34, %v7340_v32  ;;  %v9069_v34 = vld [vmem:[%s10449_s13] ss:$0 sm:$0xff]  ;;  %vm4858_vm8 = vcmask 39936   ;;  %vm7020_vm10 = vcmask 367616  }
 0x57d   : > { %v2302_v37 = vpop.f32.mrb[60].mxu1 }
 0x57e   : > { %v7836_v40 = vpop.f32.mrb[61].mxu1 }
 0x57f   : > { %v2305_v41 = vpop.f32.mrb[62].mxu1 }
 0x580   : > { %v2356_v42 = vpack.c.bf16 %v2305_v41, %v2302_v37  ;;  %v7837_v39 = vpop.f32.mrb[63].mxu1 }
 0x582   : > { %2378 = vrot.lane.b32.xlu0 %v2356_v42, %s8438_s4 }
 0x59d   : > { %2875 = vxpose.xlu1.c.b16.start.end [1/1] (short) (narrow) %v2787_v62, 48 }
 0x5a0   : > { %2794 = vxpose.xlu0.c.b16.start.end [1/1] (short) (narrow) %v2786_v63, 48 }
 0x5a6   : > { %3037 = vxpose.xlu1.c.b16.start.end [1/1] (short) (narrow) %v2789_v22, 48 }
 0x5a9   : > { %2956 = vxpose.xlu0.c.b16.start.end [1/1] (short) (narrow) %v2788_v23, 48 }
 0x5af   : > { %3199 = vxpose.xlu1.c.b16.start.end [1/1] (short) (narrow) %v2791_v5, 48 }
 0x5b8   : > { %3361 = vxpose.xlu1.c.b16.start.end [1/1] (short) (narrow) %v2793_v35, 48 }
 0x5cc   : > { %v2367_v38 = vpop.permute.xlu0 %2366 }
 0x5cd   : > { %v2384_v43 = vsel %vm1838_vm5, %v8871_v58, %v2367_v38 }
 0x5ce   : > { %7852 = vmatprep.mubr.msk.bf16.mxu1 %vm1873_vm6, %v2384_v43 }
 0x5d4   : > { %v2369_v44 = vpop.permute.xlu1 %2368 }
 0x5d5   : > { %v2387_v9 = vsel %vm1838_vm5, %v8869_v57, %v2369_v44 }
 0x5d6   : > { %7853 = vmatmul.mubr.msk.bf16.vlgmr.msra.gmra.mrb[64].mxu1 %vm1873_vm6, %v2387_v9 }
 0x5dc   : > { %v2371_v52 = vpop.permute.xlu0 %2370 }
 0x5dd   : > { %v2390_v12 = vsel %vm1838_vm5, %v8891_v25, %v2371_v52 }
 0x5de   : > { %7856 = vmatprep.mubr.msk.bf16.mxu1 %vm1873_vm6, %v2390_v12 }
 0x5e4   : > { %v2373_v17 = vpop.permute.xlu1 %2372 }
 0x5e5   : > { %v2393_v20 = vsel %vm1838_vm5, %v8889_v2, %v2373_v17 }
 0x5e6   : > { %7857 = vmatmul.mubr.msk.bf16.gmra.mrb[68].mxu1 %vm1873_vm6, %v2393_v20 }
 0x5e8   : > { %v2377_v58 = vpop.permute.xlu1 %2376 }
 0x5e9   : > { %v2399_v57 = vsel %vm1838_vm5, %v8904_v15, %v2377_v58  ;;  %v2553_v15 = vld [vmem:[%s10448_s12] sm:$0xff] }
 0x5ec   : > { %v2375_v19 = vpop.permute.xlu0 %2374  ;;  %v2381_v25 = vpop.permute.xlu1 %2380 }
 0x5ed   : > { %v2396_v16 = vsel %vm1838_vm5, %v8907_v33, %v2375_v19  ;;  %v2405_v2 = vsel %vm1838_vm5, %v8924_v53, %v2381_v25  ;;  %v2554_v33 = vld [vmem:[%s10448_s12 + $0x8] sm:$0xff]  ;;  %v2555_v53 = vld [vmem:[%s10448_s12 + $0x10] sm:$0xff] }
 0x5ee   : > { %7860 = vmatprep.mubr.msk.bf16.mxu1 %vm1873_vm6, %v2396_v16  ;;  %v2558_v47 = vpack.c.bf16 %v2556_v46, %v2555_v53 }
 0x5ef   : > { %7861 = vmatmul.mubr.msk.bf16.gmra.mrb[72].mxu1 %vm1873_vm6, %v2399_v57 }
 0x5f4   : > { %v2379_v45 = vpop.permute.xlu0 %2378 }
 0x5f5   : > { %v2402_v10 = vsel %vm1838_vm5, %v8927_v13, %v2379_v45  ;;  %v2557_v13 = vpack.c.bf16 %v2554_v33, %v2553_v15 }
 0x5f6   : > { %7864 = vmatprep.mubr.msk.bf16.mxu1 %vm1873_vm6, %v2402_v10 }
 0x5f7   : > { %7865 = vmatmul.mubr.msk.bf16.gmra.mrb[76].mxu1 %vm1873_vm6, %v2405_v2  ;;  %7868 = vmatprep.subr.bf16.mxu0 %v2557_v13  ;;  %vm2747_vm6 = vcmp.eq.s32.totalorder %v7324_v26, %v2705_v51 }
 0x5f8   : > { %7904 = vmatprep.mubr.msk.bf16.mxu1 %vm8436_vm0, %v10457_v1  ;;  %7869 = vmatpush3.bf16.msra.mxu0 %v2557_v13  ;;  %v7337_v28 = vsel %vm2747_vm6, 1.0, %v10457_v1  ;;  %vm4812_vm6 = vcmask 1047559  }
 0x5f9   : > { %7870 = vmatprep.subr.bf16.mxu0 %v2558_v47  ;;  %v2790_v7 = vpack.c.bf16 %v7337_v28, %v7336_v27 }
 0x5fb   : > { %3118 = vxpose.xlu0.c.b16.start.end [1/1] (short) (narrow) %v2790_v7, 48 }
 0x5fc   : > { %7871 = vmatpush3.bf16.msra.mxu0 %v2558_v47 }
 0x5fd   : > { %7888 = vmatprep.subr.bf16.mxu0 %v10457_v1 }
 0x604   : > { %3280 = vxpose.xlu0.c.b16.start.end [1/1] (short) (narrow) %v2792_v36, 48 }
 0x6a9   : > { %v7854_v37 = vpop.f32.mrb[64].mxu1 }
 0x6aa   : > { %v2475_v40 = vadd.f32 %v7854_v37, %v7302_v8  ;;  %v2466_v41 = vpop.f32.mrb[65].mxu1 }
 0x6ab   : > { %v2467_v42 = vadd.f32 %v7302_v8, %v2466_v41  ;;  %v7855_v39 = vpop.f32.mrb[66].mxu1 }
 0x6ac   : > { %v2478_v38 = vadd.f32 %v7855_v39, %v7302_v8  ;;  %v2469_v43 = vpop.f32.mrb[67].mxu1  ;;  %v2531_v9 = vmax.f32 %v2475_v40, 0.0 }
 0x6ad   : > { %v2470_v44 = vadd.f32 %v7302_v8, %v2469_v43  ;;  %v2529_v12 = vmax.f32 %v2467_v42, 0.0  ;;  %v2883_v43 = vpop.trf.xlu1 }
 0x6ae   : > { %v2532_v52 = vmax.f32 %v2478_v38, 0.0 }
 0x6af   : > { %v2530_v17 = vmax.f32 %v2470_v44, 0.0  ;;  %v2802_v44 = vpop.trf.xlu0 }
 0x6b0   : > { %v2546_v20 = vpack.c.bf16 %v2532_v52, %v2531_v9 }
 0x6b1   : > { %v2545_v58 = vpack.c.bf16 %v2530_v17, %v2529_v12  ;;  %v2884_v9 = vpop.trf.xlu1 }
 0x6b3   : > { %7872 = vmatprep.mubr.msk.bf16.mxu0 %vm1838_vm5, %v2545_v58  ;;  %v2803_v12 = vpop.trf.xlu0 }
 0x6b4   : > { %7873 = vmatmul.mubr.msk.bf16.vlgmr.msra.gmra.mrb[64].mxu0 %vm1838_vm5, %v2546_v20 }
 0x6b9   : > { %v7858_v19 = vpop.f32.mrb[68].mxu1 }
 0x6ba   : > { %v2491_v16 = vadd.f32 %v7858_v19, %v7302_v8  ;;  %v2482_v57 = vpop.f32.mrb[69].mxu1 }
 0x6bb   : > { %v2483_v25 = vadd.f32 %v7302_v8, %v2482_v57  ;;  %v7859_v45 = vpop.f32.mrb[70].mxu1 }
 0x6bc   : > { %v2494_v10 = vadd.f32 %v7859_v45, %v7302_v8  ;;  %v2485_v2 = vpop.f32.mrb[71].mxu1  ;;  %v2535_v33 = vmax.f32 %v2491_v16, 0.0 }
 0x6bd   : > { %v2486_v15 = vadd.f32 %v7302_v8, %v2485_v2  ;;  %v2533_v53 = vmax.f32 %v2483_v25, 0.0  ;;  %v2885_v2 = vpop.trf.xlu1 }
 0x6be   : > { %v2536_v13 = vmax.f32 %v2494_v10, 0.0 }
 0x6bf   : > { %v2534_v46 = vmax.f32 %v2486_v15, 0.0  ;;  %v2804_v15 = vpop.trf.xlu0 }
 0x6c0   : > { %v2548_v47 = vpack.c.bf16 %v2536_v13, %v2535_v33 }
 0x6c1   : > { %v2547_v49 = vpack.c.bf16 %v2534_v46, %v2533_v53 }
 0x6c2   : > { %v7862_v11 = vpop.f32.mrb[72].mxu1 }
 0x6c3   : > { %v2507_v51 = vadd.f32 %v7862_v11, %v7302_v8  ;;  %v2498_v54 = vpop.f32.mrb[73].mxu1  ;;  %7876 = vmatprep.mubr.msk.bf16.mxu0 %vm1838_vm5, %v2547_v49 }
 0x6c4   : > { %v2499_v55 = vadd.f32 %v7302_v8, %v2498_v54  ;;  %v7863_v56 = vpop.f32.mrb[74].mxu1  ;;  %7877 = vmatmul.mubr.msk.bf16.gmra.mrb[68].mxu0 %vm1838_vm5, %v2548_v47 }
 0x6c5   : > { %v2510_v59 = vadd.f32 %v7863_v56, %v7302_v8  ;;  %v2501_v60 = vpop.f32.mrb[75].mxu1  ;;  %v2539_v62 = vmax.f32 %v2507_v51, 0.0  ;;  %v3045_v56 = vpop.trf.xlu1 }
 0x6c6   : > { %v2502_v61 = vadd.f32 %v7302_v8, %v2501_v60  ;;  %v2537_v0 = vmax.f32 %v2499_v55, 0.0 }
 0x6c7   : > { %v2540_v63 = vmax.f32 %v2510_v59, 0.0  ;;  %v2964_v59 = vpop.trf.xlu0 }
 0x6c8   : > { %v2538_v18 = vmax.f32 %v2502_v61, 0.0 }
 0x6c9   : > { %v2550_v21 = vpack.c.bf16 %v2540_v63, %v2539_v62 }
 0x6ca   : > { %v2549_v4 = vpack.c.bf16 %v2538_v18, %v2537_v0  ;;  %v7866_v22 = vpop.f32.mrb[76].mxu1 }
 0x6cb   : > { %v2523_v23 = vadd.f32 %v7866_v22, %v7302_v8  ;;  %v2514_v24 = vpop.f32.mrb[77].mxu1 }
 0x6cc   : > { %v2515_v26 = vadd.f32 %v7302_v8, %v2514_v24  ;;  %v7867_v3 = vpop.f32.mrb[78].mxu1  ;;  %7880 = vmatprep.mubr.msk.bf16.mxu0 %vm1838_vm5, %v2549_v4  ;;  %v3046_v24 = vpop.trf.xlu1 }
 0x6cd   : > { %v2526_v6 = vadd.f32 %v7867_v3, %v7302_v8  ;;  %v2517_v27 = vpop.f32.mrb[79].mxu1  ;;  %7881 = vmatmul.mubr.msk.bf16.gmra.mrb[72].mxu0 %vm1838_vm5, %v2550_v21  ;;  %v2543_v5 = vmax.f32 %v2523_v23, 0.0 }
 0x6ce   : > { %v2518_v28 = vadd.f32 %v7302_v8, %v2517_v27  ;;  %v2541_v29 = vmax.f32 %v2515_v26, 0.0  ;;  %v2965_v26 = vpop.trf.xlu0 }
 0x6cf   : > { %v2544_v7 = vmax.f32 %v2526_v6, 0.0 }
 0x6d0   : > { %v2542_v14 = vmax.f32 %v2518_v28, 0.0  ;;  %v3047_v3 = vpop.trf.xlu1 }
 0x6d1   : > { %v2552_v30 = vpack.c.bf16 %v2544_v7, %v2543_v5 }
 0x6d2   : > { %v2551_v31 = vpack.c.bf16 %v2542_v14, %v2541_v29  ;;  %v2966_v6 = vpop.trf.xlu0 }
 0x6d4   : > { %7884 = vmatprep.mubr.msk.bf16.mxu0 %vm1838_vm5, %v2551_v31  ;;  %v3207_v27 = vpop.trf.xlu1 }
 0x6d5   : > { %7885 = vmatmul.mubr.msk.bf16.gmra.mrb[76].mxu0 %vm1838_vm5, %v2552_v30 }
 0x6d6   : > { %7890 = vmatprep.mubr.msk.bf16.mxu0 %vm8436_vm0, %v10457_v1  ;;  %v3126_v28 = vpop.trf.xlu0 }
 0x6d8   : > { %v3208_v5 = vpop.trf.xlu1 }
 0x6da   : > { %v3127_v7 = vpop.trf.xlu0 }
 0x6dc   : > { %v3209_v29 = vpop.trf.xlu1 }
 0x6de   : > { %v3128_v14 = vpop.trf.xlu0 }
 0x6e0   : > { %v3369_v30 = vpop.trf.xlu1 }
 0x6e2   : > { %v3288_v31 = vpop.trf.xlu0 }
 0x787   : > { %v7874_v32 = vpop.f32.mrb[64].mxu0 }
 0x788   : > { %v2624_v35 = vpop.f32.mrb[65].mxu0  ;;  %v2633_v8 = vadd.f32 %v7874_v32, %v9069_v34  ;;  %v3370_v32 = vpop.trf.xlu1 }
 0x789   : > { %v7875_v36 = vpop.f32.mrb[66].mxu0  ;;  %v2625_v41 = vadd.f32 %v9069_v34, %v2624_v35 }
 0x78a   : > { %v2636_v37 = vadd.f32 %v7875_v36, %v9069_v34  ;;  %v2627_v40 = vpop.f32.mrb[67].mxu0 }
 0x78b   : > { %v2628_v42 = vadd.f32 %v9069_v34, %v2627_v40  ;;  %v3463_v40 = vld [vmem:[%s10450_s14 + $0x8] sm:$0xff] }
 0x78c   : > { %v9075_v39 = vpack.c.bf16 %v2636_v37, %v2633_v8  ;;  %v3371_v35 = vpop.trf.xlu1  ;;  %v4350_v8 = vld [vmem:[%s9190_s27] sm:$0x1] }
 0x78d   : > { %v9077_v38 = vpack.c.bf16 %v2628_v42, %v2625_v41  ;;  %v3462_v37 = vld [vmem:[%s10450_s14] sm:$0xff]  ;;  %v4391_v41 = vpack.c.bf16 %v4350_v8, %v4350_v8 }
 0x78e   : > { %7903 = vmatpush3.bf16.msra.mxu1 %v9075_v39  ;;  %v3464_v42 = vpack.c.bf16 %v3463_v40, %v3462_v37 }
 0x78f   : > { %7889 = vmatpush3.bf16.msra.mxu0 %v9077_v38  ;;  %7930 = vmatprep.subr.bf16.mxu1 %v10457_v1 }
 0x790   : > { %7916 = vmatprep.subr.bf16.mxu0 %v10457_v1 }
 0x791   : > { %7905 = vmatmul.mubr.msk.bf16.vlgmr.msra.gmra.mrb[80].mxu1 %vm832_vm1, %v2883_v43 }
 0x792   : > { %7891 = vmatmul.mubr.msk.bf16.vlgmr.msra.gmra.mrb[80].mxu0 %vm832_vm1, %v2802_v44  ;;  %7908 = vmatprep.mubr.msk.bf16.mxu1 %vm8436_vm0, %v10457_v1  ;;  %v4352_v44 = vld [vmem:[%s9190_s27 + $0x2] sm:$0x1] }
 0x793   : > { %7894 = vmatprep.mubr.msk.bf16.mxu0 %vm8436_vm0, %v10457_v1 }
 0x797   : > { %v7878_v52 = vpop.f32.mrb[68].mxu0 }
 0x798   : > { %v2640_v17 = vpop.f32.mrb[69].mxu0  ;;  %v2649_v58 = vadd.f32 %v7878_v52, %v9069_v34 }
 0x799   : > { %v7879_v20 = vpop.f32.mrb[70].mxu0  ;;  %7909 = vmatmul.mubr.msk.bf16.gmra.mrb[84].mxu1 %vm832_vm1, %v2884_v9  ;;  %v2641_v57 = vadd.f32 %v9069_v34, %v2640_v17  ;;  %v4393_v9 = vpack.c.bf16 %v4352_v44, %v4352_v44 }
 0x79a   : > { %v2652_v19 = vadd.f32 %v7879_v20, %v9069_v34  ;;  %v2643_v16 = vpop.f32.mrb[71].mxu0  ;;  %7895 = vmatmul.mubr.msk.bf16.gmra.mrb[84].mxu0 %vm832_vm1, %v2803_v12  ;;  %7912 = vmatprep.mubr.msk.bf16.mxu1 %vm8436_vm0, %v10457_v1  ;;  %v4354_v12 = vld [vmem:[%s9190_s27 + $0x4] sm:$0x1]  ;;  %v4355_v20 = vld [vmem:[%s9190_s27 + $0x5] sm:$0x1] }
 0x79b   : > { %v2644_v25 = vadd.f32 %v9069_v34, %v2643_v16  ;;  %7898 = vmatprep.mubr.msk.bf16.mxu0 %vm8436_vm0, %v10457_v1  ;;  %v4395_v17 = vpack.c.bf16 %v4354_v12, %v4354_v12 }
 0x79c   : > { %v9099_v45 = vpack.c.bf16 %v2652_v19, %v2649_v58  ;;  %v4396_v58 = vpack.c.bf16 %v4355_v20, %v4355_v20  ;;  %v4356_v19 = vld [vmem:[%s9190_s27 + $0x6] sm:$0x1] }
 0x79d   : > { %v9101_v10 = vpack.c.bf16 %v2644_v25, %v2641_v57  ;;  %v4397_v16 = vpack.c.bf16 %v4356_v19, %v4356_v19  ;;  %v4357_v57 = vld [vmem:[%s9190_s27 + $0x7] sm:$0x1] }
 0x79e   : > { %7931 = vmatpush3.bf16.msra.mxu1 %v9099_v45  ;;  %v4398_v25 = vpack.c.bf16 %v4357_v57, %v4357_v57 }
 0x79f   : > { %7917 = vmatpush3.bf16.msra.mxu0 %v9101_v10  ;;  %7958 = vmatprep.subr.bf16.mxu1 %v10457_v1 }
 0x7a0   : > { %v7882_v33 = vpop.f32.mrb[72].mxu0  ;;  %7944 = vmatprep.subr.bf16.mxu0 %v10457_v1 }
 0x7a1   : > { %v2656_v13 = vpop.f32.mrb[73].mxu0  ;;  %7913 = vmatmul.mubr.msk.bf16.gmra.mrb[88].mxu1 %vm832_vm1, %v2885_v2  ;;  %v2665_v46 = vadd.f32 %v7882_v33, %v9069_v34  ;;  %v4365_v2 = vsel %vm4358_vm11, %v4352_v44, 0.0  ;;  %v4371_v33 = vsel %vm4358_vm11, %v4354_v12, 0.0 }
 0x7a2   : > { %v7883_v53 = vpop.f32.mrb[74].mxu0  ;;  %7899 = vmatmul.mubr.msk.bf16.gmra.mrb[88].mxu0 %vm832_vm1, %v2804_v15  ;;  %7932 = vmatprep.mubr.msk.bf16.mxu1 %vm8436_vm0, %v10457_v1  ;;  %v2657_v11 = vadd.f32 %v9069_v34, %v2656_v13  ;;  %v4374_v13 = vsel %vm4358_vm11, %v4355_v20, 0.0 }
 0x7a3   : > { %v2668_v47 = vadd.f32 %v7883_v53, %v9069_v34  ;;  %v2659_v49 = vpop.f32.mrb[75].mxu0  ;;  %7918 = vmatprep.mubr.msk.bf16.mxu0 %vm8436_vm0, %v10457_v1  ;;  %4366 = vadd.xlane.f32.xlu1 %v4365_v2  ;;  %v8439_v53 = vmov 0  }
 0x7a4   : > { %v2660_v51 = vadd.f32 %v9069_v34, %v2659_v49  ;;  %8213 = vset.pattern.permute.xlu1 %v8439_v53  ;;  %8214 = vset.pattern.permute.xlu0 %v8439_v53  ;;  %v9264_v49 = vsub.s32 0, %v9020_v50 }
 0x7a5   : > { %v9117_v54 = vpack.c.bf16 %v2668_v47, %v2665_v46  ;;  %v4377_v46 = vsel %vm4358_vm11, %v4356_v19, 0.0  ;;  %v4380_v47 = vsel %vm4358_vm11, %v4357_v57, 0.0 }
 0x7a6   : > { %v9119_v55 = vpack.c.bf16 %v2660_v51, %v2657_v11  ;;  %v7390_v11 = vld [vmem:[#allocation2] ss:$0 sm:$0xff] }
 0x7a7   : > { %4372 = vadd.xlane.f32.xlu1 %v4371_v33  ;;  %v9267_v51 = vld [vmem:[%s9261_s24] ss:$0 sm:$0xff] }
 0x7a8   : > { %v7886_v60 = vpop.f32.mrb[76].mxu0 }
 0x7a9   : > { %v2672_v61 = vpop.f32.mrb[77].mxu0  ;;  %7933 = vmatmul.mubr.msk.bf16.vlgmr.msra.gmra.mrb[92].mxu1 %vm832_vm1, %v3045_v56  ;;  %v2681_v63 = vadd.f32 %v7886_v60, %v9069_v34  ;;  %v9276_v56 = vld [vmem:[%s9261_s24 + $0x4] ss:$0 sm:$0xff] }
 0x7aa   : > { %7959 = vmatpush3.bf16.msra.mxu1 %v9117_v54  ;;  %v7887_v62 = vpop.f32.mrb[78].mxu0  ;;  %7919 = vmatmul.mubr.msk.bf16.vlgmr.msra.gmra.mrb[92].mxu0 %vm832_vm1, %v2964_v59  ;;  %v2673_v21 = vadd.f32 %v9069_v34, %v2672_v61 }
 0x7ab   : > { %v2684_v0 = vadd.f32 %v7887_v62, %v9069_v34  ;;  %7945 = vmatpush3.bf16.msra.mxu0 %v9119_v55  ;;  %v2675_v18 = vpop.f32.mrb[79].mxu0  ;;  %7936 = vmatprep.mubr.msk.bf16.mxu1 %vm8436_vm0, %v10457_v1  ;;  %v9280_v62 = vld [vmem:[%s9261_s24 + $0x3] ss:$0 sm:$0xff] }
 0x7ac   : > { %v2676_v4 = vadd.f32 %v9069_v34, %v2675_v18  ;;  %7922 = vmatprep.mubr.msk.bf16.mxu0 %vm8436_vm0, %v10457_v1  ;;  %7986 = vmatprep.subr.bf16.mxu1 %v10457_v1  ;;  %v3289_v34 = vpop.trf.xlu0 }
 0x7ad   : > { %v9134_v22 = vpack.c.bf16 %v2684_v0, %v2681_v63  ;;  %7972 = vmatprep.subr.bf16.mxu0 %v10457_v1  ;;  %4378 = vadd.xlane.f32.xlu1 %v4377_v46 }
 0x7ae   : > { %v9137_v23 = vpack.c.bf16 %v2676_v4, %v2673_v21  ;;  %v9284_v4 = vld [vmem:[%s9261_s24 + $0x6] ss:$0 sm:$0xff] }
 0x7b0   : > { %v3290_v36 = vpop.trf.xlu0 }
 0x7b1   : > { %7937 = vmatmul.mubr.msk.bf16.gmra.mrb[96].mxu1 %vm832_vm1, %v3046_v24  ;;  %v9288_v24 = vld [vmem:[%s9261_s24 + $0x5] ss:$0 sm:$0xff] }
 0x7b2   : > { %7923 = vmatmul.mubr.msk.bf16.gmra.mrb[96].mxu0 %vm832_vm1, %v2965_v26  ;;  %7940 = vmatprep.mubr.msk.bf16.mxu1 %vm8436_vm0, %v10457_v1 }
 0x7b3   : > { %7926 = vmatprep.mubr.msk.bf16.mxu0 %vm8436_vm0, %v10457_v1 }
 0x7b9   : > { %7941 = vmatmul.mubr.msk.bf16.gmra.mrb[100].mxu1 %vm832_vm1, %v3047_v3 }
 0x7ba   : > { %7927 = vmatmul.mubr.msk.bf16.gmra.mrb[100].mxu0 %vm832_vm1, %v2966_v6  ;;  %7960 = vmatprep.mubr.msk.bf16.mxu1 %vm8436_vm0, %v10457_v1 }
 0x7bb   : > { %7946 = vmatprep.mubr.msk.bf16.mxu0 %vm8436_vm0, %v10457_v1 }
 0x7be   : > { %3939 = vperm.xlu1 %8213, %v7390_v11  }
 0x7c1   : > { %7961 = vmatmul.mubr.msk.bf16.vlgmr.msra.gmra.mrb[104].mxu1 %vm832_vm1, %v3207_v27 }
 0x7c2   : > { %7987 = vmatpush3.bf16.msra.mxu1 %v9134_v22  ;;  %7947 = vmatmul.mubr.msk.bf16.vlgmr.msra.gmra.mrb[104].mxu0 %vm832_vm1, %v3126_v28  ;;  %v9294_v28 = vld [vmem:[%s9261_s24 + $0x7] ss:$0 sm:$0xff] }
 0x7c3   : > { %7973 = vmatpush3.bf16.msra.mxu0 %v9137_v23  ;;  %7964 = vmatprep.mubr.msk.bf16.mxu1 %vm8436_vm0, %v10457_v1 }
 0x7c4   : > { %7950 = vmatprep.mubr.msk.bf16.mxu0 %vm8436_vm0, %v10457_v1  ;;  %8042 = vmatprep.subr.bf16.mxu1 %v10457_v1 }
 0x7c5   : > { %8000 = vmatprep.subr.bf16.mxu0 %v3464_v42  ;;  %4279 = vbcast.lane.b32.xlu1 %v9267_v51, 256 }
 0x7c9   : > { %7965 = vmatmul.mubr.msk.bf16.gmra.mrb[108].mxu1 %vm832_vm1, %v3208_v5 }
 0x7ca   : > { %7951 = vmatmul.mubr.msk.bf16.gmra.mrb[108].mxu0 %vm832_vm1, %v3127_v7  ;;  %7968 = vmatprep.mubr.msk.bf16.mxu1 %vm8436_vm0, %v10457_v1 }
 0x7cb   : > { %7954 = vmatprep.mubr.msk.bf16.mxu0 %vm8436_vm0, %v10457_v1 }
 0x7d1   : > { %7969 = vmatmul.mubr.msk.bf16.gmra.mrb[112].mxu1 %vm832_vm1, %v3209_v29 }
 0x7d2   : > { %7955 = vmatmul.mubr.msk.bf16.gmra.mrb[112].mxu0 %vm832_vm1, %v3128_v14  ;;  %7988 = vmatprep.mubr.msk.bf16.mxu1 %vm8436_vm0, %v10457_v1 }
 0x7d3   : > { %7974 = vmatprep.mubr.msk.bf16.mxu0 %vm8436_vm0, %v10457_v1 }
 0x7d9   : > { %7989 = vmatmul.mubr.msk.bf16.vlgmr.msra.gmra.mrb[116].mxu1 %vm832_vm1, %v3369_v30 }
 0x7da   : > { %8043 = vmatpush3.bf16.msra.mxu1 %v9077_v38  ;;  %7975 = vmatmul.mubr.msk.bf16.vlgmr.msra.gmra.mrb[116].mxu0 %vm832_vm1, %v3288_v31  ;;  %v4351_v38 = vld [vmem:[%s9190_s27 + $0x1] sm:$0x1] }
 0x7db   : > { %7992 = vmatprep.mubr.msk.bf16.mxu1 %vm8436_vm0, %v10457_v1  ;;  %7978 = vmatprep.mubr.msk.bf16.mxu0 %vm8436_vm0, %v10457_v1  ;;  %v4392_v43 = vpack.c.bf16 %v4351_v38, %v4351_v38 }
 0x7dc   : > { %8048 = vmatprep.subr.bf16.mxu1 %v10457_v1  ;;  %8001 = vmatpush3.bf16.msra.mxu0 %v3464_v42 }
 0x7dd   : > { %8102 = vmatprep.subr.bf16.mxu0 %v10457_v1 }
 0x7e1   : > { %7993 = vmatmul.mubr.msk.bf16.gmra.mrb[120].mxu1 %vm832_vm1, %v3370_v32 }
 0x7e2   : > { %7979 = vmatmul.mubr.msk.bf16.gmra.mrb[120].mxu0 %vm832_vm1, %v3289_v34  ;;  %7996 = vmatprep.mubr.msk.bf16.mxu1 %vm8436_vm0, %v10457_v1 }
 0x7e3   : > { %7982 = vmatprep.mubr.msk.bf16.mxu0 %vm8436_vm0, %v10457_v1 }
 0x7e9   : > { %7997 = vmatmul.mubr.msk.bf16.gmra.mrb[124].mxu1 %vm832_vm1, %v3371_v35 }
 0x7ea   : > { %7983 = vmatmul.mubr.msk.bf16.gmra.mrb[124].mxu0 %vm832_vm1, %v3290_v36  ;;  %8044 = vmatprep.mubr.msk.bf16.mxu1 %vm8436_vm0, %v10457_v1 }
 0x7f1   : > { %8045 = vmatmul.mubr.msk.bf16.vlgmr.msra.gmra.mrb[128].mxu1 %vm832_vm1, %v4391_v41 }
 0x7f2   : > { %8049 = vmatpush3.bf16.msra.mxu1 %v9075_v39  ;;  %8050 = vmatprep.mubr.msk.bf16.mxu1 %vm8436_vm0, %v10457_v1  ;;  %v4353_v39 = vld [vmem:[%s9190_s27 + $0x3] sm:$0x1]  ;;  %s9895_s27 = scalar_lea.vmem %s10442_s6, %s9543_s0  ;;  %s8443_s0 = smov 8  }
 0x7f3   : > { %8054 = vmatprep.subr.bf16.mxu1 %v10457_v1  ;;  %v4394_v52 = vpack.c.bf16 %v4353_v39, %v4353_v39  ;;  %v4368_v15 = vsel %vm4358_vm11, %v4353_v39, 0.0 }
 0x7f9   : > { %8051 = vmatmul.mubr.msk.bf16.vlgmr.msra.gmra.mrb[132].mxu1 %vm832_vm1, %v4392_v43 }
 0x7fa   : > { %8055 = vmatpush3.bf16.msra.mxu1 %v9101_v10  ;;  %8056 = vmatprep.mubr.msk.bf16.mxu1 %vm8436_vm0, %v10457_v1  ;;  %v4359_v10 = vsel %vm4358_vm11, %v4350_v8, 0.0 }
 0x7fb   : > { %8060 = vmatprep.subr.bf16.mxu1 %v10457_v1 }
 0x801   : > { %8057 = vmatmul.mubr.msk.bf16.vlgmr.msra.gmra.mrb[136].mxu1 %vm832_vm1, %v4393_v9 }
 0x802   : > { %8061 = vmatpush3.bf16.msra.mxu1 %v9099_v45  ;;  %8062 = vmatprep.mubr.msk.bf16.mxu1 %vm8436_vm0, %v10457_v1  ;;  %v4362_v45 = vsel %vm4358_vm11, %v4351_v38, 0.0 }
 0x803   : > { %8066 = vmatprep.subr.bf16.mxu1 %v10457_v1  ;;  %4363 = vadd.xlane.f32.xlu0 %v4362_v45 }
 0x807   : > { %4360 = vadd.xlane.f32.xlu0 %v4359_v10 }
 0x809   : > { %8063 = vmatmul.mubr.msk.bf16.vlgmr.msra.gmra.mrb[140].mxu1 %vm832_vm1, %v4394_v52 }
 0x80a   : > { %8067 = vmatpush3.bf16.msra.mxu1 %v9119_v55  ;;  %8068 = vmatprep.mubr.msk.bf16.mxu1 %vm8436_vm0, %v10457_v1  ;;  %v9273_v55 = vld [vmem:[%s9261_s24 + $0x2] ss:$0 sm:$0xff] }
 0x80b   : > { %8072 = vmatprep.subr.bf16.mxu1 %v10457_v1  ;;  %4369 = vadd.xlane.f32.xlu0 %v4368_v15 }
 0x80c   : > { %4285 = vbcast.lane.b32.xlu1 %v9273_v55, 256 }
 0x80f   : > { %4375 = vadd.xlane.f32.xlu0 %v4374_v13 }
 0x810   : > { %4288 = vbcast.lane.b32.xlu1 %v9280_v62, 256 }
 0x811   : > { %8069 = vmatmul.mubr.msk.bf16.vlgmr.msra.gmra.mrb[144].mxu1 %vm832_vm1, %v4395_v17 }
 0x812   : > { %8073 = vmatpush3.bf16.msra.mxu1 %v9117_v54  ;;  %8074 = vmatprep.mubr.msk.bf16.mxu1 %vm8436_vm0, %v10457_v1  ;;  %v9270_v54 = vld [vmem:[%s9261_s24 + $0x1] ss:$0 sm:$0xff] }
 0x813   : > { %8078 = vmatprep.subr.bf16.mxu1 %v10457_v1  ;;  %4381 = vadd.xlane.f32.xlu0 %v4380_v47 }
 0x814   : > { %4294 = vbcast.lane.b32.xlu1 %v9288_v24, 256 }
 0x818   : > { %4300 = vbcast.lane.b32.xlu1 %v9294_v28, 256 }
 0x819   : > { %8075 = vmatmul.mubr.msk.bf16.vlgmr.msra.gmra.mrb[148].mxu1 %vm832_vm1, %v4396_v58 }
 0x81a   : > { %8079 = vmatpush3.bf16.msra.mxu1 %v9137_v23  ;;  %8080 = vmatprep.mubr.msk.bf16.mxu1 %vm8436_vm0, %v10457_v1 }
 0x81b   : > { %8084 = vmatprep.subr.bf16.mxu1 %v10457_v1 }
 0x821   : > { %8081 = vmatmul.mubr.msk.bf16.vlgmr.msra.gmra.mrb[152].mxu1 %vm832_vm1, %v4397_v16 }
 0x822   : > { %8085 = vmatpush3.bf16.msra.mxu1 %v9134_v22  ;;  %8086 = vmatprep.mubr.msk.bf16.mxu1 %vm8436_vm0, %v10457_v1 }
 0x823   : > { %8090 = vmatprep.subr.bf16.mxu1 %v10457_v1 }
 0x829   : > { %8087 = vmatmul.mubr.msk.bf16.vlgmr.msra.gmra.mrb[156].mxu1 %vm832_vm1, %v4398_v25  ;;  %4282 = vbcast.lane.b32.xlu0 %v9270_v54, 256 }
 0x82a   : > { %8092 = vmatprep.mubr.msk.bf16.mxu1 %vm8436_vm0, %v10457_v1 }
 0x82d   : > { %4291 = vbcast.lane.b32.xlu0 %v9276_v56, 256 }
 0x831   : > { %4297 = vbcast.lane.b32.xlu0 %v9284_v4, 256 }
 0x864   : > { %v2934_v59 = vpop.f32.mrb[80].mxu1 }
 0x865   : > { %v2853_v60 = vpop.f32.mrb[80].mxu0  ;;  %v7906_v61 = vpop.f32.mrb[81].mxu1 }
 0x866   : > { %v7892_v63 = vpop.f32.mrb[81].mxu0  ;;  %v2937_v0 = vpop.f32.mrb[82].mxu1 }
 0x867   : > { %v2856_v18 = vpop.f32.mrb[82].mxu0  ;;  %v7907_v21 = vpop.f32.mrb[83].mxu1 }
 0x868   : > { %v3442_v22 = vpack.c.bf16 %v2856_v18, %v2853_v60  ;;  %v7893_v23 = vpop.f32.mrb[83].mxu0 }
 0x86a   : > { %8002 = vmatprep.mubr.msk.bf16.mxu0 %vm832_vm1, %v3442_v22 }
 0x86c   : > { %v2942_v26 = vpop.f32.mrb[84].mxu1 }
 0x86d   : > { %v2861_v3 = vpop.f32.mrb[84].mxu0  ;;  %v3445_v6 = vpack.c.bf16 %v2942_v26, %v2937_v0  ;;  %v7910_v27 = vpop.f32.mrb[85].mxu1 }
 0x86e   : > { %v7896_v5 = vpop.f32.mrb[85].mxu0  ;;  %v2945_v7 = vpop.f32.mrb[86].mxu1 }
 0x86f   : > { %v2864_v29 = vpop.f32.mrb[86].mxu0  ;;  %v7911_v14 = vpop.f32.mrb[87].mxu1 }
 0x870   : > { %v3443_v30 = vpack.c.bf16 %v2864_v29, %v2861_v3  ;;  %v7897_v31 = vpop.f32.mrb[87].mxu0 }
 0x872   : > { %8003 = vmatmul.mubr.msk.bf16.vlgmr.msra.gmra.mrb[128].mxu0 %vm832_vm1, %v3443_v30 }
 0x874   : > { %v2950_v32 = vpop.f32.mrb[88].mxu1 }
 0x875   : > { %v2869_v34 = vpop.f32.mrb[88].mxu0  ;;  %v3446_v35 = vpack.c.bf16 %v2950_v32, %v2945_v7  ;;  %v7914_v36 = vpop.f32.mrb[89].mxu1 }
 0x876   : > { %v3444_v8 = vpack.c.bf16 %v2934_v59, %v2869_v34  ;;  %v7900_v37 = vpop.f32.mrb[89].mxu0  ;;  %v2953_v40 = vpop.f32.mrb[90].mxu1 }
 0x877   : > { %v2872_v41 = vpop.f32.mrb[90].mxu0  ;;  %v7915_v42 = vpop.f32.mrb[91].mxu1 }
 0x878   : > { %8006 = vmatprep.mubr.msk.bf16.mxu0 %vm832_vm1, %v3444_v8  ;;  %v7901_v38 = vpop.f32.mrb[91].mxu0 }
 0x87a   : > { %8007 = vmatmul.mubr.msk.bf16.gmra.mrb[132].mxu0 %vm832_vm1, %v3445_v6 }
 0x87b   : > { %8010 = vmatprep.mubr.msk.bf16.mxu0 %vm832_vm1, %v3446_v35 }
 0x87c   : > { %v3096_v43 = vpop.f32.mrb[92].mxu1 }
 0x87d   : > { %v3015_v44 = vpop.f32.mrb[92].mxu0  ;;  %v7934_v9 = vpop.f32.mrb[93].mxu1 }
 0x87e   : > { %v7920_v39 = vpop.f32.mrb[93].mxu0  ;;  %v3099_v52 = vpop.f32.mrb[94].mxu1 }
 0x87f   : > { %v3018_v12 = vpop.f32.mrb[94].mxu0  ;;  %v7935_v17 = vpop.f32.mrb[95].mxu1 }
 0x880   : > { %v3447_v20 = vpack.c.bf16 %v3018_v12, %v3015_v44  ;;  %v7921_v58 = vpop.f32.mrb[95].mxu0 }
 0x882   : > { %8011 = vmatmul.mubr.msk.bf16.gmra.mrb[136].mxu0 %vm832_vm1, %v3447_v20 }
 0x884   : > { %v3104_v19 = vpop.f32.mrb[96].mxu1 }
 0x885   : > { %v3023_v16 = vpop.f32.mrb[96].mxu0  ;;  %v3450_v57 = vpack.c.bf16 %v3104_v19, %v3099_v52  ;;  %v7938_v25 = vpop.f32.mrb[97].mxu1 }
 0x886   : > { %v7924_v45 = vpop.f32.mrb[97].mxu0  ;;  %v3107_v10 = vpop.f32.mrb[98].mxu1 }
 0x887   : > { %v3026_v2 = vpop.f32.mrb[98].mxu0  ;;  %v7939_v15 = vpop.f32.mrb[99].mxu1 }
 0x888   : > { %v3448_v33 = vpack.c.bf16 %v3026_v2, %v3023_v16  ;;  %v7925_v13 = vpop.f32.mrb[99].mxu0 }
 0x88a   : > { %8014 = vmatprep.mubr.msk.bf16.mxu0 %vm832_vm1, %v3448_v33 }
 0x88c   : > { %v3112_v53 = vpop.f32.mrb[100].mxu1 }
 0x88d   : > { %v3031_v46 = vpop.f32.mrb[100].mxu0  ;;  %v3451_v47 = vpack.c.bf16 %v3112_v53, %v3107_v10  ;;  %v7942_v11 = vpop.f32.mrb[101].mxu1 }
 0x88e   : > { %v3449_v59 = vpack.c.bf16 %v3096_v43, %v3031_v46  ;;  %v7928_v60 = vpop.f32.mrb[101].mxu0  ;;  %v3115_v61 = vpop.f32.mrb[102].mxu1 }
 0x88f   : > { %v3034_v63 = vpop.f32.mrb[102].mxu0  ;;  %v7943_v0 = vpop.f32.mrb[103].mxu1 }
 0x890   : > { %8015 = vmatmul.mubr.msk.bf16.gmra.mrb[140].mxu0 %vm832_vm1, %v3449_v59  ;;  %v7929_v18 = vpop.f32.mrb[103].mxu0 }
 0x891   : > { %8018 = vmatprep.mubr.msk.bf16.mxu0 %vm832_vm1, %v3450_v57 }
 0x894   : > { %v3258_v21 = vpop.f32.mrb[104].mxu1 }
 0x895   : > { %v3177_v22 = vpop.f32.mrb[104].mxu0  ;;  %v7962_v23 = vpop.f32.mrb[105].mxu1 }
 0x896   : > { %v7948_v26 = vpop.f32.mrb[105].mxu0  ;;  %v3261_v3 = vpop.f32.mrb[106].mxu1 }
 0x897   : > { %v3180_v6 = vpop.f32.mrb[106].mxu0  ;;  %v7963_v27 = vpop.f32.mrb[107].mxu1 }
 0x898   : > { %8019 = vmatmul.mubr.msk.bf16.gmra.mrb[144].mxu0 %vm832_vm1, %v3451_v47  ;;  %v3452_v5 = vpack.c.bf16 %v3180_v6, %v3177_v22  ;;  %v7949_v7 = vpop.f32.mrb[107].mxu0  ;;  %v4364_v27 = vpop.xlane.xlu0 %4363 }
 0x89a   : > { %8022 = vmatprep.mubr.msk.bf16.mxu0 %vm832_vm1, %v3452_v5 }
 0x89c   : > { %v3266_v29 = vpop.f32.mrb[108].mxu1 }
 0x89d   : > { %v3185_v14 = vpop.f32.mrb[108].mxu0  ;;  %v3455_v30 = vpack.c.bf16 %v3266_v29, %v3261_v3  ;;  %v7966_v31 = vpop.f32.mrb[109].mxu1 }
 0x89e   : > { %v7952_v32 = vpop.f32.mrb[109].mxu0  ;;  %v3269_v34 = vpop.f32.mrb[110].mxu1 }
 0x89f   : > { %v3188_v35 = vpop.f32.mrb[110].mxu0  ;;  %v7967_v36 = vpop.f32.mrb[111].mxu1 }
 0x8a0   : > { %v3453_v8 = vpack.c.bf16 %v3188_v35, %v3185_v14  ;;  %v7953_v37 = vpop.f32.mrb[111].mxu0  ;;  %v4361_v14 = vpop.xlane.xlu0 %4360 }
 0x8a2   : > { %8023 = vmatmul.mubr.msk.bf16.gmra.mrb[148].mxu0 %vm832_vm1, %v3453_v8 }
 0x8a4   : > { %v3274_v40 = vpop.f32.mrb[112].mxu1  ;;  %v4370_v36 = vpop.xlane.xlu0 %4369 }
 0x8a5   : > { %v3193_v41 = vpop.f32.mrb[112].mxu0  ;;  %v3456_v42 = vpack.c.bf16 %v3274_v40, %v3269_v34  ;;  %v7970_v38 = vpop.f32.mrb[113].mxu1 }
 0x8a6   : > { %v3454_v43 = vpack.c.bf16 %v3258_v21, %v3193_v41  ;;  %v7956_v44 = vpop.f32.mrb[113].mxu0  ;;  %v3277_v9 = vpop.f32.mrb[114].mxu1  ;;  %v4384_v41 = vadd.f32 1e-06, %v4364_v27 }
 0x8a7   : > { %v3196_v39 = vpop.f32.mrb[114].mxu0  ;;  %v7971_v52 = vpop.f32.mrb[115].mxu1  ;;  %v4383_v44 = vadd.f32 1e-06, %v4361_v14  ;;  %v4386_v9 = vadd.f32 1e-06, %v4370_v36 }
 0x8a8   : > { %8026 = vmatprep.mubr.msk.bf16.mxu0 %vm832_vm1, %v3454_v43  ;;  %v7957_v12 = vpop.f32.mrb[115].mxu0  ;;  %v4367_v34 = vpop.xlane.xlu1 %4366  ;;  %8231 = vrcp.f32 %v4384_v41 }
 0x8a9   : > { %v4385_v38 = vadd.f32 1e-06, %v4367_v34  ;;  %v4376_v12 = vpop.xlane.xlu0 %4375 }
 0x8aa   : > { %8027 = vmatmul.mubr.msk.bf16.gmra.mrb[152].mxu0 %vm832_vm1, %v3455_v30 }
 0x8ab   : > { %8030 = vmatprep.mubr.msk.bf16.mxu0 %vm832_vm1, %v3456_v42  ;;  %8233 = vrcp.f32 %v4385_v38 }
 0x8ac   : > { %v3420_v17 = vpop.f32.mrb[116].mxu1  ;;  %v4373_v39 = vpop.xlane.xlu1 %4372  ;;  %8235 = vrcp.f32 %v4383_v44  ;;  %v4767_v44 = vld [vmem:[%s10454_s18] sm:$0xff] }
 0x8ad   : > { %v3339_v20 = vpop.f32.mrb[116].mxu0  ;;  %v7990_v58 = vpop.f32.mrb[117].mxu1  ;;  %v4387_v52 = vadd.f32 1e-06, %v4373_v39  ;;  %8237 = vrcp.f32 %v4386_v9  ;;  %v4768_v9 = vld [vmem:[%s10454_s18 + $0x8] sm:$0xff] }
 0x8ae   : > { %v7976_v19 = vpop.f32.mrb[117].mxu0  ;;  %v3423_v16 = vpop.f32.mrb[118].mxu1 }
 0x8af   : > { %v3342_v57 = vpop.f32.mrb[118].mxu0  ;;  %v7991_v25 = vpop.f32.mrb[119].mxu1  ;;  %8239 = vrcp.f32 %v4387_v52 }
 0x8b0   : > { %v3457_v45 = vpack.c.bf16 %v3342_v57, %v3339_v20  ;;  %v7977_v10 = vpop.f32.mrb[119].mxu0  ;;  %v4379_v57 = vpop.xlane.xlu1 %4378 }
 0x8b2   : > { %8031 = vmatmul.mubr.msk.bf16.gmra.mrb[156].mxu0 %vm832_vm1, %v3457_v45  ;;  %v8232_v25 = vpop.eup %8231  ;;  %v4389_v45 = vadd.f32 1e-06, %v4379_v57 }
 0x8b4   : > { %v3428_v2 = vpop.f32.mrb[120].mxu1 }
 0x8b5   : > { %v3347_v15 = vpop.f32.mrb[120].mxu0  ;;  %v3460_v33 = vpack.c.bf16 %v3428_v2, %v3423_v16  ;;  %v7994_v13 = vpop.f32.mrb[121].mxu1 }
 0x8b6   : > { %v7980_v53 = vpop.f32.mrb[121].mxu0  ;;  %v3431_v46 = vpop.f32.mrb[122].mxu1 }
 0x8b7   : > { %v3350_v47 = vpop.f32.mrb[122].mxu0  ;;  %v7995_v11 = vpop.f32.mrb[123].mxu1 }
 0x8b8   : > { %v3458_v59 = vpack.c.bf16 %v3350_v47, %v3347_v15  ;;  %v7981_v60 = vpop.f32.mrb[123].mxu0  ;;  %v8234_v2 = vpop.eup %8233 }
 0x8b9   : > { %v8236_v13 = vpop.eup %8235 }
 0x8ba   : > { %8034 = vmatprep.mubr.msk.bf16.mxu0 %vm832_vm1, %v3458_v59  ;;  %v8238_v47 = vpop.eup %8237 }
 0x8bc   : > { %v3436_v61 = vpop.f32.mrb[124].mxu1 }
 0x8bd   : > { %v3355_v63 = vpop.f32.mrb[124].mxu0  ;;  %v3461_v0 = vpack.c.bf16 %v3436_v61, %v3431_v46  ;;  %v7998_v18 = vpop.f32.mrb[125].mxu1 }
 0x8be   : > { %v3459_v21 = vpack.c.bf16 %v3420_v17, %v3355_v63  ;;  %v7984_v22 = vpop.f32.mrb[125].mxu0  ;;  %v3439_v23 = vpop.f32.mrb[126].mxu1  ;;  %v4388_v17 = vadd.f32 1e-06, %v4376_v12  ;;  %v4769_v12 = vpack.c.bf16 %v4768_v9, %v4767_v44 }
 0x8bf   : > { %v3358_v26 = vpop.f32.mrb[126].mxu0  ;;  %v7999_v3 = vpop.f32.mrb[127].mxu1 }
 0x8c0   : > { %8035 = vmatmul.mubr.msk.bf16.gmra.mrb[160].mxu0 %vm832_vm1, %v3459_v21  ;;  %v7985_v6 = vpop.f32.mrb[127].mxu0  ;;  %8241 = vrcp.f32 %v4388_v17  ;;  %v8240_v61 = vpop.eup %8239  ;;  %8091 = vmatpush3.bf16.msra.mxu1 %v4769_v12 }
 0x8c1   : > { %8038 = vmatprep.mubr.msk.bf16.mxu0 %vm832_vm1, %v3460_v33  ;;  %8243 = vrcp.f32 %v4389_v45  ;;  %v4382_v22 = vpop.xlane.xlu0 %4381  ;;  %8096 = vmatprep.subr.bf16.mxu1 %v10457_v1 }
 0x8c4   : > { %v4436_v5 = vpop.f32.mrb[128].mxu1 }
 0x8c5   : > { %v8046_v7 = vpop.f32.mrb[129].mxu1  ;;  %v4744_v11 = vmul.f32 %v8236_v13, %v4436_v5  ;;  %v4390_v5 = vadd.f32 1e-06, %v4382_v22 }
 0x8c6   : > { %v4439_v29 = vpop.f32.mrb[130].mxu1 }
 0x8c7   : > { %v8047_v30 = vpop.f32.mrb[131].mxu1  ;;  %v4759_v18 = vpack.c.bf16 %v4744_v11, %v4744_v11  ;;  %8245 = vrcp.f32 %v4390_v5 }
 0x8c8   : > { %8039 = vmatmul.mubr.msk.bf16.gmra.mrb[164].mxu0 %vm832_vm1, %v3461_v0 }
 0x8c9   : > { %8104 = vmatprep.mubr.msk.bf16.mxu0 %vm8436_vm0, %v10457_v1  ;;  %v4785_v27 = vunpack.c.l.b16 %v4759_v18 }
 0x8ca   : > { %v8242_v26 = vpop.eup %8241 }
 0x8cb   : > { %v8244_v17 = vpop.eup %8243 }
 0x8cc   : > { %v4479_v31 = vpop.f32.mrb[132].mxu1 }
 0x8cd   : > { %v8052_v32 = vpop.f32.mrb[133].mxu1  ;;  %v4746_v15 = vmul.f32 %v8232_v25, %v4479_v31 }
 0x8ce   : > { %v4482_v35 = vpop.f32.mrb[134].mxu1 }
 0x8cf   : > { %v8053_v8 = vpop.f32.mrb[135].mxu1  ;;  %v4760_v59 = vpack.c.bf16 %v4746_v15, %v4746_v15 }
 0x8d1   : > { %v4786_v21 = vunpack.c.l.b16 %v4760_v59  ;;  %v8246_v15 = vpop.eup %8245 }
 0x8d3   : > { %v4793_v7 = vrot.slane %v4786_v21, 7  ;;  %v9340_v21 = vld [vmem:[%s10451_s15] ss:$0 sm:$0xff] }
 0x8d4   : > { %v4522_v37 = vpop.f32.mrb[136].mxu1 }
 0x8d5   : > { %v8058_v40 = vpop.f32.mrb[137].mxu1  ;;  %v4748_v53 = vmul.f32 %v8234_v2, %v4522_v37  ;;  %v4795_v32 = vsel %vm4794_vm12, %v4793_v7, %v4785_v27  ;;  %v9347_v27 = vld [vmem:[%s10452_s16] ss:$0 sm:$0xff] }
 0x8d6   : > { %v4525_v42 = vpop.f32.mrb[138].mxu1 }
 0x8d7   : > { %v8059_v43 = vpop.f32.mrb[139].mxu1  ;;  %v4761_v63 = vpack.c.bf16 %v4748_v53, %v4748_v53 }
 0x8d9   : > { %v4787_v3 = vunpack.c.l.b16 %v4761_v63 }
 0x8db   : > { %v4796_v14 = vrot.slane %v4787_v3, 6 }
 0x8dc   : > { %v4565_v20 = vpop.f32.mrb[140].mxu1 }
 0x8dd   : > { %v8064_v58 = vpop.f32.mrb[141].mxu1  ;;  %v4750_v0 = vmul.f32 %v8238_v47, %v4565_v20  ;;  %v4798_v8 = vsel %vm4797_vm13, %v4796_v14, %v4795_v32 }
 0x8de   : > { %v4568_v19 = vpop.f32.mrb[142].mxu1 }
 0x8df   : > { %v8065_v16 = vpop.f32.mrb[143].mxu1  ;;  %v4762_v6 = vpack.c.bf16 %v4750_v0, %v4750_v0 }
 0x8e1   : > { %v4788_v30 = vunpack.c.l.b16 %v4762_v6 }
 0x8e3   : > { %v4799_v37 = vrot.slane %v4788_v30, 5 }
 0x8e4   : > { %v4608_v10 = vpop.f32.mrb[144].mxu1 }
 0x8e5   : > { %v8070_v33 = vpop.f32.mrb[145].mxu1  ;;  %v4752_v23 = vmul.f32 %v8240_v61, %v4608_v10  ;;  %v4801_v43 = vsel %vm4800_vm14, %v4799_v37, %v4798_v8 }
 0x8e6   : > { %v4611_v46 = vpop.f32.mrb[146].mxu1 }
 0x8e7   : > { %v8071_v60 = vpop.f32.mrb[147].mxu1  ;;  %v4763_v29 = vpack.c.bf16 %v4752_v23, %v4752_v23 }
 0x8e9   : > { %v4789_v34 = vunpack.c.l.b16 %v4763_v29 }
 0x8eb   : > { %v4802_v41 = vrot.slane %v4789_v34, 4 }
 0x8ec   : > { %v4651_v31 = vpop.f32.mrb[148].mxu1 }
 0x8ed   : > { %v4754_v35 = vmul.f32 %v8242_v26, %v4651_v31  ;;  %v8076_v36 = vpop.f32.mrb[149].mxu1  ;;  %v4804_v39 = vsel %vm4803_vm15, %v4802_v41, %v4801_v43 }
 0x8ee   : > { %v4654_v40 = vpop.f32.mrb[150].mxu1 }
 0x8ef   : > { %v4764_v42 = vpack.c.bf16 %v4754_v35, %v4754_v35  ;;  %v8077_v38 = vpop.f32.mrb[151].mxu1 }
 0x8f1   : > { %v4790_v52 = vunpack.c.l.b16 %v4764_v42 }
 0x8f3   : > { %v4805_v20 = vrot.slane %v4790_v52, 3 }
 0x8f4   : > { %v4694_v58 = vpop.f32.mrb[152].mxu1 }
 0x8f5   : > { %v4807_v19 = vsel %vm4806_vm2, %v4805_v20, %v4804_v39  ;;  %v4756_v16 = vmul.f32 %v8244_v17, %v4694_v58  ;;  %v8082_v57 = vpop.f32.mrb[153].mxu1 }
 0x8f6   : > { %v4697_v25 = vpop.f32.mrb[154].mxu1 }
 0x8f7   : > { %v4765_v45 = vpack.c.bf16 %v4756_v16, %v4756_v16  ;;  %v8083_v10 = vpop.f32.mrb[155].mxu1 }
 0x8f9   : > { %v4791_v2 = vunpack.c.l.b16 %v4765_v45 }
 0x8fb   : > { %v4808_v33 = vrot.slane %v4791_v2, 2 }
 0x8fc   : > { %v4737_v13 = vpop.f32.mrb[156].mxu1 }
 0x8fd   : > { %v4810_v53 = vsel %vm4809_vm3, %v4808_v33, %v4807_v19  ;;  %v4758_v46 = vmul.f32 %v8246_v15, %v4737_v13  ;;  %v8088_v47 = vpop.f32.mrb[157].mxu1 }
 0x8fe   : > { %v4740_v11 = vpop.f32.mrb[158].mxu1 }
 0x8ff   : > { %v4766_v59 = vpack.c.bf16 %v4758_v46, %v4758_v46  ;;  %v8089_v60 = vpop.f32.mrb[159].mxu1 }
 0x901   : > { %v4792_v61 = vunpack.c.l.b16 %v4766_v59 }
 0x903   : > { %v4811_v63 = vrot.slane %v4792_v61, 1 }
 0x905   : > { %v4813_v0 = vsel %vm4812_vm6, %v4811_v63, %v4810_v53 }
 0x906   : > { %v4814_v18 = vpack.c.b16 %v4813_v0, %v4813_v0 }
 0x908   : > { %8093 = vmatmul.mubr.msk.bf16.vlgmr.msra.gmra.mrb[160].mxu1 %vm832_vm1, %v4814_v18 }
 0x909   : > { %8098 = vmatprep.mubr.msk.bf16.mxu1 %vm8436_vm0, %v10457_v1 }
 0x945   : > { %v8004_v22 = vpop.f32.mrb[128].mxu0 }
 0x946   : > { %v3575_v23 = vadd.f32 %v8004_v22, %v9340_v21  ;;  %v3566_v26 = vpop.f32.mrb[129].mxu0 }
 0x947   : > { %v3567_v3 = vadd.f32 %v9340_v21, %v3566_v26  ;;  %v8005_v6 = vpop.f32.mrb[130].mxu0 }
 0x948   : > { %v3727_v7 = vmax.f32 %v3575_v23, 0.0  ;;  %v3578_v29 = vadd.f32 %v8005_v6, %v9340_v21  ;;  %v3569_v14 = vpop.f32.mrb[131].mxu0 }
 0x949   : > { %v3725_v30 = vmax.f32 %v3567_v3, 0.0  ;;  %v3570_v5 = vadd.f32 %v9340_v21, %v3569_v14 }
 0x94a   : > { %v3728_v31 = vmax.f32 %v3578_v29, 0.0  ;;  %v3774_v32 = vmul.f32 %v9347_v27, %v3727_v7 }
 0x94b   : > { %v3726_v34 = vmax.f32 %v3570_v5, 0.0  ;;  %v3772_v8 = vmul.f32 %v9347_v27, %v3725_v30 }
 0x94c   : > { %v3818_v35 = vsel %vm1838_vm5, %v3774_v32, 0.0  ;;  %v3775_v36 = vmul.f32 %v9347_v27, %v3728_v31 }
 0x94d   : > { %3819 = vadd.xlane.f32.xlu1 %v3818_v35  ;;  %v8008_v37 = vpop.f32.mrb[132].mxu0  ;;  %v3773_v38 = vmul.f32 %v9347_v27, %v3726_v34  ;;  %v3812_v52 = vsel %vm1838_vm5, %v3772_v8, 0.0 }
 0x94e   : > { %v3591_v40 = vadd.f32 %v8008_v37, %v9340_v21  ;;  %v3821_v41 = vsel %vm1838_vm5, %v3775_v36, 0.0  ;;  %v3582_v42 = vpop.f32.mrb[133].mxu0 }
 0x94f   : > { %3822 = vadd.xlane.f32.xlu0 %v3821_v41  ;;  %v3583_v43 = vadd.f32 %v9340_v21, %v3582_v42  ;;  %v8009_v44 = vpop.f32.mrb[134].mxu0  ;;  %v3815_v19 = vsel %vm1838_vm5, %v3773_v38, 0.0 }
 0x950   : > { %v3731_v9 = vmax.f32 %v3591_v40, 0.0  ;;  %v3594_v39 = vadd.f32 %v8009_v44, %v9340_v21  ;;  %v3585_v12 = vpop.f32.mrb[135].mxu0 }
 0x951   : > { %v3729_v17 = vmax.f32 %v3583_v43, 0.0  ;;  %3813 = vadd.xlane.f32.xlu1 %v3812_v52  ;;  %v3586_v20 = vadd.f32 %v9340_v21, %v3585_v12 }
 0x952   : > { %v3732_v58 = vmax.f32 %v3594_v39, 0.0  ;;  %v3778_v16 = vmul.f32 %v9347_v27, %v3731_v9 }
 0x953   : > { %v3730_v57 = vmax.f32 %v3586_v20, 0.0  ;;  %3816 = vadd.xlane.f32.xlu0 %v3815_v19  ;;  %v3776_v25 = vmul.f32 %v9347_v27, %v3729_v17 }
 0x954   : > { %v3830_v45 = vsel %vm1838_vm5, %v3778_v16, 0.0  ;;  %v3779_v10 = vmul.f32 %v9347_v27, %v3732_v58 }
 0x955   : > { %v8012_v2 = vpop.f32.mrb[136].mxu0  ;;  %3831 = vadd.xlane.f32.xlu1 %v3830_v45  ;;  %v3824_v15 = vsel %vm1838_vm5, %v3776_v25, 0.0  ;;  %v3777_v53 = vmul.f32 %v9347_v27, %v3730_v57 }
 0x956   : > { %v3607_v33 = vadd.f32 %v8012_v2, %v9340_v21  ;;  %v3598_v13 = vpop.f32.mrb[137].mxu0  ;;  %v3833_v59 = vsel %vm1838_vm5, %v3779_v10, 0.0 }
 0x957   : > { %v3599_v46 = vadd.f32 %v9340_v21, %v3598_v13  ;;  %3825 = vadd.xlane.f32.xlu0 %v3824_v15  ;;  %v8013_v47 = vpop.f32.mrb[138].mxu0  ;;  %v3827_v18 = vsel %vm1838_vm5, %v3777_v53, 0.0 }
 0x958   : > { %v3735_v11 = vmax.f32 %v3607_v33, 0.0  ;;  %v3610_v60 = vadd.f32 %v8013_v47, %v9340_v21  ;;  %v3601_v61 = vpop.f32.mrb[139].mxu0 }
 0x959   : > { %v3733_v63 = vmax.f32 %v3599_v46, 0.0  ;;  %3834 = vadd.xlane.f32.xlu1 %v3833_v59  ;;  %v3602_v22 = vadd.f32 %v9340_v21, %v3601_v61 }
 0x95a   : > { %v3736_v0 = vmax.f32 %v3610_v60, 0.0  ;;  %v3782_v23 = vmul.f32 %v9347_v27, %v3735_v11 }
 0x95b   : > { %3828 = vadd.xlane.f32.xlu0 %v3827_v18  ;;  %v3780_v26 = vmul.f32 %v9347_v27, %v3733_v63  ;;  %v3734_v6 = vmax.f32 %v3602_v22, 0.0 }
 0x95c   : > { %v3842_v7 = vsel %vm1838_vm5, %v3782_v23, 0.0  ;;  %v3783_v29 = vmul.f32 %v9347_v27, %v3736_v0 }
 0x95d   : > { %v3836_v3 = vsel %vm1838_vm5, %v3780_v26, 0.0  ;;  %v3781_v30 = vmul.f32 %v9347_v27, %v3734_v6 }
 0x95e   : > { %3837 = vadd.xlane.f32.xlu1 %v3836_v3  ;;  %v3845_v14 = vsel %vm1838_vm5, %v3783_v29, 0.0 }
 0x95f   : > { %3843 = vadd.xlane.f32.xlu0 %v3842_v7  ;;  %v3839_v8 = vsel %vm1838_vm5, %v3781_v30, 0.0 }
 0x963   : > { %v8016_v5 = vpop.f32.mrb[140].mxu0  ;;  %3846 = vadd.xlane.f32.xlu0 %v3845_v14 }
 0x964   : > { %v3623_v31 = vadd.f32 %v8016_v5, %v9340_v21  ;;  %v3614_v32 = vpop.f32.mrb[141].mxu0 }
 0x965   : > { %v3615_v34 = vadd.f32 %v9340_v21, %v3614_v32  ;;  %v8017_v35 = vpop.f32.mrb[142].mxu0 }
 0x966   : > { %v3739_v36 = vmax.f32 %v3623_v31, 0.0  ;;  %v3626_v37 = vadd.f32 %v8017_v35, %v9340_v21  ;;  %v3617_v40 = vpop.f32.mrb[143].mxu0 }
 0x967   : > { %v3737_v41 = vmax.f32 %v3615_v34, 0.0  ;;  %3840 = vadd.xlane.f32.xlu0 %v3839_v8  ;;  %v3618_v43 = vadd.f32 %v9340_v21, %v3617_v40 }
 0x968   : > { %v3786_v42 = vmul.f32 %v9347_v27, %v3739_v36  ;;  %v3740_v38 = vmax.f32 %v3626_v37, 0.0 }
 0x969   : > { %v3784_v9 = vmul.f32 %v9347_v27, %v3737_v41  ;;  %v3738_v20 = vmax.f32 %v3618_v43, 0.0 }
 0x96a   : > { %v3854_v44 = vsel %vm1838_vm5, %v3786_v42, 0.0  ;;  %v3787_v16 = vmul.f32 %v9347_v27, %v3740_v38 }
 0x96b   : > { %v8020_v39 = vpop.f32.mrb[144].mxu0  ;;  %3855 = vadd.xlane.f32.xlu0 %v3854_v44  ;;  %v3848_v19 = vsel %vm1838_vm5, %v3784_v9, 0.0  ;;  %v3785_v33 = vmul.f32 %v9347_v27, %v3738_v20 }
 0x96c   : > { %v3630_v52 = vpop.f32.mrb[145].mxu0  ;;  %v3639_v58 = vadd.f32 %v8020_v39, %v9340_v21  ;;  %v3857_v2 = vsel %vm1838_vm5, %v3787_v16, 0.0 }
 0x96d   : > { %v3631_v12 = vadd.f32 %v9340_v21, %v3630_v52  ;;  %v8021_v17 = vpop.f32.mrb[146].mxu0  ;;  %v3851_v11 = vsel %vm1838_vm5, %v3785_v33, 0.0 }
 0x96e   : > { %v3633_v57 = vpop.f32.mrb[147].mxu0  ;;  %v3743_v10 = vmax.f32 %v3639_v58, 0.0  ;;  %v3642_v15 = vadd.f32 %v8021_v17, %v9340_v21 }
 0x96f   : > { %v3741_v25 = vmax.f32 %v3631_v12, 0.0  ;;  %3849 = vadd.xlane.f32.xlu0 %v3848_v19  ;;  %v3634_v53 = vadd.f32 %v9340_v21, %v3633_v57 }
 0x970   : > { %v3744_v47 = vmax.f32 %v3642_v15, 0.0  ;;  %v3790_v60 = vmul.f32 %v9347_v27, %v3743_v10 }
 0x971   : > { %v3788_v45 = vmul.f32 %v9347_v27, %v3741_v25  ;;  %v3742_v0 = vmax.f32 %v3634_v53, 0.0 }
 0x972   : > { %v3866_v22 = vsel %vm1838_vm5, %v3790_v60, 0.0  ;;  %v3791_v23 = vmul.f32 %v9347_v27, %v3744_v47 }
 0x973   : > { %3858 = vadd.xlane.f32.xlu0 %v3857_v2  ;;  %v3860_v13 = vsel %vm1838_vm5, %v3788_v45, 0.0  ;;  %v3789_v3 = vmul.f32 %v9347_v27, %v3742_v0 }
 0x974   : > { %3861 = vadd.xlane.f32.xlu1 %v3860_v13  ;;  %v3869_v14 = vsel %vm1838_vm5, %v3791_v23, 0.0 }
 0x975   : > { %v8024_v46 = vpop.f32.mrb[148].mxu0  ;;  %v3863_v36 = vsel %vm1838_vm5, %v3789_v3, 0.0 }
 0x976   : > { %v3646_v59 = vpop.f32.mrb[149].mxu0  ;;  %v3655_v18 = vadd.f32 %v8024_v46, %v9340_v21 }
 0x977   : > { %3852 = vadd.xlane.f32.xlu0 %v3851_v11  ;;  %v8025_v61 = vpop.f32.mrb[150].mxu0  ;;  %v3647_v7 = vadd.f32 %v9340_v21, %v3646_v59 }
 0x978   : > { %v3649_v63 = vpop.f32.mrb[151].mxu0  ;;  %v3747_v6 = vmax.f32 %v3655_v18, 0.0  ;;  %v3658_v35 = vadd.f32 %v8025_v61, %v9340_v21 }
 0x979   : > { %v3745_v8 = vmax.f32 %v3647_v7, 0.0  ;;  %v3650_v43 = vadd.f32 %v9340_v21, %v3649_v63 }
 0x97a   : > { %v3794_v41 = vmul.f32 %v9347_v27, %v3747_v6  ;;  %v3748_v9 = vmax.f32 %v3658_v35, 0.0 }
 0x97b   : > { %3867 = vadd.xlane.f32.xlu0 %v3866_v22  ;;  %v3792_v17 = vmul.f32 %v9347_v27, %v3745_v8  ;;  %v3746_v25 = vmax.f32 %v3650_v43, 0.0 }
 0x97c   : > { %v3878_v52 = vsel %vm1838_vm5, %v3794_v41, 0.0  ;;  %v3795_v33 = vmul.f32 %v9347_v27, %v3748_v9 }
 0x97d   : > { %v8028_v26 = vpop.f32.mrb[152].mxu0  ;;  %v3872_v2 = vsel %vm1838_vm5, %v3792_v17, 0.0  ;;  %v3793_v46 = vmul.f32 %v9347_v27, %v3746_v25 }
 0x97e   : > { %v3671_v29 = vadd.f32 %v8028_v26, %v9340_v21  ;;  %v3662_v30 = vpop.f32.mrb[153].mxu0  ;;  %v3881_v59 = vsel %vm1838_vm5, %v3795_v33, 0.0 }
 0x97f   : > { %3870 = vadd.xlane.f32.xlu0 %v3869_v14  ;;  %v8029_v5 = vpop.f32.mrb[154].mxu0  ;;  %v3663_v10 = vadd.f32 %v9340_v21, %v3662_v30  ;;  %v3875_v18 = vsel %vm1838_vm5, %v3793_v46, 0.0 }
 0x980   : > { %v3751_v31 = vmax.f32 %v3671_v29, 0.0  ;;  %v3674_v32 = vadd.f32 %v8029_v5, %v9340_v21  ;;  %v3665_v34 = vpop.f32.mrb[155].mxu0 }
 0x981   : > { %v3749_v47 = vmax.f32 %v3663_v10, 0.0  ;;  %v3666_v11 = vadd.f32 %v9340_v21, %v3665_v34 }
 0x982   : > { %v3752_v37 = vmax.f32 %v3674_v32, 0.0  ;;  %v3798_v40 = vmul.f32 %v9347_v27, %v3751_v31 }
 0x983   : > { %3864 = vadd.xlane.f32.xlu0 %v3863_v36  ;;  %v3796_v61 = vmul.f32 %v9347_v27, %v3749_v47  ;;  %v3750_v63 = vmax.f32 %v3666_v11, 0.0 }
 0x984   : > { %v3890_v42 = vsel %vm1838_vm5, %v3798_v40, 0.0  ;;  %v3799_v38 = vmul.f32 %v9347_v27, %v3752_v37 }
 0x985   : > { %v8032_v44 = vpop.f32.mrb[156].mxu0  ;;  %3891 = vadd.xlane.f32.xlu1 %v3890_v42  ;;  %v3797_v7 = vmul.f32 %v9347_v27, %v3750_v63  ;;  %v3884_v14 = vsel %vm1838_vm5, %v3796_v61, 0.0 }
 0x986   : > { %v3687_v39 = vadd.f32 %v8032_v44, %v9340_v21  ;;  %v3678_v12 = vpop.f32.mrb[157].mxu0  ;;  %v3893_v16 = vsel %vm1838_vm5, %v3799_v38, 0.0 }
 0x987   : > { %3879 = vadd.xlane.f32.xlu0 %v3878_v52  ;;  %v3679_v20 = vadd.f32 %v9340_v21, %v3678_v12  ;;  %v8033_v58 = vpop.f32.mrb[158].mxu0  ;;  %v3887_v36 = vsel %vm1838_vm5, %v3797_v7, 0.0 }
 0x988   : > { %v3755_v19 = vmax.f32 %v3687_v39, 0.0  ;;  %v3681_v57 = vpop.f32.mrb[159].mxu0  ;;  %v3690_v0 = vadd.f32 %v8033_v58, %v9340_v21 }
 0x989   : > { %v3753_v45 = vmax.f32 %v3679_v20, 0.0  ;;  %3894 = vadd.xlane.f32.xlu1 %v3893_v16  ;;  %v3682_v26 = vadd.f32 %v9340_v21, %v3681_v57 }
 0x98a   : > { %v3802_v15 = vmul.f32 %v9347_v27, %v3755_v19  ;;  %v3756_v29 = vmax.f32 %v3690_v0, 0.0 }
 0x98b   : > { %3873 = vadd.xlane.f32.xlu0 %v3872_v2  ;;  %v3800_v53 = vmul.f32 %v9347_v27, %v3753_v45  ;;  %v3754_v31 = vmax.f32 %v3682_v26, 0.0 }
 0x98c   : > { %v3902_v13 = vsel %vm1838_vm5, %v3802_v15, 0.0  ;;  %v3803_v34 = vmul.f32 %v9347_v27, %v3756_v29 }
 0x98d   : > { %3903 = vadd.xlane.f32.xlu1 %v3902_v13  ;;  %v3896_v60 = vsel %vm1838_vm5, %v3800_v53, 0.0  ;;  %v3801_v42 = vmul.f32 %v9347_v27, %v3754_v31 }
 0x98e   : > { %v3905_v52 = vsel %vm1838_vm5, %v3803_v34, 0.0 }
 0x98f   : > { %3882 = vadd.xlane.f32.xlu0 %v3881_v59  ;;  %v3899_v57 = vsel %vm1838_vm5, %v3801_v42, 0.0 }
 0x991   : > { %3897 = vadd.xlane.f32.xlu1 %v3896_v60 }
 0x993   : > { %v8036_v22 = vpop.f32.mrb[160].mxu0  ;;  %3876 = vadd.xlane.f32.xlu0 %v3875_v18  ;;  %v9467_v18 = vpop.permute.xlu1 %3939 }
 0x994   : > { %v3694_v23 = vpop.f32.mrb[161].mxu0  ;;  %v3703_v35 = vadd.f32 %v8036_v22, %v9340_v21 }
 0x995   : > { %v3695_v3 = vadd.f32 %v9340_v21, %v3694_v23  ;;  %v8037_v6 = vpop.f32.mrb[162].mxu0 }
 0x996   : > { %v3697_v30 = vpop.f32.mrb[163].mxu0  ;;  %v3706_v38 = vadd.f32 %v8037_v6, %v9340_v21  ;;  %v3759_v9 = vmax.f32 %v3703_v35, 0.0 }
 0x997   : > { %v3757_v5 = vmax.f32 %v3695_v3, 0.0  ;;  %3885 = vadd.xlane.f32.xlu0 %v3884_v14  ;;  %v3698_v16 = vadd.f32 %v9340_v21, %v3697_v30  ;;  %v9469_v22 = vpop.permute.xlu1 %4279  ;;  %v9475_v3 = vpop.permute.xlu0 %4282 }
 0x998   : > { %v3760_v19 = vmax.f32 %v3706_v38, 0.0  ;;  %v3806_v25 = vmul.f32 %v9347_v27, %v3759_v9 }
 0x999   : > { %v3804_v32 = vmul.f32 %v9347_v27, %v3757_v5  ;;  %v3758_v33 = vmax.f32 %v3698_v16, 0.0 }
 0x99a   : > { %v3807_v15 = vmul.f32 %v9347_v27, %v3760_v19  ;;  %v3914_v53 = vsel %vm1838_vm5, %v3806_v25, 0.0 }
 0x99b   : > { %v8040_v8 = vpop.f32.mrb[164].mxu0  ;;  %3888 = vadd.xlane.f32.xlu0 %v3887_v36  ;;  %v3908_v37 = vsel %vm1838_vm5, %v3804_v32, 0.0  ;;  %v3805_v11 = vmul.f32 %v9347_v27, %v3758_v33  ;;  %v9471_v23 = vpop.permute.xlu1 %4285 }
 0x99c   : > { %v3719_v40 = vadd.f32 %v8040_v8, %v9340_v21  ;;  %3909 = vadd.xlane.f32.xlu1 %v3908_v37  ;;  %v3710_v41 = vpop.f32.mrb[165].mxu0  ;;  %v3917_v60 = vsel %vm1838_vm5, %v3807_v15, 0.0  ;;  %v9479_v7 = vpop.permute.xlu0 %4291 }
 0x99d   : > { %v3711_v43 = vadd.f32 %v9340_v21, %v3710_v41  ;;  %v8041_v44 = vpop.f32.mrb[166].mxu0 }
 0x99e   : > { %v3763_v39 = vmax.f32 %v3719_v40, 0.0  ;;  %v3713_v12 = vpop.f32.mrb[167].mxu0  ;;  %v3722_v13 = vadd.f32 %v8041_v44, %v9340_v21 }
 0x99f   : > { %v3761_v17 = vmax.f32 %v3711_v43, 0.0  ;;  %3906 = vadd.xlane.f32.xlu0 %v3905_v52  ;;  %v3714_v20 = vadd.f32 %v9340_v21, %v3713_v12  ;;  %v3911_v21 = vsel %vm1838_vm5, %v3805_v11, 0.0  ;;  %v9473_v26 = vpop.permute.xlu1 %4288 }
 0x9a0   : > { %v3810_v58 = vmul.f32 %v9347_v27, %v3763_v39  ;;  %v3764_v59 = vmax.f32 %v3722_v13, 0.0  ;;  %v9483_v29 = vpop.permute.xlu0 %4297 }
 0x9a1   : > { %v3762_v45 = vmax.f32 %v3714_v20, 0.0  ;;  %v3808_v2 = vmul.f32 %v9347_v27, %v3761_v17 }
 0x9a2   : > { %v3926_v10 = vsel %vm1838_vm5, %v3810_v58, 0.0  ;;  %v3811_v63 = vmul.f32 %v9347_v27, %v3764_v59 }
 0x9a3   : > { %3900 = vadd.xlane.f32.xlu0 %v3899_v57  ;;  %3927 = vadd.xlane.f32.xlu1 %v3926_v10  ;;  %v3920_v46 = vsel %vm1838_vm5, %v3808_v2, 0.0  ;;  %v3809_v47 = vmul.f32 %v9347_v27, %v3762_v45  ;;  %v9477_v6 = vpop.permute.xlu1 %4294 }
 0x9a4   : > { %v3929_v0 = vsel %vm1838_vm5, %v3811_v63, 0.0 }
 0x9a5   : > { %v3923_v61 = vsel %vm1838_vm5, %v3809_v47, 0.0 }
 0x9a7   : > { %3915 = vadd.xlane.f32.xlu0 %v3914_v53  ;;  %3921 = vadd.xlane.f32.xlu1 %v3920_v46  ;;  %v9481_v27 = vpop.permute.xlu1 %4300 }
 0x9ab   : > { %3918 = vadd.xlane.f32.xlu0 %v3917_v60  ;;  %3924 = vadd.xlane.f32.xlu1 %v3923_v61 }
 0x9af   : > { %3912 = vadd.xlane.f32.xlu0 %v3911_v21 }
 0x9b3   : > { %3930 = vadd.xlane.f32.xlu0 %v3929_v0 }
 0x9da   : > { %v3820_v14 = vpop.xlane.xlu1 %3819 }
 0x9db   : > { %v3944_v30 = vadd.f32 %v9467_v18, %v3820_v14  ;;  %v9486_v5 = vpop.f32.mrb[160].mxu1 }
 0x9dc   : > { %v3823_v31 = vpop.xlane.xlu0 %3822  ;;  %v8094_v32 = vpop.f32.mrb[161].mxu1 }
 0x9dd   : > { %v7393_v34 = vmul.f32 -1.442695, %v3944_v30  ;;  %v3945_v35 = vadd.f32 %v9467_v18, %v3823_v31  ;;  %v4855_v36 = vpop.f32.mrb[162].mxu1 }
 0x9de   : > { %v3814_v8 = vpop.xlane.xlu1 %3813  ;;  %v8095_v37 = vpop.f32.mrb[163].mxu1 }
 0x9df   : > { %8247 = vpow2.f32 %v7393_v34  ;;  %v7394_v40 = vmul.f32 -1.442695, %v3945_v35  ;;  %v3942_v41 = vadd.f32 %v9467_v18, %v3814_v8 }
 0x9e0   : > { %v3817_v42 = vpop.xlane.xlu0 %3816 }
 0x9e1   : > { %8249 = vpow2.f32 %v7394_v40  ;;  %v7391_v38 = vmul.f32 -1.442695, %v3942_v41  ;;  %v3943_v43 = vadd.f32 %v9467_v18, %v3817_v42 }
 0x9e2   : > { %v3832_v44 = vpop.xlane.xlu1 %3831 }
 0x9e3   : > { %8251 = vpow2.f32 %v7391_v38  ;;  %v7392_v9 = vmul.f32 -1.442695, %v3943_v43  ;;  %v3948_v39 = vadd.f32 %v9467_v18, %v3832_v44 }
 0x9e4   : > { %v3826_v52 = vpop.xlane.xlu0 %3825 }
 0x9e5   : > { %8253 = vpow2.f32 %v7392_v9  ;;  %v7397_v12 = vmul.f32 -1.442695, %v3948_v39  ;;  %v3946_v17 = vadd.f32 %v9467_v18, %v3826_v52 }
 0x9e6   : > { %v3835_v20 = vpop.xlane.xlu1 %3834 }
 0x9e7   : > { %8255 = vpow2.f32 %v7397_v12  ;;  %v7395_v58 = vmul.f32 -1.442695, %v3946_v17  ;;  %v3949_v19 = vadd.f32 %v9467_v18, %v3835_v20 }
 0x9e8   : > { %v3829_v16 = vpop.xlane.xlu0 %3828 }
 0x9e9   : > { %v8248_v57 = vpop.eup %8247  ;;  %8257 = vpow2.f32 %v7395_v58  ;;  %v7398_v25 = vmul.f32 -1.442695, %v3949_v19  ;;  %v3947_v45 = vadd.f32 %v9467_v18, %v3829_v16 }
 0x9ea   : > { %v4112_v10 = vadd.f32 1.0, %v8248_v57 }
 0x9eb   : > { %v8250_v2 = vpop.eup %8249  ;;  %8259 = vpow2.f32 %v7398_v25  ;;  %v7396_v15 = vmul.f32 -1.442695, %v3947_v45  ;;  %v3838_v33 = vpop.xlane.xlu1 %3837 }
 0x9ec   : > { %8261 = vrcp.f32 %v4112_v10  ;;  %v4113_v13 = vadd.f32 1.0, %v8250_v2  ;;  %v3950_v53 = vadd.f32 %v9467_v18, %v3838_v33  ;;  %v3844_v46 = vpop.xlane.xlu0 %3843 }
 0x9ed   : > { %v8252_v47 = vpop.eup %8251  ;;  %8263 = vpow2.f32 %v7396_v15  ;;  %v3952_v11 = vadd.f32 %v9467_v18, %v3844_v46 }
 0x9ee   : > { %8265 = vrcp.f32 %v4113_v13  ;;  %v4110_v59 = vadd.f32 1.0, %v8252_v47  ;;  %v7399_v60 = vmul.f32 -1.442695, %v3950_v53 }
 0x9ef   : > { %v8254_v61 = vpop.eup %8253  ;;  %v7401_v63 = vmul.f32 -1.442695, %v3952_v11 }
 0x9f0   : > { %8267 = vrcp.f32 %v4110_v59  ;;  %v4111_v21 = vadd.f32 1.0, %v8254_v61  ;;  %v3847_v0 = vpop.xlane.xlu0 %3846 }
 0x9f1   : > { %v8256_v14 = vpop.eup %8255  ;;  %8269 = vpow2.f32 %v7399_v60  ;;  %v3953_v30 = vadd.f32 %v9467_v18, %v3847_v0 }
 0x9f2   : > { %8271 = vrcp.f32 %v4111_v21  ;;  %v4116_v31 = vadd.f32 1.0, %v8256_v14 }
 0x9f3   : > { %v8258_v32 = vpop.eup %8257  ;;  %8273 = vpow2.f32 %v7401_v63  ;;  %v7402_v34 = vmul.f32 -1.442695, %v3953_v30 }
 0x9f4   : > { %8275 = vrcp.f32 %v4116_v31  ;;  %v4114_v35 = vadd.f32 1.0, %v8258_v32  ;;  %v3841_v36 = vpop.xlane.xlu0 %3840 }
 0x9f5   : > { %v8260_v8 = vpop.eup %8259  ;;  %8277 = vpow2.f32 %v7402_v34  ;;  %v3951_v37 = vadd.f32 %v9467_v18, %v3841_v36 }
 0x9f6   : > { %v8262_v40 = vpop.eup %8261  ;;  %8279 = vrcp.f32 %v4114_v35  ;;  %v4117_v41 = vadd.f32 1.0, %v8260_v8 }
 0x9f7   : > { %v8264_v42 = vpop.eup %8263  ;;  %v7400_v38 = vmul.f32 -1.442695, %v3951_v37  ;;  %v9500_v43 = vmul.f32 %v8262_v40, %v9469_v22 }
 0x9f8   : > { %v8266_v44 = vpop.eup %8265  ;;  %8281 = vrcp.f32 %v4117_v41  ;;  %v4115_v9 = vadd.f32 1.0, %v8264_v42  ;;  %v3856_v39 = vpop.xlane.xlu0 %3855 }
 0x9f9   : > { %8283 = vpow2.f32 %v7400_v38  ;;  %v3956_v52 = vadd.f32 %v9467_v18, %v3856_v39  ;;  %v4872_v12 = vpack.c.bf16 %v9500_v43, %v9500_v43  ;;  %v9506_v20 = vmul.f32 %v8266_v44, %v9469_v22 }
 0x9fa   : > { %v8268_v17 = vpop.eup %8267  ;;  %8285 = vrcp.f32 %v4115_v9 }
 0x9fb   : > { %v8270_v58 = vpop.eup %8269  ;;  %v7405_v19 = vmul.f32 -1.442695, %v3956_v52  ;;  %v4925_v16 = vunpack.c.l.b16 %v4872_v12  ;;  %v9509_v57 = vmul.f32 %v8268_v17, %v9469_v22  ;;  %v4873_v47 = vpack.c.bf16 %v9506_v20, %v9506_v20 }
 0x9fc   : > { %v8272_v25 = vpop.eup %8271  ;;  %v4118_v45 = vadd.f32 1.0, %v8270_v58  ;;  %v3850_v10 = vpop.xlane.xlu0 %3849 }
 0x9fd   : > { %v8274_v2 = vpop.eup %8273  ;;  %8287 = vpow2.f32 %v7405_v19  ;;  %v3954_v15 = vadd.f32 %v9467_v18, %v3850_v10  ;;  %4935 = vperm.xlu1 %8213, %v4925_v16   ;;  %v4870_v33 = vpack.c.bf16 %v9509_v57, %v9509_v57  ;;  %v9515_v13 = vmul.f32 %v8272_v25, %v9469_v22  ;;  %v4910_v10 = vld [vmem:[%s9549_s22] sm:$0xf] }
 0x9fe   : > { %v8276_v53 = vpop.eup %8275  ;;  %8289 = vrcp.f32 %v4118_v45  ;;  %v4120_v46 = vadd.f32 1.0, %v8274_v2  ;;  %v4926_v41 = vunpack.c.l.b16 %v4873_v47 }
 0x9ff   : > { %v8278_v11 = vpop.eup %8277  ;;  %v7403_v59 = vmul.f32 -1.442695, %v3954_v15  ;;  %v4923_v60 = vunpack.c.l.b16 %v4870_v33  ;;  %v4871_v61 = vpack.c.bf16 %v9515_v13, %v9515_v13  ;;  %v9522_v63 = vmul.f32 %v8276_v53, %v9475_v3 }
 0xa00   : > { %v8280_v21 = vpop.eup %8279  ;;  %8291 = vrcp.f32 %v4120_v46  ;;  %v4121_v0 = vadd.f32 1.0, %v8278_v11  ;;  %v3859_v14 = vpop.xlane.xlu0 %3858  ;;  %v4975_v11 = vsel %vm4970_vm7, %v4910_v10, 0 }
 0xa01   : > { %8293 = vpow2.f32 %v7403_v59  ;;  %v3957_v30 = vadd.f32 %v9467_v18, %v3859_v14  ;;  %4929 = vperm.xlu0 %8214, %v4923_v60   ;;  %v3862_v31 = vpop.xlane.xlu1 %3861  ;;  %v4924_v32 = vunpack.c.l.b16 %v4871_v61  ;;  %v4876_v34 = vpack.c.bf16 %v9522_v63, %v9522_v63  ;;  %8097 = vmatpush3.bf16.xpose.msra.mxu1 %v4975_v11 }
 0xa02   : > { %v8282_v35 = vpop.eup %8281  ;;  %8295 = vrcp.f32 %v4121_v0  ;;  %v3958_v36 = vadd.f32 %v9467_v18, %v3862_v31  ;;  %v9529_v8 = vmul.f32 %v8280_v21, %v9469_v22  ;;  %8108 = vmatprep.subr.bf16.mxu1 %v10457_v1 }
 0xa03   : > { %v8284_v37 = vpop.eup %8283  ;;  %v7406_v40 = vmul.f32 -1.442695, %v3957_v30  ;;  %4932 = vperm.xlu1 %8213, %v4924_v32   ;;  %v9532_v42 = vmul.f32 %v8282_v35, %v9475_v3  ;;  %v5023_v52 = vunpack.c.l.b16 %v4876_v34 }
 0xa04   : > { %v8286_v38 = vpop.eup %8285  ;;  %v4119_v44 = vadd.f32 1.0, %v8284_v37  ;;  %v7407_v9 = vmul.f32 -1.442695, %v3958_v36  ;;  %v3853_v39 = vpop.xlane.xlu0 %3852  ;;  %v4874_v12 = vpack.c.bf16 %v9529_v8, %v9529_v8 }
 0xa05   : > { %8297 = vpow2.f32 %v7406_v40  ;;  %v3955_v22 = vadd.f32 %v9467_v18, %v3853_v39  ;;  %4938 = vperm.xlu0 %8214, %v4926_v41   ;;  %v4877_v17 = vpack.c.bf16 %v9532_v42, %v9532_v42  ;;  %v9540_v58 = vmul.f32 %v8286_v38, %v9475_v3 }
 0xa06   : > { %8299 = vrcp.f32 %v4119_v44  ;;  %v4927_v25 = vunpack.c.l.b16 %v4874_v12 }
 0xa07   : > { %v8288_v19 = vpop.eup %8287  ;;  %8301 = vpow2.f32 %v7407_v9  ;;  %v7404_v16 = vmul.f32 -1.442695, %v3955_v22  ;;  %5031 = vperm.xlu1 %8213, %v5023_v52   ;;  %v4875_v45 = vpack.c.bf16 %v9540_v58, %v9540_v58  ;;  %v5024_v46 = vunpack.c.l.b16 %v4877_v17 }
 0xa08   : > { %v8290_v2 = vpop.eup %8289  ;;  %v4124_v15 = vadd.f32 1.0, %v8288_v19  ;;  %v3868_v33 = vpop.xlane.xlu0 %3867 }
 0xa09   : > { %8303 = vpow2.f32 %v7404_v16  ;;  %v3960_v53 = vadd.f32 %v9467_v18, %v3868_v33  ;;  %4941 = vperm.xlu0 %8214, %v4927_v25   ;;  %v5022_v61 = vunpack.c.l.b16 %v4875_v45  ;;  %v9560_v0 = vmul.f32 %v8290_v2, %v9475_v3 }
 0xa0a   : > { %v8292_v47 = vpop.eup %8291  ;;  %8305 = vrcp.f32 %v4124_v15 }
 0xa0b   : > { %v8294_v59 = vpop.eup %8293  ;;  %v7409_v60 = vmul.f32 -1.442695, %v3960_v53  ;;  %5034 = vperm.xlu1 %8213, %v5024_v46   ;;  %v9557_v21 = vmul.f32 %v8292_v47, %v9471_v23  ;;  %v4878_v38 = vpack.c.bf16 %v9560_v0, %v9560_v0 }
 0xa0c   : > { %v8296_v14 = vpop.eup %8295  ;;  %v4122_v30 = vadd.f32 1.0, %v8294_v59  ;;  %v3871_v31 = vpop.xlane.xlu0 %3870  ;;  %v4911_v59 = vld [vmem:[%s9549_s22 + $0x4] sm:$0xf] }
 0xa0d   : > { %8307 = vpow2.f32 %v7409_v60  ;;  %v3961_v32 = vadd.f32 %v9467_v18, %v3871_v31  ;;  %5028 = vperm.xlu0 %8214, %v5022_v61   ;;  %v4880_v34 = vpack.c.bf16 %v9557_v21, %v9557_v21  ;;  %v9567_v35 = vmul.f32 %v8296_v14, %v9471_v23 }
 0xa0e   : > { %8309 = vrcp.f32 %v4122_v30  ;;  %v5025_v2 = vunpack.c.l.b16 %v4878_v38  ;;  %v5071_v14 = vsel %vm4970_vm7, %v4911_v59, 0 }
 0xa0f   : > { %v8298_v36 = vpop.eup %8297  ;;  %v7410_v37 = vmul.f32 -1.442695, %v3961_v32  ;;  %v5118_v40 = vunpack.c.l.b16 %v4880_v34  ;;  %v4881_v41 = vpack.c.bf16 %v9567_v35, %v9567_v35  ;;  %8103 = vmatpush3.bf16.xpose.msra.mxu0 %v5071_v14 }
 0xa10   : > { %v8300_v44 = vpop.eup %8299  ;;  %v4125_v9 = vadd.f32 1.0, %v8298_v36  ;;  %v3865_v39 = vpop.xlane.xlu0 %3864  ;;  %8114 = vmatprep.subr.bf16.mxu0 %v10457_v1 }
 0xa11   : > { %v8302_v52 = vpop.eup %8301  ;;  %8311 = vpow2.f32 %v7410_v37  ;;  %5124 = vperm.xlu1 %8213, %v5118_v40   ;;  %v3959_v12 = vadd.f32 %v9467_v18, %v3865_v39  ;;  %v5119_v22 = vunpack.c.l.b16 %v4881_v41  ;;  %v9575_v17 = vmul.f32 %v8300_v44, %v9475_v3 }
 0xa12   : > { %8313 = vrcp.f32 %v4125_v9  ;;  %v4126_v19 = vadd.f32 1.0, %v8302_v52  ;;  %v3892_v16 = vpop.xlane.xlu1 %3891 }
 0xa13   : > { %10482 = vst [vmem:[#allocation4_spill] sm:$0xff] %v9575_v17  ;;  %v8304_v25 = vpop.eup %8303  ;;  %v7408_v45 = vmul.f32 -1.442695, %v3959_v12  ;;  %v3968_v10 = vadd.f32 %v9467_v18, %v3892_v16  ;;  %5127 = vperm.xlu0 %8214, %v5119_v22   ;;  %v4879_v15 = vpack.c.bf16 %v9575_v17, %v9575_v17 }
 0xa14   : > { %v8306_v33 = vpop.eup %8305  ;;  %8315 = vrcp.f32 %v4126_v19  ;;  %v4123_v53 = vadd.f32 1.0, %v8304_v25  ;;  %v3880_v46 = vpop.xlane.xlu0 %3879 }
 0xa15   : > { %8317 = vpow2.f32 %v7408_v45  ;;  %v7417_v3 = vmul.f32 -1.442695, %v3968_v10  ;;  %5037 = vperm.xlu1 %8213, %v5025_v2   ;;  %v3964_v47 = vadd.f32 %v9467_v18, %v3880_v46  ;;  %v5026_v11 = vunpack.c.l.b16 %v4879_v15 }
 0xa16   : > { %8319 = vrcp.f32 %v4123_v53  ;;  %v3895_v60 = vpop.xlane.xlu1 %3894  ;;  %v9583_v61 = vmul.f32 %v8306_v33, %v9471_v23 }
 0xa17   : > { %v8308_v30 = vpop.eup %8307  ;;  %8321 = vpow2.f32 %v7417_v3  ;;  %v7413_v31 = vmul.f32 -1.442695, %v3964_v47  ;;  %v3969_v32 = vadd.f32 %v9467_v18, %v3895_v60  ;;  %5040 = vperm.xlu0 %8214, %v5026_v11  }
 0xa18   : > { %v8310_v34 = vpop.eup %8309  ;;  %v4128_v36 = vadd.f32 1.0, %v8308_v30  ;;  %v3874_v37 = vpop.xlane.xlu0 %3873  ;;  %v4884_v40 = vpack.c.bf16 %v9583_v61, %v9583_v61 }
 0xa19   : > { %8323 = vpow2.f32 %v7413_v31  ;;  %v7418_v41 = vmul.f32 -1.442695, %v3969_v32  ;;  %v3962_v38 = vadd.f32 %v9467_v18, %v3874_v37  ;;  %v9592_v44 = vmul.f32 %v8310_v34, %v9471_v23 }
 0xa1a   : > { %8325 = vrcp.f32 %v4128_v36  ;;  %v3904_v9 = vpop.xlane.xlu1 %3903  ;;  %v5122_v39 = vunpack.c.l.b16 %v4884_v40 }
 0xa1b   : > { %v8312_v52 = vpop.eup %8311  ;;  %8327 = vpow2.f32 %v7418_v41  ;;  %v7411_v12 = vmul.f32 -1.442695, %v3962_v38  ;;  %v3972_v22 = vadd.f32 %v9467_v18, %v3904_v9  ;;  %v4882_v19 = vpack.c.bf16 %v9592_v44, %v9592_v44 }
 0xa1c   : > { %v8314_v16 = vpop.eup %8313  ;;  %v4129_v25 = vadd.f32 1.0, %v8312_v52  ;;  %5136 = vperm.xlu0 %8214, %v5122_v39   ;;  %v3883_v45 = vpop.xlane.xlu0 %3882 }
 0xa1d   : > { %8329 = vpow2.f32 %v7411_v12  ;;  %v7421_v10 = vmul.f32 -1.442695, %v3972_v22  ;;  %v3965_v2 = vadd.f32 %v9467_v18, %v3883_v45  ;;  %v5120_v15 = vunpack.c.l.b16 %v4882_v19 }
 0xa1e   : > { %v8316_v33 = vpop.eup %8315  ;;  %8331 = vrcp.f32 %v4129_v25  ;;  %v3898_v53 = vpop.xlane.xlu1 %3897  ;;  %v9599_v46 = vmul.f32 %v8314_v16, %v9473_v26 }
 0xa1f   : > { %v8318_v3 = vpop.eup %8317  ;;  %8333 = vpow2.f32 %v7421_v10  ;;  %v7414_v47 = vmul.f32 -1.442695, %v3965_v2  ;;  %v3970_v11 = vadd.f32 %v9467_v18, %v3898_v53  ;;  %5130 = vperm.xlu1 %8213, %v5120_v15   ;;  %v9611_v39 = vmul.f32 %v8316_v33, %v9473_v26 }
 0xa20   : > { %v8320_v59 = vpop.eup %8319  ;;  %v4127_v60 = vadd.f32 1.0, %v8318_v3  ;;  %v3877_v14 = vpop.xlane.xlu0 %3876  ;;  %v4885_v30 = vpack.c.bf16 %v9599_v46, %v9599_v46 }
 0xa21   : > { %v8322_v31 = vpop.eup %8321  ;;  %8335 = vpow2.f32 %v7414_v47  ;;  %v7419_v32 = vmul.f32 -1.442695, %v3970_v11  ;;  %v3963_v34 = vadd.f32 %v9467_v18, %v3877_v14  ;;  %v9606_v36 = vmul.f32 %v8320_v59, %v9471_v23 }
 0xa22   : > { %8337 = vrcp.f32 %v4127_v60  ;;  %v4136_v37 = vadd.f32 1.0, %v8322_v31  ;;  %v5214_v40 = vunpack.c.l.b16 %v4885_v30  ;;  %v4886_v15 = vpack.c.bf16 %v9611_v39, %v9611_v39 }
 0xa23   : > { %v8324_v41 = vpop.eup %8323  ;;  %8339 = vpow2.f32 %v7419_v32  ;;  %v7412_v38 = vmul.f32 -1.442695, %v3963_v34  ;;  %v4883_v9 = vpack.c.bf16 %v9606_v36, %v9606_v36 }
 0xa24   : > { %v8326_v52 = vpop.eup %8325  ;;  %8341 = vrcp.f32 %v4136_v37  ;;  %v4132_v12 = vadd.f32 1.0, %v8324_v41  ;;  %5220 = vperm.xlu0 %8214, %v5214_v40   ;;  %v3886_v22 = vpop.xlane.xlu0 %3885  ;;  %v5215_v40 = vunpack.c.l.b16 %v4886_v15 }
 0xa25   : > { %v8328_v19 = vpop.eup %8327  ;;  %8343 = vpow2.f32 %v7412_v38  ;;  %v3966_v23 = vadd.f32 %v9467_v18, %v3886_v22  ;;  %v5121_v16 = vunpack.c.l.b16 %v4883_v9  ;;  %v9615_v25 = vmul.f32 %v8326_v52, %v9473_v26 }
 0xa26   : > { %8345 = vrcp.f32 %v4132_v12  ;;  %v4137_v53 = vadd.f32 1.0, %v8328_v19 }
 0xa27   : > { %v8330_v45 = vpop.eup %8329  ;;  %v7415_v10 = vmul.f32 -1.442695, %v3966_v23  ;;  %v4888_v2 = vpack.c.bf16 %v9615_v25, %v9615_v25 }
 0xa28   : > { %v8332_v33 = vpop.eup %8331  ;;  %v4130_v3 = vadd.f32 1.0, %v8330_v45  ;;  %5133 = vperm.xlu0 %8214, %v5121_v16   ;;  %v3889_v47 = vpop.xlane.xlu0 %3888 }
 0xa29   : > { %v8334_v11 = vpop.eup %8333  ;;  %8347 = vpow2.f32 %v7415_v10  ;;  %v3967_v59 = vadd.f32 %v9467_v18, %v3889_v47  ;;  %v3910_v60 = vpop.xlane.xlu1 %3909  ;;  %v5217_v14 = vunpack.c.l.b16 %v4888_v2  ;;  %v9623_v30 = vmul.f32 %v8332_v33, %v9473_v26 }
 0xa2a   : > { %8349 = vrcp.f32 %v4130_v3  ;;  %v3974_v31 = vadd.f32 %v9467_v18, %v3910_v60  ;;  %v4140_v38 = vadd.f32 1.0, %v8334_v11 }
 0xa2b   : > { %10483 = vst [vmem:[#allocation5_spill] sm:$0xff] %v9623_v30  ;;  %v8336_v32 = vpop.eup %8335  ;;  %v7416_v34 = vmul.f32 -1.442695, %v3967_v59  ;;  %5229 = vperm.xlu1 %8213, %v5217_v14   ;;  %v4889_v37 = vpack.c.bf16 %v9623_v30, %v9623_v30  ;;  %8351 = vrcp.f32 %v4137_v53 }
 0xa2c   : > { %v8338_v41 = vpop.eup %8337  ;;  %v4133_v9 = vadd.f32 1.0, %v8336_v32  ;;  %v7423_v52 = vmul.f32 -1.442695, %v3974_v31  ;;  %v3907_v12 = vpop.xlane.xlu0 %3906 }
 0xa2d   : > { %v8340_v22 = vpop.eup %8339  ;;  %8353 = vpow2.f32 %v7416_v34  ;;  %v3973_v19 = vadd.f32 %v9467_v18, %v3907_v12  ;;  %v5218_v23 = vunpack.c.l.b16 %v4889_v37  ;;  %v9630_v16 = vmul.f32 %v8338_v41, %v9473_v26 }
 0xa2e   : > { %v8342_v45 = vpop.eup %8341  ;;  %8355 = vrcp.f32 %v4133_v9  ;;  %v4138_v53 = vadd.f32 1.0, %v8340_v22 }
 0xa2f   : > { %v8344_v10 = vpop.eup %8343  ;;  %8357 = vpow2.f32 %v7423_v52  ;;  %v7422_v2 = vmul.f32 -1.442695, %v3973_v19  ;;  %5232 = vperm.xlu0 %8214, %v5218_v23   ;;  %5223 = vperm.xlu1 %8213, %v5215_v40   ;;  %v4887_v15 = vpack.c.bf16 %v9630_v16, %v9630_v16  ;;  %v9640_v34 = vmul.f32 %v8342_v45, %v9477_v6 }
 0xa30   : > { %v8346_v33 = vpop.eup %8345  ;;  %8359 = vrcp.f32 %v4140_v38  ;;  %v4131_v3 = vadd.f32 1.0, %v8344_v10  ;;  %v3901_v47 = vpop.xlane.xlu0 %3900 }
 0xa31   : > { %v3928_v11 = vpop.xlane.xlu1 %3927  ;;  %8361 = vpow2.f32 %v7422_v2  ;;  %v3971_v26 = vadd.f32 %v9467_v18, %v3901_v47  ;;  %v5216_v60 = vunpack.c.l.b16 %v4887_v15  ;;  %v9637_v14 = vmul.f32 %v8346_v33, %v9479_v7 }
 0xa32   : > { %v3980_v59 = vadd.f32 %v9467_v18, %v3928_v11  ;;  %8363 = vrcp.f32 %v4131_v3 }
 0xa33   : > { %v8348_v31 = vpop.eup %8347  ;;  %v7420_v32 = vmul.f32 -1.442695, %v3971_v26  ;;  %5226 = vperm.xlu1 %8213, %v5216_v60   ;;  %8365 = vrcp.f32 %v4138_v53  ;;  %v4892_v52 = vpack.c.bf16 %v9637_v14, %v9637_v14  ;;  %v4896_v26 = vpack.c.bf16 %v9640_v34, %v9640_v34 }
 0xa34   : > { %v8350_v37 = vpop.eup %8349  ;;  %v4134_v40 = vadd.f32 1.0, %v8348_v31  ;;  %v7429_v41 = vmul.f32 -1.442695, %v3980_v59  ;;  %v3916_v38 = vpop.xlane.xlu0 %3915 }
 0xa35   : > { %v3922_v9 = vpop.xlane.xlu1 %3921  ;;  %8367 = vpow2.f32 %v7420_v32  ;;  %v3976_v12 = vadd.f32 %v9467_v18, %v3916_v38  ;;  %v9647_v19 = vmul.f32 %v8350_v37, %v9479_v7  ;;  %v8352_v23 = vpop.eup %8351  ;;  %v5312_v45 = vunpack.c.l.b16 %v4892_v52 }
 0xa36   : > { %v3978_v22 = vadd.f32 %v9467_v18, %v3922_v9  ;;  %8369 = vrcp.f32 %v4134_v40 }
 0xa37   : > { %v8354_v10 = vpop.eup %8353  ;;  %v7425_v2 = vmul.f32 -1.442695, %v3976_v12  ;;  %v4890_v33 = vpack.c.bf16 %v9647_v19, %v9647_v19  ;;  %8371 = vpow2.f32 %v7429_v41  ;;  %5322 = vperm.xlu1 %8213, %v5312_v45   ;;  %v9659_v41 = vmul.f32 %v8352_v23, %v9477_v6 }
 0xa38   : > { %v7427_v15 = vmul.f32 -1.442695, %v3978_v22  ;;  %v8356_v53 = vpop.eup %8355  ;;  %v4135_v3 = vadd.f32 1.0, %v8354_v10  ;;  %v3919_v47 = vpop.xlane.xlu0 %3918 }
 0xa39   : > { %v3925_v11 = vpop.xlane.xlu1 %3924  ;;  %v8358_v59 = vpop.eup %8357  ;;  %8373 = vpow2.f32 %v7425_v2  ;;  %v3977_v60 = vadd.f32 %v9467_v18, %v3919_v47  ;;  %v5310_v32 = vunpack.c.l.b16 %v4890_v33  ;;  %v9656_v38 = vmul.f32 %v8356_v53, %v9479_v7 }
 0xa3a   : > { %v3979_v31 = vadd.f32 %v9467_v18, %v3925_v11  ;;  %v8360_v37 = vpop.eup %8359  ;;  %8375 = vrcp.f32 %v4135_v3  ;;  %v4142_v40 = vadd.f32 1.0, %v8358_v59  ;;  %v5407_v53 = vunpack.c.l.b16 %v4896_v26 }
 0xa3b   : > { %v8362_v9 = vpop.eup %8361  ;;  %8377 = vpow2.f32 %v7427_v15  ;;  %v7426_v52 = vmul.f32 -1.442695, %v3977_v60  ;;  %5316 = vperm.xlu1 %8213, %v5310_v32   ;;  %v4893_v2 = vpack.c.bf16 %v9656_v38, %v9656_v38  ;;  %v4897_v47 = vpack.c.bf16 %v9659_v41, %v9659_v41 }
 0xa3c   : > { %v7428_v12 = vmul.f32 -1.442695, %v3979_v31  ;;  %v8364_v22 = vpop.eup %8363  ;;  %8379 = vrcp.f32 %v4142_v40  ;;  %v4141_v45 = vadd.f32 1.0, %v8362_v9  ;;  %v3913_v10 = vpop.xlane.xlu0 %3912  ;;  %v9670_v11 = vmul.f32 %v8360_v37, %v9483_v29 }
 0xa3d   : > { %8381 = vpow2.f32 %v7426_v52  ;;  %v3975_v33 = vadd.f32 %v9467_v18, %v3913_v10  ;;  %v9665_v3 = vmul.f32 %v8364_v22, %v9479_v7  ;;  %v8366_v23 = vpop.eup %8365  ;;  %v5313_v15 = vunpack.c.l.b16 %v4893_v2 }
 0xa3e   : > { %8383 = vrcp.f32 %v4141_v45  ;;  %v5408_v45 = vunpack.c.l.b16 %v4897_v47  ;;  %v9681_v10 = vmul.f32 %v8366_v23, %v9477_v6 }
 0xa3f   : > { %v8368_v59 = vpop.eup %8367  ;;  %8385 = vpow2.f32 %v7428_v12  ;;  %v7424_v60 = vmul.f32 -1.442695, %v3975_v33  ;;  %v4891_v31 = vpack.c.bf16 %v9665_v3, %v9665_v3  ;;  %5325 = vperm.xlu0 %8214, %v5313_v15   ;;  %5415 = vperm.xlu1 %8213, %v5407_v53   ;;  %v4900_v12 = vpack.c.bf16 %v9670_v11, %v9670_v11 }
 0xa40   : > { %v8370_v32 = vpop.eup %8369  ;;  %v4139_v26 = vadd.f32 1.0, %v8368_v59  ;;  %v3931_v40 = vpop.xlane.xlu0 %3930 }
 0xa41   : > { %8387 = vpow2.f32 %v7424_v60  ;;  %v3981_v9 = vadd.f32 %v9467_v18, %v3931_v40  ;;  %v5311_v52 = vunpack.c.l.b16 %v4891_v31  ;;  %v9676_v22 = vmul.f32 %v8370_v32, %v9479_v7  ;;  %v8372_v37 = vpop.eup %8371 }
 0xa42   : > { %8389 = vrcp.f32 %v4139_v26  ;;  %v4148_v59 = vadd.f32 1.0, %v8372_v37  ;;  %v5502_v32 = vunpack.c.l.b16 %v4900_v12  ;;  %v4898_v26 = vpack.c.bf16 %v9681_v10, %v9681_v10 }
 0xa43   : > { %10484 = vst [vmem:[#allocation6_spill] sm:$0xff] %v9676_v22  ;;  %v8374_v2 = vpop.eup %8373  ;;  %v7430_v33 = vmul.f32 -1.442695, %v3981_v9  ;;  %v4894_v53 = vpack.c.bf16 %v9676_v22, %v9676_v22  ;;  %5319 = vperm.xlu0 %8214, %v5311_v52   ;;  %5418 = vperm.xlu1 %8213, %v5408_v45  }
 0xa44   : > { %v8376_v15 = vpop.eup %8375  ;;  %v4144_v18 = vadd.f32 1.0, %v8374_v2 }
 0xa45   : > { %v8378_v7 = vpop.eup %8377  ;;  %8391 = vpow2.f32 %v7430_v33  ;;  %v5314_v60 = vunpack.c.l.b16 %v4894_v53  ;;  %v9686_v47 = vmul.f32 %v8376_v15, %v9477_v6  ;;  %v5409_v15 = vunpack.c.l.b16 %v4898_v26 }
 0xa46   : > { %v8380_v31 = vpop.eup %8379  ;;  %8393 = vrcp.f32 %v4144_v18  ;;  %v4146_v23 = vadd.f32 1.0, %v8378_v7 }
 0xa47   : > { %v8382_v40 = vpop.eup %8381  ;;  %v4895_v9 = vpack.c.bf16 %v9686_v47, %v9686_v47  ;;  %v9693_v52 = vmul.f32 %v8380_v31, %v9483_v29  ;;  %5328 = vperm.xlu0 %8214, %v5314_v60   ;;  %5508 = vperm.xlu1 %8213, %v5502_v32  }
 0xa48   : > { %v8384_v37 = vpop.eup %8383  ;;  %8395 = vrcp.f32 %v4146_v23  ;;  %v4145_v45 = vadd.f32 1.0, %v8382_v40 }
 0xa49   : > { %v8386_v2 = vpop.eup %8385  ;;  %8397 = vrcp.f32 %v4148_v59  ;;  %v5406_v33 = vunpack.c.l.b16 %v4895_v9  ;;  %v9696_v12 = vmul.f32 %v8384_v37, %v9483_v29  ;;  %v4902_v18 = vpack.c.bf16 %v9693_v52, %v9693_v52 }
 0xa4a   : > { %8399 = vrcp.f32 %v4145_v45  ;;  %v4147_v53 = vadd.f32 1.0, %v8386_v2 }
 0xa4b   : > { %v8388_v7 = vpop.eup %8387  ;;  %v4901_v31 = vpack.c.bf16 %v9696_v12, %v9696_v12  ;;  %5412 = vperm.xlu0 %8214, %v5406_v33   ;;  %5421 = vperm.xlu1 %8213, %v5409_v15   ;;  %v5504_v40 = vunpack.c.l.b16 %v4902_v18 }
 0xa4c   : > { %v8390_v23 = vpop.eup %8389  ;;  %8401 = vrcp.f32 %v4147_v53  ;;  %v4143_v60 = vadd.f32 1.0, %v8388_v7 }
 0xa4d   : > { %v5503_v59 = vunpack.c.l.b16 %v4901_v31  ;;  %v9703_v32 = vmul.f32 %v8390_v23, %v9477_v6 }
 0xa4e   : > { %8403 = vrcp.f32 %v4143_v60 }
 0xa4f   : > { %10485 = vst [vmem:[#allocation7_spill] sm:$0xff] %v9703_v32  ;;  %v8392_v9 = vpop.eup %8391  ;;  %v4899_v26 = vpack.c.bf16 %v9703_v32, %v9703_v32  ;;  %5511 = vperm.xlu0 %8214, %v5503_v59   ;;  %5514 = vperm.xlu1 %8213, %v5504_v40  }
 0xa50   : > { %v8394_v37 = vpop.eup %8393  ;;  %v4149_v45 = vadd.f32 1.0, %v8392_v9 }
 0xa51   : > { %v5410_v2 = vunpack.c.l.b16 %v4899_v26  ;;  %v9708_v53 = vmul.f32 %v8394_v37, %v9483_v29 }
 0xa52   : > { %v8396_v33 = vpop.eup %8395  ;;  %8405 = vrcp.f32 %v4149_v45 }
 0xa53   : > { %10486 = vst [vmem:[#allocation8_spill] sm:$0xff] %v9708_v53  ;;  %v8398_v15 = vpop.eup %8397  ;;  %v4904_v6 = vpack.c.bf16 %v9708_v53, %v9708_v53  ;;  %v9713_v18 = vmul.f32 %v8396_v33, %v9481_v27  ;;  %5424 = vperm.xlu0 %8214, %v5410_v2  }
 0xa54   : > { %v8400_v7 = vpop.eup %8399  ;;  %v9726_v37 = vmul.f32 %v8398_v15, %v9481_v27 }
 0xa55   : > { %v5506_v31 = vunpack.c.l.b16 %v4904_v6  ;;  %v4906_v23 = vpack.c.bf16 %v9713_v18, %v9713_v18  ;;  %v9718_v60 = vmul.f32 %v8400_v7, %v9481_v27 }
 0xa56   : > { %v8402_v59 = vpop.eup %8401 }
 0xa57   : > { %v5599_v40 = vunpack.c.l.b16 %v4906_v23  ;;  %v4905_v9 = vpack.c.bf16 %v9718_v60, %v9718_v60  ;;  %v9723_v26 = vmul.f32 %v8402_v59, %v9481_v27  ;;  %5520 = vperm.xlu0 %8214, %v5506_v31   ;;  %v4908_v59 = vpack.c.bf16 %v9726_v37, %v9726_v37 }
 0xa58   : > { %v8404_v45 = vpop.eup %8403 }
 0xa59   : > { %5607 = vperm.xlu1 %8213, %v5599_v40   ;;  %v5598_v2 = vunpack.c.l.b16 %v4905_v9  ;;  %v4907_v33 = vpack.c.bf16 %v9723_v26, %v9723_v26  ;;  %v9731_v6 = vmul.f32 %v8404_v45, %v9483_v29  ;;  %v5601_v40 = vunpack.c.l.b16 %v4908_v59 }
 0xa5b   : > { %v5600_v7 = vunpack.c.l.b16 %v4907_v33  ;;  %v4903_v23 = vpack.c.bf16 %v9731_v6, %v9731_v6  ;;  %5604 = vperm.xlu0 %8214, %v5598_v2  }
 0xa5c   : > { %v8406_v1 = vpop.eup %8405 }
 0xa5d   : > { %5610 = vperm.xlu1 %8213, %v5600_v7   ;;  %v5505_v15 = vunpack.c.l.b16 %v4903_v23  ;;  %v9738_v31 = vmul.f32 %v8406_v1, %v9481_v27  ;;  %v4944_v1 = vand.u32 127, %v2703_v48  ;;  %v7439_v27 = vld [vmem:[%s10455_s19] ss:$0 sm:$0xff] }
 0xa5e   : > { %v9753_v2 = vadd.f32 %v7439_v27, %v9486_v5 }
 0xa5f   : > { %10487 = vst [vmem:[#allocation9_spill] sm:$0xff] %v9738_v31  ;;  %v4909_v9 = vpack.c.bf16 %v9738_v31, %v9738_v31  ;;  %5517 = vperm.xlu0 %8214, %v5505_v15  }
 0xa61   : > { %5613 = vperm.xlu1 %8213, %v5601_v40   ;;  %v5602_v29 = vunpack.c.l.b16 %v4909_v9 }
 0xa63   : > { %5616 = vperm.xlu0 %8214, %v5602_v29  }
 0xa67   : > { %6559 = vperm.xlu0 %8214, %v9509_v57  }
 0xa6b   : > { %6562 = vperm.xlu0 %8214, %v9515_v13  }
 0xa6f   : > { %6565 = vperm.xlu0 %8214, %v9500_v43   ;;  %v9757_v43 = vsub.s32 %v4944_v1, %v9020_v50 }
 0xa71   : > { %10488 = vst [vmem:[#allocation10_spill] sm:$0xff] %v9757_v43 }
 0xa73   : > { %6568 = vperm.xlu0 %8214, %v9506_v20  }
 0xa77   : > { %6571 = vperm.xlu0 %8214, %v9529_v8   ;;  %v4859_v8 = vsel %vm4858_vm8, %v9753_v2, -inf }
 0xa7b   : > { %6574 = vperm.xlu0 %8214, %v9540_v58  }
 0xa7c   : > { %v4936_v45 = vpop.permute.xlu1 %4935 }
 0xa7d   : > { %v4956_v58 = vrot.slane %v4936_v45, %v9757_v43 }
 0xa7f   : > { %6577 = vperm.xlu0 %8214, %v9522_v63  }
 0xa80   : > { %v4930_v57 = vpop.permute.xlu0 %4929 }
 0xa81   : > { %v4948_v13 = vrot.slane %v4930_v57, %v9757_v43 }
 0xa82   : > { %v4933_v20 = vpop.permute.xlu1 %4932 }
 0xa83   : > { %v4952_v48 = vrot.slane %v4933_v20, %v9757_v43  ;;  %6589 = vperm.xlu0 %8214, %v9557_v21   ;;  %v4912_v21 = vld [vmem:[%s9549_s22 + $0x8] sm:$0xf] }
 0xa84   : > { %v4939_v5 = vpop.permute.xlu0 %4938  ;;  %v5167_v27 = vsel %vm4970_vm7, %v4912_v21, 0 }
 0xa85   : > { %v4965_v63 = vsel %vm4794_vm12, %v4952_v48, %v4948_v13  ;;  %4860 = vmax.xlane.f32.xlu1 %v4859_v8  ;;  %v4960_v33 = vrot.slane %v4939_v5, %v9757_v43 }
 0xa86   : > { %v5032_v7 = vpop.permute.xlu1 %5031  ;;  %v4966_v23 = vsel %vm4797_vm13, %v4956_v58, %v4965_v63 }
 0xa87   : > { %6592 = vperm.xlu0 %8214, %v9567_v35   ;;  %v4967_v40 = vsel %vm4800_vm14, %v4960_v33, %v4966_v23  ;;  %v10489_v35 = vmov 0.0   ;;  %v4913_v23 = vld [vmem:[%s9549_s22 + $0xc] sm:$0xf] }
 0xa88   : > { %v4942_v59 = vpop.permute.xlu0 %4941 }
 0xa89   : > { %v4964_v15 = vrot.slane %v4942_v59, %v9757_v43 }
 0xa8a   : > { %v5035_v9 = vpop.permute.xlu1 %5034 }
 0xa8b   : > { %v4968_v29 = vsel %vm4803_vm15, %v4964_v15, %v4967_v40  ;;  %6607 = vperm.xlu0 %8214, %v9611_v39   ;;  %v5049_v39 = vrot.slane %v5032_v7, %v9757_v43  ;;  %v5053_v5 = vrot.slane %v5035_v9, %v9757_v43 }
 0xa8c   : > { %v9773_v1 = vpack.c.b16 %v4968_v29, %v4968_v29  ;;  %v5029_v45 = vpop.permute.xlu0 %5028 }
 0xa8d   : > { %v5045_v57 = vrot.slane %v5029_v45, %v9757_v43 }
 0xa8e   : > { %8099 = vmatmul.mubr.msk.bf16.vlgmr.msra.gmra.mrb[164].mxu1 %vm4970_vm7, %v9773_v1 }
 0xa8f   : > { %8109 = vmatpush3.bf16.xpose.msra.mxu1 %v5167_v27  ;;  %8110 = vmatprep.mubr.msk.bf16.mxu1 %vm8436_vm0, %v10489_v35  ;;  %v5062_v48 = vsel %vm4794_vm12, %v5049_v39, %v5045_v57  ;;  %v4914_v27 = vld [vmem:[%s9549_s22 + $0x10] sm:$0xf] }
 0xa90   : > { %v5125_v20 = vpop.permute.xlu1 %5124  ;;  %6619 = vperm.xlu0 %8214, %v9647_v19   ;;  %8120 = vmatprep.subr.bf16.mxu1 %v10489_v35  ;;  %v5063_v33 = vsel %vm4797_vm13, %v5053_v5, %v5062_v48 }
 0xa91   : > { %v5141_v40 = vrot.slane %v5125_v20, %v9757_v43  ;;  %v5359_v20 = vsel %vm4970_vm7, %v4914_v27, 0 }
 0xa92   : > { %v5128_v13 = vpop.permute.xlu0 %5127 }
 0xa94   : > { %v5038_v8 = vpop.permute.xlu1 %5037  ;;  %6622 = vperm.xlu0 %8214, %v9665_v3   ;;  %v5263_v3 = vsel %vm4970_vm7, %v4913_v23, 0 }
 0xa95   : > { %v5057_v58 = vrot.slane %v5038_v8, %v9757_v43 }
 0xa96   : > { %6604 = vperm.xlu1 %8213, %v9599_v46   ;;  %v5041_v63 = vpop.permute.xlu0 %5040 }
 0xa97   : > { %v5061_v19 = vrot.slane %v5041_v63, %v9757_v43  ;;  %v5064_v7 = vsel %vm4800_vm14, %v5057_v58, %v5063_v33  ;;  %v4915_v33 = vld [vmem:[%s9549_s22 + $0x14] sm:$0xf] }
 0xa98   : > { %6634 = vperm.xlu0 %8214, %v9686_v47  }
 0xa99   : > { %v5065_v59 = vsel %vm4803_vm15, %v5061_v19, %v5064_v7 }
 0xa9a   : > { %v9796_v15 = vpack.c.b16 %v5065_v59, %v5065_v59  ;;  %6637 = vperm.xlu1 %8213, %v9640_v34  }
 0xa9b   : > { %v5137_v46 = vpop.permute.xlu0 %5136 }
 0xa9c   : > { %6649 = vperm.xlu0 %8214, %v9670_v11   ;;  %8105 = vmatmul.mubr.msk.bf16.vlgmr.msra.gmra.mrb[168].mxu0 %vm4970_vm7, %v9796_v15  ;;  %v5145_v11 = vrot.slane %v5128_v13, %v9757_v43 }
 0xa9d   : > { %8115 = vmatpush3.bf16.xpose.msra.mxu0 %v5263_v3  ;;  %8116 = vmatprep.mubr.msk.bf16.mxu0 %vm8436_vm0, %v10489_v35  ;;  %v5455_v3 = vsel %vm4970_vm7, %v4915_v33, 0 }
 0xa9e   : > { %6652 = vperm.xlu1 %8213, %v9696_v12   ;;  %8126 = vmatprep.subr.bf16.mxu0 %v10489_v35  ;;  %v5131_v34 = vpop.permute.xlu1 %5130  ;;  %v5158_v9 = vsel %vm4794_vm12, %v5145_v11, %v5141_v40 }
 0xa9f   : > { %v5149_v21 = vrot.slane %v5131_v34, %v9757_v43 }
 0xaa0   : > { %6664 = vperm.xlu0 %8214, %v9718_v60  }
 0xaa1   : > { %v5159_v60 = vsel %vm4797_vm13, %v5149_v21, %v5158_v9 }
 0xaa2   : > { %6667 = vperm.xlu1 %8213, %v9713_v18   ;;  %v5157_v18 = vrot.slane %v5137_v46, %v9757_v43 }
 0xaa3   : > { %v5221_v47 = vpop.permute.xlu0 %5220 }
 0xaa4   : > { %6580 = vperm.xlu0 %8214, %v9532_v42   ;;  %v5237_v39 = vrot.slane %v5221_v47, %v9757_v43 }
 0xaa6   : > { %6595 = vperm.xlu1 %8213, %v9592_v44  }
 0xaa7   : > { %v5134_v12 = vpop.permute.xlu0 %5133 }
 0xaa8   : > { %v5153_v29 = vrot.slane %v5134_v12, %v9757_v43  ;;  %6610 = vperm.xlu0 %8214, %v9630_v16  }
 0xaaa   : > { %v5160_v42 = vsel %vm4800_vm14, %v5153_v29, %v5159_v60  ;;  %6625 = vperm.xlu1 %8213, %v9637_v14   ;;  %v5230_v45 = vpop.permute.xlu1 %5229 }
 0xaab   : > { %v5161_v57 = vsel %vm4803_vm15, %v5157_v18, %v5160_v42 }
 0xaac   : > { %v9823_v44 = vpack.c.b16 %v5161_v57, %v5161_v57 }
 0xaae   : > { %6655 = vperm.xlu1 %8213, %v9693_v52   ;;  %8111 = vmatmul.mubr.msk.bf16.vlgmr.msra.gmra.mrb[168].mxu1 %vm4970_vm7, %v9823_v44  ;;  %v5224_v16 = vpop.permute.xlu1 %5223  ;;  %v5233_v13 = vpop.permute.xlu0 %5232  ;;  %v5249_v52 = vrot.slane %v5230_v45, %v9757_v43 }
 0xaaf   : > { %8121 = vmatpush3.bf16.xpose.msra.mxu1 %v5359_v20  ;;  %8122 = vmatprep.mubr.msk.bf16.mxu1 %vm8436_vm0, %v10489_v35  ;;  %v5241_v14 = vrot.slane %v5224_v16, %v9757_v43  ;;  %v5253_v58 = vrot.slane %v5233_v13, %v9757_v43  ;;  %v4916_v20 = vld [vmem:[%s9549_s22 + $0x18] sm:$0xf] }
 0xab0   : > { %8132 = vmatprep.subr.bf16.mxu1 %v10489_v35  ;;  %v5551_v13 = vsel %vm4970_vm7, %v4916_v20, 0 }
 0xab1   : > { %v5254_v5 = vsel %vm4794_vm12, %v5241_v14, %v5237_v39 }
 0xab2   : > { %v5227_v48 = vpop.permute.xlu1 %5226 }
 0xab3   : > { %v5245_v8 = vrot.slane %v5227_v48, %v9757_v43 }
 0xab5   : > { %v5255_v63 = vsel %vm4797_vm13, %v5245_v8, %v5254_v5 }
 0xab6   : > { %v5256_v19 = vsel %vm4800_vm14, %v5249_v52, %v5255_v63  ;;  %v5323_v7 = vpop.permute.xlu1 %5322 }
 0xab7   : > { %v5257_v23 = vsel %vm4803_vm15, %v5253_v58, %v5256_v19  ;;  %v5341_v9 = vrot.slane %v5323_v7, %v9757_v43 }
 0xab8   : > { %v9842_v59 = vpack.c.b16 %v5257_v23, %v5257_v23 }
 0xaba   : > { %8117 = vmatmul.mubr.msk.bf16.vlgmr.msra.gmra.mrb[172].mxu0 %vm4970_vm7, %v9842_v59  ;;  %v5317_v46 = vpop.permute.xlu1 %5316 }
 0xabb   : > { %8127 = vmatpush3.bf16.xpose.msra.mxu0 %v5455_v3  ;;  %8128 = vmatprep.mubr.msk.bf16.mxu0 %vm8436_vm0, %v10489_v35  ;;  %v5333_v40 = vrot.slane %v5317_v46, %v9757_v43  ;;  %v4917_v46 = vld [vmem:[%s9549_s22 + $0x1c] sm:$0xf] }
 0xabc   : > { %8138 = vmatprep.subr.bf16.mxu0 %v10489_v35 }
 0xabe   : > { %v5326_v34 = vpop.permute.xlu0 %5325  ;;  %v5416_v47 = vpop.permute.xlu1 %5415 }
 0xabf   : > { %v5345_v29 = vrot.slane %v5326_v34, %v9757_v43  ;;  %v5433_v8 = vrot.slane %v5416_v47, %v9757_v43 }
 0xac2   : > { %v5320_v11 = vpop.permute.xlu0 %5319  ;;  %v5419_v21 = vpop.permute.xlu1 %5418 }
 0xac3   : > { %v5337_v12 = vrot.slane %v5320_v11, %v9757_v43  ;;  %v5437_v63 = vrot.slane %v5419_v21, %v9757_v43 }
 0xac5   : > { %v5350_v18 = vsel %vm4794_vm12, %v5337_v12, %v5333_v40  ;;  %v5647_v12 = vsel %vm4970_vm7, %v4917_v46, 0 }
 0xac6   : > { %v5351_v60 = vsel %vm4797_vm13, %v5341_v9, %v5350_v18  ;;  %v5329_v27 = vpop.permute.xlu0 %5328  ;;  %v5509_v57 = vpop.permute.xlu1 %5508 }
 0xac7   : > { %v5349_v42 = vrot.slane %v5329_v27, %v9757_v43  ;;  %v5352_v45 = vsel %vm4800_vm14, %v5345_v29, %v5351_v60  ;;  %v5525_v18 = vrot.slane %v5509_v57, %v9757_v43 }
 0xac9   : > { %v5353_v16 = vsel %vm4803_vm15, %v5349_v42, %v5352_v45 }
 0xaca   : > { %v9860_v14 = vpack.c.b16 %v5353_v16, %v5353_v16  ;;  %v5413_v39 = vpop.permute.xlu0 %5412  ;;  %v5422_v52 = vpop.permute.xlu1 %5421 }
 0xacb   : > { %v5429_v48 = vrot.slane %v5413_v39, %v9757_v43  ;;  %v5441_v19 = vrot.slane %v5422_v52, %v9757_v43 }
 0xacc   : > { %8123 = vmatmul.mubr.msk.bf16.vlgmr.msra.gmra.mrb[172].mxu1 %vm4970_vm7, %v9860_v14 }
 0xacd   : > { %8133 = vmatpush3.bf16.xpose.msra.mxu1 %v5551_v13  ;;  %8134 = vmatprep.mubr.msk.bf16.mxu1 %vm8436_vm0, %v10489_v35  ;;  %v5446_v5 = vsel %vm4794_vm12, %v5433_v8, %v5429_v48 }
 0xace   : > { %v5512_v58 = vpop.permute.xlu0 %5511  ;;  %8144 = vmatprep.subr.bf16.mxu1 %v10489_v35  ;;  %v5447_v33 = vsel %vm4797_vm13, %v5437_v63, %v5446_v5  ;;  %v5515_v7 = vpop.permute.xlu1 %5514 }
 0xacf   : > { %v5448_v34 = vsel %vm4800_vm14, %v5441_v19, %v5447_v33  ;;  %v5529_v9 = vrot.slane %v5512_v58, %v9757_v43  ;;  %v5533_v27 = vrot.slane %v5515_v7, %v9757_v43  ;;  %v5689_v58 = vld [vmem:[%s9895_s27] sm:$0xf] }
 0xad0   : > { %v5698_v46 = vsel %vm4970_vm7, %v5689_v58, 0 }
 0xad1   : > { %v5542_v45 = vsel %vm4794_vm12, %v5529_v9, %v5525_v18 }
 0xad2   : > { %v5425_v23 = vpop.permute.xlu0 %5424  ;;  %v5543_v48 = vsel %vm4797_vm13, %v5533_v27, %v5542_v45  ;;  %v5692_v45 = vld [vmem:[%s9895_s27 + $0xc] sm:$0xf] }
 0xad3   : > { %v5445_v3 = vrot.slane %v5425_v23, %v9757_v43 }
 0xad5   : > { %v5449_v47 = vsel %vm4803_vm15, %v5445_v3, %v5448_v34  ;;  %v5690_v34 = vld [vmem:[%s9895_s27 + $0x4] sm:$0xf] }
 0xad6   : > { %v9878_v11 = vpack.c.b16 %v5449_v47, %v5449_v47  ;;  %v5521_v40 = vpop.permute.xlu0 %5520  ;;  %v5741_v9 = vsel %vm4970_vm7, %v5690_v34, 0 }
 0xad7   : > { %v5541_v8 = vrot.slane %v5521_v40, %v9757_v43 }
 0xad8   : > { %v5608_v21 = vpop.permute.xlu1 %5607  ;;  %8129 = vmatmul.mubr.msk.bf16.vlgmr.msra.gmra.mrb[176].mxu0 %vm4970_vm7, %v9878_v11 }
 0xad9   : > { %8139 = vmatpush3.bf16.xpose.msra.mxu0 %v5647_v12  ;;  %8140 = vmatprep.mubr.msk.bf16.mxu0 %vm8436_vm0, %v10489_v35  ;;  %v5625_v20 = vrot.slane %v5608_v21, %v9757_v43 }
 0xada   : > { %v5605_v29 = vpop.permute.xlu0 %5604  ;;  %8150 = vmatprep.subr.bf16.mxu0 %v10489_v35 }
 0xadb   : > { %v5621_v42 = vrot.slane %v5605_v29, %v9757_v43  ;;  %v5691_v29 = vld [vmem:[%s9895_s27 + $0x8] sm:$0xf] }
 0xadc   : > { %v5611_v60 = vpop.permute.xlu1 %5610 }
 0xadd   : > { %v5629_v39 = vrot.slane %v5611_v60, %v9757_v43  ;;  %v5638_v52 = vsel %vm4794_vm12, %v5625_v20, %v5621_v42  ;;  %v5784_v42 = vsel %vm4970_vm7, %v5691_v29, 0 }
 0xade   : > { %v5518_v16 = vpop.permute.xlu0 %5517 }
 0xadf   : > { %v5537_v57 = vrot.slane %v5518_v16, %v9757_v43  ;;  %v5639_v23 = vsel %vm4797_vm13, %v5629_v39, %v5638_v52  ;;  %v5827_v39 = vsel %vm4970_vm7, %v5692_v45, 0 }
 0xae0   : > { %v5614_v13 = vpop.permute.xlu1 %5613 }
 0xae1   : > { %v5633_v5 = vrot.slane %v5614_v13, %v9757_v43  ;;  %v5544_v63 = vsel %vm4800_vm14, %v5537_v57, %v5543_v48  ;;  %v5693_v13 = vld [vmem:[%s9895_s27 + $0x10] sm:$0xf] }
 0xae2   : > { %v5545_v33 = vsel %vm4803_vm15, %v5541_v8, %v5544_v63  ;;  %v5617_v19 = vpop.permute.xlu0 %5616  ;;  %v5870_v52 = vsel %vm4970_vm7, %v5693_v13, 0 }
 0xae3   : > { %v9908_v7 = vpack.c.b16 %v5545_v33, %v5545_v33  ;;  %v5637_v3 = vrot.slane %v5617_v19, %v9757_v43  ;;  %v5640_v47 = vsel %vm4800_vm14, %v5633_v5, %v5639_v23  ;;  %v5694_v5 = vld [vmem:[%s9895_s27 + $0x14] sm:$0xf]  ;;  %v5695_v19 = vld [vmem:[%s9895_s27 + $0x18] sm:$0xf] }
 0xae4   : > { %v5913_v63 = vsel %vm4970_vm7, %v5694_v5, 0 }
 0xae5   : > { %v5641_v40 = vsel %vm4803_vm15, %v5637_v3, %v5640_v47  ;;  %8135 = vmatmul.mubr.msk.bf16.vlgmr.msra.gmra.mrb[176].mxu1 %vm4970_vm7, %v9908_v7  ;;  %v5956_v3 = vsel %vm4970_vm7, %v5695_v19, 0 }
 0xae6   : > { %v9917_v12 = vpack.c.b16 %v5641_v40, %v5641_v40  ;;  %v6560_v21 = vpop.permute.xlu0 %6559  ;;  %8145 = vmatpush3.bf16.xpose.msra.mxu1 %v5698_v46  ;;  %8146 = vmatprep.mubr.msk.bf16.mxu1 %vm8436_vm0, %v10489_v35  ;;  %v5696_v46 = vld [vmem:[%s9895_s27 + $0x1c] sm:$0xf] }
 0xae7   : > { %8156 = vmatprep.subr.bf16.mxu1 %v10489_v35  ;;  %v6681_v60 = vrot.slane %v6560_v21, %v9757_v43 }
 0xae8   : > { %8141 = vmatmul.mubr.msk.bf16.vlgmr.msra.gmra.mrb[180].mxu0 %vm4970_vm7, %v9917_v12 }
 0xae9   : > { %8151 = vmatpush3.bf16.xpose.msra.mxu0 %v5741_v9  ;;  %8152 = vmatprep.mubr.msk.bf16.mxu0 %vm8436_vm0, %v10489_v35 }
 0xaea   : > { %v6563_v18 = vpop.permute.xlu0 %6562  ;;  %8162 = vmatprep.subr.bf16.mxu0 %v10489_v35 }
 0xaeb   : > { %v6685_v27 = vrot.slane %v6563_v18, %v9757_v43 }
 0xaed   : > { %v6838_v20 = vsel %vm4794_vm12, %v6685_v27, %v6681_v60  ;;  %8147 = vmatmul.mubr.msk.bf16.vlgmr.msra.gmra.mrb[180].mxu1 %vm4970_vm7, %v9773_v1 }
 0xaee   : > { %v6566_v16 = vpop.permute.xlu0 %6565  ;;  %8157 = vmatpush3.bf16.xpose.msra.mxu1 %v5784_v42  ;;  %8158 = vmatprep.mubr.msk.bf16.mxu1 %vm8436_vm0, %v10489_v35 }
 0xaef   : > { %v6689_v57 = vrot.slane %v6566_v16, %v9757_v43  ;;  %8168 = vmatprep.subr.bf16.mxu1 %v10489_v35 }
 0xaf0   : > { %8153 = vmatmul.mubr.msk.bf16.vlgmr.msra.gmra.mrb[184].mxu0 %vm4970_vm7, %v9796_v15 }
 0xaf1   : > { %v6839_v48 = vsel %vm4797_vm13, %v6689_v57, %v6838_v20  ;;  %8163 = vmatpush3.bf16.xpose.msra.mxu0 %v5827_v39  ;;  %8164 = vmatprep.mubr.msk.bf16.mxu0 %vm8436_vm0, %v10489_v35 }
 0xaf2   : > { %v6569_v1 = vpop.permute.xlu0 %6568  ;;  %8174 = vmatprep.subr.bf16.mxu0 %v10489_v35 }
 0xaf3   : > { %v6693_v8 = vrot.slane %v6569_v1, %v9757_v43 }
 0xaf5   : > { %v6840_v58 = vsel %vm4800_vm14, %v6693_v8, %v6839_v48  ;;  %8159 = vmatmul.mubr.msk.bf16.vlgmr.msra.gmra.mrb[184].mxu1 %vm4970_vm7, %v9823_v44 }
 0xaf6   : > { %v6572_v15 = vpop.permute.xlu0 %6571  ;;  %8169 = vmatpush3.bf16.xpose.msra.mxu1 %v5870_v52  ;;  %8170 = vmatprep.mubr.msk.bf16.mxu1 %vm8436_vm0, %v10489_v35 }
 0xaf7   : > { %v6697_v33 = vrot.slane %v6572_v15, %v9757_v43  ;;  %8180 = vmatprep.subr.bf16.mxu1 %v10489_v35 }
 0xaf8   : > { %8165 = vmatmul.mubr.msk.bf16.vlgmr.msra.gmra.mrb[188].mxu0 %vm4970_vm7, %v9842_v59  ;;  %v5999_v59 = vsel %vm4970_vm7, %v5696_v46, 0 }
 0xaf9   : > { %v9963_v23 = vsel %vm4803_vm15, %v6697_v33, %v6840_v58  ;;  %8175 = vmatpush3.bf16.xpose.msra.mxu0 %v5913_v63  ;;  %8176 = vmatprep.mubr.msk.bf16.mxu0 %vm8436_vm0, %v10489_v35 }
 0xafa   : > { %10490 = vst [vmem:[#allocation11_spill] sm:$0xff] %v9963_v23  ;;  %v6575_v44 = vpop.permute.xlu0 %6574  ;;  %8186 = vmatprep.subr.bf16.mxu0 %v10489_v35 }
 0xafb   : > { %v6701_v47 = vrot.slane %v6575_v44, %v9757_v43 }
 0xafd   : > { %8171 = vmatmul.mubr.msk.bf16.vlgmr.msra.gmra.mrb[188].mxu1 %vm4970_vm7, %v9860_v14 }
 0xafe   : > { %v6578_v34 = vpop.permute.xlu0 %6577  ;;  %8181 = vmatpush3.bf16.xpose.msra.mxu1 %v5956_v3  ;;  %8182 = vmatprep.mubr.msk.bf16.mxu1 %vm8436_vm0, %v10489_v35 }
 0xaff   : > { %v6705_v40 = vrot.slane %v6578_v34, %v9757_v43 }
 0xb00   : > { %8177 = vmatmul.mubr.msk.bf16.vlgmr.msra.gmra.mrb[192].mxu0 %vm4970_vm7, %v9878_v11 }
 0xb01   : > { %v6842_v21 = vsel %vm4794_vm12, %v6705_v40, %v6701_v47  ;;  %8187 = vmatpush3.bf16.xpose.msra.mxu0 %v5999_v59  ;;  %8188 = vmatprep.mubr.msk.bf16.mxu0 %vm8436_vm0, %v10489_v35  ;;  %vm6345_vm0 = vcmask 61440  }
 0xb02   : > { %v6590_v14 = vpop.permute.xlu0 %6589 }
 0xb03   : > { %v6721_v29 = vrot.slane %v6590_v14, %v9757_v43 }
 0xb05   : > { %8183 = vmatmul.mubr.msk.bf16.vlgmr.msra.gmra.mrb[192].mxu1 %vm4970_vm7, %v9908_v7 }
 0xb06   : > { %v6593_v9 = vpop.permute.xlu0 %6592 }
 0xb07   : > { %v6725_v18 = vrot.slane %v6593_v9, %v9757_v43 }
 0xb08   : > { %8189 = vmatmul.mubr.msk.bf16.vlgmr.msra.gmra.mrb[196].mxu0 %vm4970_vm7, %v9917_v12 }
 0xb09   : > { %v6846_v11 = vsel %vm4794_vm12, %v6725_v18, %v6721_v29 }
 0xb0a   : > { %v6608_v60 = vpop.permute.xlu0 %6607 }
 0xb0b   : > { %v6745_v13 = vrot.slane %v6608_v60, %v9757_v43 }
 0xb0f   : > { %v6620_v27 = vpop.permute.xlu0 %6619 }
 0xb10   : > { %v6761_v20 = vrot.slane %v6620_v27, %v9757_v43 }
 0xb12   : > { %v4861_v42 = vpop.xlane.xlu1 %4860 }
 0xb13   : > { %v4862_v45 = vsub.f32 %v9753_v2, %v4861_v42  ;;  %v6623_v35 = vpop.permute.xlu0 %6622 }
 0xb14   : > { %v6765_v7 = vrot.slane %v6623_v35, %v9757_v43 }
 0xb15   : > { %v4863_v16 = vmul.f32 1.442695, %v4862_v45 }
 0xb16   : > { %v6854_v39 = vsel %vm4794_vm12, %v6765_v7, %v6761_v20  ;;  %v6605_v57 = vpop.permute.xlu1 %6604 }
 0xb17   : > { %8407 = vpow2.f32 %v4863_v16  ;;  %v6741_v12 = vrot.slane %v6605_v57, %v9757_v43  ;;  %v6635_v48 = vpop.permute.xlu0 %6634 }
 0xb18   : > { %v6781_v2 = vrot.slane %v6635_v48, %v9757_v43 }
 0xb19   : > { %v9996_v1 = vsel %vm4794_vm12, %v6745_v13, %v6741_v12 }
 0xb1a   : > { %10491 = vst [vmem:[#allocation12_spill] sm:$0xff] %v9996_v1  ;;  %v6638_v8 = vpop.permute.xlu1 %6637 }
 0xb1b   : > { %v6785_v52 = vrot.slane %v6638_v8, %v9757_v43  ;;  %v6650_v5 = vpop.permute.xlu0 %6649 }
 0xb1c   : > { %v6801_v63 = vrot.slane %v6650_v5, %v9757_v43 }
 0xb1d   : > { %v10001_v58 = vsel %vm4794_vm12, %v6785_v52, %v6781_v2 }
 0xb1e   : > { %10492 = vst [vmem:[#allocation13_spill] sm:$0xff] %v10001_v58  ;;  %v6653_v15 = vpop.permute.xlu1 %6652 }
 0xb1f   : > { %v6805_v33 = vrot.slane %v6653_v15, %v9757_v43  ;;  %v6665_v19 = vpop.permute.xlu0 %6664 }
 0xb20   : > { %v6821_v59 = vrot.slane %v6665_v19, %v9757_v43 }
 0xb21   : > { %v10005_v44 = vpop.eup %8407  ;;  %v10008_v3 = vsel %vm4794_vm12, %v6805_v33, %v6801_v63 }
 0xb22   : > { %10493 = vst [vmem:[#allocation14_spill] sm:$0xff] %v10008_v3  ;;  %v6668_v46 = vpop.permute.xlu1 %6667  ;;  %v4865_v34 = vsel %vm4858_vm8, %v10005_v44, 0.0  ;;  %v10118_v3 = vld [vmem:[%s10055_s30 + $0xc] sm:$0x7] }
 0xb23   : > { %v6825_v47 = vrot.slane %v6668_v46, %v9757_v43  ;;  %4866 = vadd.xlane.f32.xlu0 %v4865_v34  ;;  %v6581_v40 = vpop.permute.xlu0 %6580 }
 0xb24   : > { %v6709_v14 = vrot.slane %v6581_v40, %v9757_v43 }
 0xb25   : > { %v10016_v9 = vsel %vm4794_vm12, %v6825_v47, %v6821_v59 }
 0xb26   : > { %10494 = vst [vmem:[#allocation15_spill] sm:$0xff] %v10016_v9  ;;  %v10019_v29 = vsel %vm4797_vm13, %v6709_v14, %v6842_v21  ;;  %v6596_v18 = vpop.permute.xlu1 %6595 }
 0xb27   : > { %10495 = vst [vmem:[#allocation16_spill] sm:$0xff] %v10019_v29  ;;  %v6729_v60 = vrot.slane %v6596_v18, %v9757_v43  ;;  %v10040_v34 = vpop.permute.xlu0 %6610 }
 0xb28   : > { %10498 = vst [vmem:[#allocation19_spill] sm:$0xff] %v10040_v34 }
 0xb29   : > { %v10023_v27 = vsel %vm4797_vm13, %v6729_v60, %v6846_v11  ;;  %v8411_v60 = vld [vmem:[%s9261_s24] sm:$0x1] }
 0xb2a   : > { %10496 = vst [vmem:[#allocation17_spill] sm:$0xff] %v10023_v27  ;;  %v6626_v42 = vpop.permute.xlu1 %6625 }
 0xb2b   : > { %v6769_v45 = vrot.slane %v6626_v42, %v9757_v43  ;;  %v6281_v42 = vsub.f32 1.0, %v8411_v60 }
 0xb2d   : > { %v10027_v35 = vsel %vm4797_vm13, %v6769_v45, %v6854_v39  ;;  %v8412_v45 = vld [vmem:[%s9261_s24 + $0x2] sm:$0x1] }
 0xb2e   : > { %10497 = vst [vmem:[#allocation18_spill] sm:$0xff] %v10027_v35  ;;  %v10115_v35 = vld [vmem:[%s10055_s30 + $0x8] sm:$0x7] }
 0xb39   : > { %6640 = vperm.xlu0 %8214, %v9659_v41  }
 0xb61   : > { %v10030_v20 = vpop.f32.mrb[164].mxu1 }
 0xb62   : > { %v8100_v7 = vpop.f32.mrb[165].mxu1 }
 0xb63   : > { %v5014_v16 = vpop.f32.mrb[166].mxu1  ;;  %v6283_v7 = vsub.f32 1.0, %v8412_v45 }
 0xb64   : > { %v8101_v21 = vpop.f32.mrb[167].mxu1  ;;  %v8413_v16 = vld [vmem:[%s9261_s24 + $0x3] sm:$0x1] }
 0xb65   : > { %v6284_v21 = vsub.f32 1.0, %v8413_v16  ;;  %v6415_v16 = vsub.s32 6, %v9020_v50 }
 0xb6f   : > { %v10032_v57 = vpop.f32.mrb[168].mxu0 }
 0xb70   : > { %v8106_v13 = vpop.f32.mrb[169].mxu0 }
 0xb71   : > { %v5110_v12 = vpop.f32.mrb[170].mxu0  ;;  %v8414_v13 = vld [vmem:[%s9261_s24 + $0x5] sm:$0x1] }
 0xb72   : > { %v8107_v48 = vpop.f32.mrb[171].mxu0  ;;  %v6286_v12 = vsub.f32 1.0, %v8414_v13  ;;  %v6422_v13 = vsub.s32 7, %v9020_v50 }
 0xb73   : > { %v8415_v48 = vld [vmem:[%s9261_s24 + $0x1] sm:$0x1] }
 0xb81   : > { %v10034_v11 = vpop.f32.mrb[168].mxu1 }
 0xb82   : > { %v8112_v8 = vpop.f32.mrb[169].mxu1 }
 0xb83   : > { %v5206_v2 = vpop.f32.mrb[170].mxu1  ;;  %v6282_v8 = vsub.f32 1.0, %v8415_v48  ;;  %v10090_v48 = vld [vmem:[%s10055_s30] sm:$0x7] }
 0xb84   : > { %v8113_v52 = vpop.f32.mrb[171].mxu1 }
 0xb85   : > { %v10079_v45 = vrot.slane %v6282_v8, %v9264_v49 }
 0xb8d   : > { %v10036_v39 = vpop.f32.mrb[172].mxu0 }
 0xb8e   : > { %v8118_v5 = vpop.f32.mrb[173].mxu0 }
 0xb8f   : > { %v5302_v41 = vpop.f32.mrb[174].mxu0  ;;  %v10058_v5 = vsub.s32 1, %v9020_v50 }
 0xb90   : > { %v8119_v15 = vpop.f32.mrb[175].mxu0 }
 0xb91   : > { %v10061_v15 = vrot.slane %v6281_v42, %v9264_v49  ;;  %v10076_v42 = vrot.slane %v6286_v12, %v9264_v49 }
 0xb9f   : > { %v10038_v63 = vpop.f32.mrb[172].mxu1 }
 0xba0   : > { %v8124_v33 = vpop.f32.mrb[173].mxu1 }
 0xba1   : > { %v5398_v19 = vpop.f32.mrb[174].mxu1 }
 0xba2   : > { %v8125_v46 = vpop.f32.mrb[175].mxu1  ;;  %v10064_v19 = vrot.slane %v6283_v7, %v9264_v49  ;;  %v10082_v7 = vld [vmem:[%s9261_s24 + $0x7] sm:$0x1] }
 0xba3   : > { %v10067_v46 = vrot.slane %v6284_v21, %v9264_v49  ;;  %v10086_v21 = vld [vmem:[%s9261_s24 + $0x6] sm:$0x1] }
 0xbab   : > { %v10042_v59 = vpop.f32.mrb[176].mxu0 }
 0xbac   : > { %v8130_v47 = vpop.f32.mrb[177].mxu0 }
 0xbad   : > { %v5494_v40 = vpop.f32.mrb[178].mxu0  ;;  %v8416_v47 = vld [vmem:[%s9261_s24 + $0x4] sm:$0x1]  ;;  %s8442_s24 = smov 16  }
 0xbae   : > { %v8131_v14 = vpop.f32.mrb[179].mxu0  ;;  %v6285_v40 = vsub.f32 1.0, %v8416_v47  ;;  %v10101_v47 = vld [vmem:[%s10055_s30 + $0x4] sm:$0x7] }
 0xbb0   : > { %v4867_v18 = vpop.xlane.xlu0 %4866  ;;  %v10108_v9 = vrot.slane %v6285_v40, %v9264_v49 }
 0xbb1   : > { %8409 = vrcp.f32 %v4867_v18 }
 0xbb8   : > { %v10049_v2 = vpop.f32.mrb[176].mxu1 }
 0xbb9   : > { %v8136_v52 = vpop.f32.mrb[177].mxu1 }
 0xbba   : > { %v5590_v33 = vpop.f32.mrb[178].mxu1 }
 0xbbb   : > { %v8410_v41 = vpop.eup %8409  ;;  %v8137_v18 = vpop.f32.mrb[179].mxu1  ;;  %v6394_v33 = vsub.s32 3, %v9020_v50 }
 0xbbc   : > { %v10071_v14 = vmul.f32 %v8410_v41, %v10005_v44  ;;  %v10073_v60 = vpop.f32.mrb[180].mxu0  ;;  %v10097_v41 = vsub.s32 2, %v9020_v50 }
 0xbbd   : > { %v8142_v44 = vpop.f32.mrb[181].mxu0 }
 0xbbe   : > { %10499 = vst [vmem:[#allocation20_spill] sm:$0xff] %v10071_v14  ;;  %v5686_v52 = vpop.f32.mrb[182].mxu0  ;;  %v6381_v12 = vrot.slane %v10071_v14, %v10058_v5  ;;  %v6374_v8 = vrot.slane %v10071_v14, %v9264_v49  ;;  %v6401_v44 = vsub.s32 4, %v9020_v50  ;;  %v6388_v1 = vrot.slane %v10071_v14, %v10097_v41 }
 0xbbf   : > { %v8143_v18 = vpop.f32.mrb[183].mxu0  ;;  %v6408_v52 = vsub.s32 5, %v9020_v50  ;;  %v6395_v27 = vrot.slane %v10071_v14, %v6394_v33  ;;  %v10134_v50 = vld [vmem:[%s10055_s30 + $0x10] sm:$0x7]  ;;  %v10502_v22 = vrot.slane %v10090_v48, %v10097_v41 }
 0xbc0   : > { %6383 = vbcast.lane.b32.xlu1 %v6381_v12, 256  ;;  %6376 = vbcast.lane.b32.xlu0 %v6374_v8, 256  ;;  %v5734_v29 = vpop.f32.mrb[180].mxu1 }
 0xbc1   : > { %v6049_v18 = vsub.f32 %v10030_v20, %v5734_v29  ;;  %v6089_v58 = vsub.f32 %v5734_v29, %v10030_v20  ;;  %v8148_v23 = vpop.f32.mrb[181].mxu1  ;;  %v10145_v29 = vld [vmem:[%s10055_s30 + $0x14] sm:$0x7]  ;;  %v6409_v40 = vrot.slane %v10071_v14, %v6408_v52  ;;  %v10168_v52 = vld [vmem:[%s10055_s30 + $0x18] sm:$0x7] }
 0xbc2   : > { %v5737_v34 = vpop.f32.mrb[182].mxu1 }
 0xbc3   : > { %v6057_v20 = vmax.f32 %v6049_v18, 0.0  ;;  %v6097_v43 = vmax.f32 %v6089_v58, 0.0  ;;  %v8149_v33 = vpop.f32.mrb[183].mxu1  ;;  %v5777_v34 = vpop.f32.mrb[184].mxu0 }
 0xbc4   : > { %6390 = vbcast.lane.b32.xlu1 %v6388_v1, 256  ;;  %6397 = vbcast.lane.b32.xlu0 %v6395_v27, 256  ;;  %v6050_v31 = vsub.f32 %v10032_v57, %v5777_v34  ;;  %v6090_v8 = vsub.f32 %v5777_v34, %v10032_v57  ;;  %v8154_v53 = vpop.f32.mrb[185].mxu0  ;;  %v6402_v33 = vrot.slane %v10071_v14, %v6401_v44 }
 0xbc5   : > { %v6065_v58 = vsub.f32 1.0, %v6057_v20  ;;  %v6105_v27 = vsub.f32 1.0, %v6097_v43  ;;  %v5780_v18 = vpop.f32.mrb[186].mxu0  ;;  %v6416_v20 = vrot.slane %v10071_v14, %v6415_v16  ;;  %v10500_v16 = vrot.slane %v10090_v48, %v9264_v49 }
 0xbc6   : > { %v6058_v12 = vmax.f32 %v6050_v31, 0.0  ;;  %v6098_v32 = vmax.f32 %v6090_v8, 0.0  ;;  %v8155_v30 = vpop.f32.mrb[187].mxu0  ;;  %v6423_v18 = vrot.slane %v10071_v14, %v6422_v13 }
 0xbc7   : > { %v6073_v34 = vmax.f32 %v6065_v58, 0.0  ;;  %v6113_v23 = vmax.f32 %v6105_v27, 0.0 }
 0xbc8   : > { %6404 = vbcast.lane.b32.xlu1 %v6402_v33, 256  ;;  %6411 = vbcast.lane.b32.xlu0 %v6409_v40, 256  ;;  %v6066_v31 = vsub.f32 1.0, %v6058_v12  ;;  %v6106_v30 = vsub.f32 1.0, %v6098_v32  ;;  %v5820_v8 = vpop.f32.mrb[184].mxu1 }
 0xbc9   : > { %v6081_v57 = vmin.f32 %v6073_v34, 1.0  ;;  %v6121_v58 = vmin.f32 %v6113_v23, 1.0  ;;  %v6051_v27 = vsub.f32 %v10034_v11, %v5820_v8  ;;  %v6091_v40 = vsub.f32 %v5820_v8, %v10034_v11  ;;  %v8160_v33 = vpop.f32.mrb[185].mxu1 }
 0xbca   : > { %v6074_v43 = vmax.f32 %v6066_v31, 0.0  ;;  %v6114_v53 = vmax.f32 %v6106_v30, 0.0  ;;  %v5823_v1 = vpop.f32.mrb[186].mxu1  ;;  %v10501_v23 = vrot.slane %v10090_v48, %v10058_v5 }
 0xbcb   : > { %v6129_v12 = vmin.f32 %v6081_v57, %v6121_v58  ;;  %v6169_v13 = vmul.f32 %v10500_v16, %v6081_v57  ;;  %v6059_v11 = vmax.f32 %v6051_v27, 0.0  ;;  %v8161_v31 = vpop.f32.mrb[187].mxu1  ;;  %v5863_v1 = vpop.f32.mrb[188].mxu0  ;;  %v6099_v33 = vmax.f32 %v6091_v40, 0.0 }
 0xbcc   : > { %v6209_v34 = vmul.f32 %v10501_v23, %v6121_v58  ;;  %6418 = vbcast.lane.b32.xlu1 %v6416_v20, 256  ;;  %6425 = vbcast.lane.b32.xlu0 %v6423_v18, 256  ;;  %v6082_v30 = vmin.f32 %v6074_v43, 1.0  ;;  %v6122_v8 = vmin.f32 %v6114_v53, 1.0  ;;  %v6052_v44 = vsub.f32 %v10036_v39, %v5863_v1  ;;  %v8166_v32 = vpop.f32.mrb[189].mxu0 }
 0xbcd   : > { %v6257_v57 = vmul.f32 %v10502_v22, %v6129_v12  ;;  %v6067_v16 = vsub.f32 1.0, %v6059_v11  ;;  %v6092_v17 = vsub.f32 %v5863_v1, %v10036_v39  ;;  %v5866_v58 = vpop.f32.mrb[190].mxu0  ;;  %v10503_v20 = vrot.slane %v10101_v47, %v9264_v49 }
 0xbce   : > { %v6217_v14 = vadd.f32 %v6209_v34, %v6169_v13  ;;  %v6130_v27 = vmin.f32 %v6082_v30, %v6122_v8  ;;  %v10504_v53 = vrot.slane %v10101_v47, %v10058_v5  ;;  %v6107_v40 = vsub.f32 1.0, %v6099_v33  ;;  %v8167_v32 = vpop.f32.mrb[191].mxu0 }
 0xbcf   : > { %v6170_v18 = vmul.f32 %v10503_v20, %v6082_v30  ;;  %v6075_v13 = vmax.f32 %v6067_v16, 0.0  ;;  %v6060_v23 = vmax.f32 %v6052_v44, 0.0  ;;  %v6100_v34 = vmax.f32 %v6092_v17, 0.0 }
 0xbd0   : > { %v6210_v43 = vmul.f32 %v10504_v53, %v6122_v8  ;;  %v6265_v48 = vadd.f32 %v6257_v57, %v6217_v14  ;;  %v10505_v39 = vrot.slane %v10101_v47, %v10097_v41  ;;  %v6115_v11 = vmax.f32 %v6107_v40, 0.0  ;;  %v5906_v31 = vpop.f32.mrb[188].mxu1 }
 0xbd1   : > { %v6252_v1 = vrot.slane %v10168_v52, %v10097_v41  ;;  %v6083_v30 = vmin.f32 %v6075_v13, 1.0  ;;  %v6068_v58 = vsub.f32 1.0, %v6060_v23  ;;  %v6108_v20 = vsub.f32 1.0, %v6100_v34  ;;  %v8172_v33 = vpop.f32.mrb[189].mxu1 }
 0xbd2   : > { %v6218_v22 = vadd.f32 %v6210_v43, %v6170_v18  ;;  %v6258_v12 = vmul.f32 %v10505_v39, %v6130_v27  ;;  %v6053_v8 = vsub.f32 %v10038_v63, %v5906_v31  ;;  %v6123_v16 = vmin.f32 %v6115_v11, 1.0  ;;  %v5909_v14 = vpop.f32.mrb[190].mxu1 }
 0xbd3   : > { %v6093_v17 = vsub.f32 %v5906_v31, %v10038_v63  ;;  %v6273_v44 = vmul.f32 %v9267_v51, %v6265_v48  ;;  %v10506_v47 = vrot.slane %v10115_v35, %v9264_v49  ;;  %v6076_v18 = vmax.f32 %v6068_v58, 0.0  ;;  %v8173_v40 = vpop.f32.mrb[191].mxu1  ;;  %v5949_v32 = vpop.f32.mrb[192].mxu0 }
 0xbd4   : > { %v10203_v57 = vadd.f32 %v6258_v12, %v6218_v22  ;;  %v6116_v53 = vmax.f32 %v6108_v20, 0.0  ;;  %v6061_v43 = vmax.f32 %v6053_v8, 0.0  ;;  %v6131_v13 = vmin.f32 %v6083_v30, %v6123_v16  ;;  %v8178_v48 = vpop.f32.mrb[193].mxu0 }
 0xbd5   : > { %v6171_v27 = vmul.f32 %v10506_v47, %v6083_v30  ;;  %v10507_v23 = vrot.slane %v10115_v35, %v10058_v5  ;;  %v6101_v34 = vmax.f32 %v6093_v17, 0.0  ;;  %v6054_v51 = vsub.f32 %v10042_v59, %v5949_v32  ;;  %v5952_v31 = vpop.f32.mrb[194].mxu0  ;;  %v10217_v47 = vld [vmem:[%s10055_s30 + $0x1c] sm:$0x7] }
 0xbd6   : > { %v6084_v22 = vmin.f32 %v6076_v18, 1.0  ;;  %v6124_v39 = vmin.f32 %v6116_v53, 1.0  ;;  %v6069_v12 = vsub.f32 1.0, %v6061_v43  ;;  %v6094_v11 = vsub.f32 %v5949_v32, %v10042_v59  ;;  %v8179_v14 = vpop.f32.mrb[195].mxu0 }
 0xbd7   : > { %v6211_v63 = vmul.f32 %v10507_v23, %v6123_v16  ;;  %v10508_v20 = vrot.slane %v10115_v35, %v10097_v41  ;;  %v6109_v30 = vsub.f32 1.0, %v6101_v34  ;;  %v6062_v33 = vmax.f32 %v6054_v51, 0.0 }
 0xbd8   : > { %v6132_v16 = vmin.f32 %v6084_v22, %v6124_v39  ;;  %v10509_v17 = vrot.slane %v10118_v3, %v9264_v49  ;;  %v10510_v53 = vrot.slane %v10118_v3, %v10058_v5  ;;  %v6077_v43 = vmax.f32 %v6069_v12, 0.0  ;;  %v5992_v35 = vpop.f32.mrb[192].mxu1 }
 0xbd9   : > { %v6219_v58 = vadd.f32 %v6211_v63, %v6171_v27  ;;  %v6259_v8 = vmul.f32 %v10508_v20, %v6131_v13  ;;  %v6117_v27 = vmax.f32 %v6109_v30, 0.0  ;;  %v6070_v40 = vsub.f32 1.0, %v6062_v33  ;;  %v8184_v51 = vpop.f32.mrb[193].mxu1 }
 0xbda   : > { %v6172_v18 = vmul.f32 %v10509_v17, %v6084_v22  ;;  %v6212_v59 = vmul.f32 %v10510_v53, %v6124_v39  ;;  %v6102_v32 = vmax.f32 %v6094_v11, 0.0  ;;  %v10226_v13 = vadd.f32 %v10061_v15, %v6273_v44  ;;  %v5995_v12 = vpop.f32.mrb[194].mxu1 }
 0xbdb   : > { %v6085_v63 = vmin.f32 %v6077_v43, 1.0  ;;  %v6055_v34 = vsub.f32 %v10049_v2, %v5992_v35  ;;  %v6168_v48 = vrot.slane %v10217_v47, %v9264_v49  ;;  %v6125_v22 = vmin.f32 %v6117_v27, 1.0  ;;  %v8185_v14 = vpop.f32.mrb[195].mxu1  ;;  %v6035_v17 = vpop.f32.mrb[196].mxu0 }
 0xbdc   : > { %v6220_v23 = vadd.f32 %v6212_v59, %v6172_v18  ;;  %v6078_v31 = vmax.f32 %v6070_v40, 0.0  ;;  %v6110_v20 = vsub.f32 1.0, %v6102_v32  ;;  %v6095_v39 = vsub.f32 %v5992_v35, %v10049_v2  ;;  %v8190_v40 = vpop.f32.mrb[197].mxu0 }
 0xbdd   : > { %v10511_v11 = vrot.slane %v10118_v3, %v10097_v41  ;;  %v10512_v15 = vrot.slane %v10134_v50, %v9264_v49  ;;  %v6063_v33 = vmax.f32 %v6055_v34, 0.0  ;;  %v6267_v18 = vadd.f32 %v6259_v8, %v6219_v58  ;;  %v6038_v51 = vpop.f32.mrb[198].mxu0 }
 0xbde   : > { %v6133_v53 = vmin.f32 %v6085_v63, %v6125_v22  ;;  %v10513_v59 = vrot.slane %v10134_v50, %v10058_v5  ;;  %v6086_v27 = vmin.f32 %v6078_v31, 1.0  ;;  %v6118_v2 = vmax.f32 %v6110_v20, 0.0  ;;  %v8191_v31 = vpop.f32.mrb[199].mxu0 }
 0xbdf   : > { %v6260_v30 = vmul.f32 %v10511_v11, %v6132_v16  ;;  %v6173_v44 = vmul.f32 %v10512_v15, %v6085_v63  ;;  %v6071_v32 = vsub.f32 1.0, %v6063_v33  ;;  %v6103_v35 = vmax.f32 %v6095_v39, 0.0 }
 0xbe0   : > { %v6213_v43 = vmul.f32 %v10513_v59, %v6125_v22  ;;  %v6056_v3 = vsub.f32 %v10073_v60, %v6035_v17  ;;  %v6096_v16 = vsub.f32 %v6035_v17, %v10073_v60  ;;  %v10514_v34 = vrot.slane %v10134_v50, %v10097_v41 }
 0xbe1   : > { %v6126_v8 = vmin.f32 %v6118_v2, 1.0  ;;  %v10515_v63 = vrot.slane %v10145_v29, %v9264_v49  ;;  %v6079_v20 = vmax.f32 %v6071_v32, 0.0  ;;  %v6111_v11 = vsub.f32 1.0, %v6103_v35 }
 0xbe2   : > { %v6221_v12 = vadd.f32 %v6213_v43, %v6173_v44  ;;  %v6261_v58 = vmul.f32 %v10514_v34, %v6133_v53  ;;  %v6064_v15 = vmax.f32 %v6056_v3, 0.0  ;;  %v6104_v39 = vmax.f32 %v6096_v16, 0.0 }
 0xbe3   : > { %v6174_v22 = vmul.f32 %v10515_v63, %v6086_v27  ;;  %v6134_v33 = vmin.f32 %v6086_v27, %v6126_v8  ;;  %v10516_v60 = vrot.slane %v10145_v29, %v10058_v5  ;;  %v6275_v44 = vmul.f32 %v9273_v55, %v6267_v18 }
 0xbe4   : > { %v6274_v50 = vmul.f32 %v9270_v54, %v10203_v57  ;;  %v6087_v17 = vmin.f32 %v6079_v20, 1.0  ;;  %v6119_v53 = vmax.f32 %v6111_v11, 0.0  ;;  %v6072_v59 = vsub.f32 1.0, %v6064_v15 }
 0xbe5   : > { %v6214_v14 = vmul.f32 %v10516_v60, %v6126_v8  ;;  %v6112_v43 = vsub.f32 1.0, %v6104_v39  ;;  %v10517_v40 = vrot.slane %v10145_v29, %v10097_v41  ;;  %v6339_v27 = vadd.f32 %v10064_v19, %v6275_v44 }
 0xbe6   : > { %v6338_v35 = vadd.f32 %v10079_v45, %v6274_v50  ;;  %v6127_v3 = vmin.f32 %v6119_v53, 1.0  ;;  %v10518_v55 = vrot.slane %v10168_v52, %v9264_v49  ;;  %v6080_v16 = vmax.f32 %v6072_v59, 0.0  ;;  %v10523_v53 = vld [vmem:[#allocation6_spill] sm:$0xff] }
 0xbe7   : > { %v6222_v2 = vadd.f32 %v6214_v14, %v6174_v22  ;;  %v6262_v32 = vmul.f32 %v10517_v40, %v6134_v33  ;;  %v6120_v54 = vmax.f32 %v6112_v43, 0.0  ;;  %v6208_v57 = vrot.slane %v10217_v47, %v10058_v5 }
 0xbe8   : > { %v6175_v18 = vmul.f32 %v10518_v55, %v6087_v17  ;;  %v6256_v51 = vrot.slane %v10217_v47, %v10097_v41  ;;  %v6269_v34 = vadd.f32 %v6261_v58, %v6221_v12  ;;  %v6268_v29 = vadd.f32 %v6260_v30, %v6220_v23 }
 0xbe9   : > { %v6135_v8 = vmin.f32 %v6087_v17, %v6127_v3  ;;  %v10519_v19 = vrot.slane %v10168_v52, %v10058_v5  ;;  %v6088_v63 = vmin.f32 %v6080_v16, 1.0  ;;  %v6128_v22 = vmin.f32 %v6120_v54, 1.0 }
 0xbea   : > { %v6277_v31 = vmul.f32 %v9276_v56, %v6269_v34  ;;  %v6276_v20 = vmul.f32 %v9280_v62, %v6268_v29  ;;  %v6270_v11 = vadd.f32 %v6262_v32, %v6222_v2  ;;  %v10520_v56 = vsub.f32 1.0, %v10086_v21 }
 0xbeb   : > { %v6215_v45 = vmul.f32 %v10519_v19, %v6127_v3  ;;  %v6263_v47 = vmul.f32 %v6252_v1, %v6135_v8  ;;  %v6136_v12 = vmin.f32 %v6088_v63, %v6128_v22  ;;  %v6176_v23 = vmul.f32 %v6168_v48, %v6088_v63  ;;  %v10526_v63 = vld [vmem:[#allocation8_spill] sm:$0xff] }
 0xbec   : > { %v6216_v30 = vmul.f32 %v6208_v57, %v6128_v22  ;;  %v6341_v58 = vadd.f32 %v10108_v9, %v6277_v31  ;;  %v6340_v5 = vadd.f32 %v10067_v46, %v6276_v20  ;;  %v6278_v39 = vmul.f32 %v9288_v24, %v6270_v11  ;;  %v10527_v11 = vld [vmem:[#allocation9_spill] sm:$0xff] }
 0xbed   : > { %v6223_v15 = vadd.f32 %v6215_v45, %v6175_v18  ;;  %v6324_v33 = vrot.slane %v10520_v56, %v9264_v49  ;;  %v6264_v62 = vmul.f32 %v6256_v51, %v6136_v12  ;;  %v6346_v60 = vsel %vm6345_vm0, %v10226_v13, inf }
 0xbee   : > { %v6224_v41 = vadd.f32 %v6216_v30, %v6176_v23  ;;  %6347 = vmin.xlane.f32.xlu0 %v6346_v60  ;;  %v6342_v52 = vadd.f32 %v10076_v42, %v6278_v39  ;;  %v10521_v9 = vsub.f32 1.0, %v10082_v7  ;;  %v6352_v48 = vsel %vm6345_vm0, %v6339_v27, inf  ;;  %v10528_v39 = vld [vmem:[#allocation10_spill] sm:$0xff] }
 0xbef   : > { %v6271_v14 = vadd.f32 %v6263_v47, %v6223_v15  ;;  %v6349_v44 = vsel %vm6345_vm0, %v6338_v35, inf  ;;  %v6358_v17 = vsel %vm6345_vm0, %v6341_v58, inf  ;;  %v8440_v58 = vmov 1983009808  }
 0xbf0   : > { %v6328_v46 = vrot.slane %v10521_v9, %v9264_v49  ;;  %v6272_v24 = vadd.f32 %v6264_v62, %v6224_v41  ;;  %6350 = vmin.xlane.f32.xlu1 %v6349_v44  ;;  %v6361_v49 = vsel %vm6345_vm0, %v6342_v52, inf  ;;  %v10529_v62 = vld [vmem:[#allocation19_spill] sm:$0xff] }
 0xbf1   : > { %v6279_v1 = vmul.f32 %v9284_v4, %v6271_v14  ;;  %v6355_v4 = vsel %vm6345_vm0, %v6340_v5, inf  ;;  %v6881_v5 = vunpack.c.l.s4 %v8440_v58  ;;  %v6749_v60 = vrot.slane %v10529_v62, %v10528_v39 }
 0xbf2   : > { %6353 = vmin.xlane.f32.xlu0 %v6352_v48  ;;  %v6280_v13 = vmul.f32 %v9294_v28, %v6272_v24  ;;  %v10522_v28 = vld [vmem:[#allocation4_spill] sm:$0xff] }
 0xbf3   : > { %v6343_v21 = vadd.f32 %v6324_v33, %v6279_v1  ;;  %v6882_v1 = vunpack.c.0.s8 %v6881_v5  ;;  %v10536_v5 = vld [vmem:[#allocation18_spill] sm:$0xff] }
 0xbf4   : > { %v6344_v50 = vadd.f32 %v6328_v46, %v6280_v13  ;;  %6356 = vmin.xlane.f32.xlu1 %v6355_v4  ;;  %v10530_v46 = vld [vmem:[#allocation17_spill] sm:$0xff]  ;;  %v10531_v13 = vld [vmem:[#allocation12_spill] sm:$0xff] }
 0xbf5   : > { %v6364_v42 = vsel %vm6345_vm0, %v6343_v21, inf }
 0xbf6   : > { %6359 = vmin.xlane.f32.xlu0 %v6358_v17  ;;  %v6367_v7 = vsel %vm6345_vm0, %v6344_v50, inf  ;;  %v6851_v50 = vsel %vm4797_vm13, %v6749_v60, %v10531_v13  ;;  %v10532_v17 = vld [vmem:[#allocation11_spill] sm:$0xff] }
 0xbf8   : > { %6362 = vmin.xlane.f32.xlu1 %v6361_v49 }
 0xbfa   : > { %6365 = vmin.xlane.f32.xlu0 %v6364_v42 }
 0xbfc   : > { %6368 = vmin.xlane.f32.xlu1 %v6367_v7  ;;  %v10533_v7 = vld [vmem:[#allocation16_spill] sm:$0xff] }
 0xc0d   : > { %6583 = vperm.xlu1 %8213, %v9560_v0   ;;  %v10524_v0 = vld [vmem:[#allocation5_spill] sm:$0xff] }
 0xc10   : > { %6670 = vperm.xlu0 %8214, %v9723_v26   ;;  %v10525_v26 = vld [vmem:[#allocation7_spill] sm:$0xff] }
 0xc11   : > { %6613 = vperm.xlu1 %8213, %v9615_v25   ;;  %v10309_v25 = vpop.permute.xlu0 %6640 }
 0xc14   : > { %6598 = vperm.xlu0 %8214, %v9606_v36  }
 0xc15   : > { %6643 = vperm.xlu1 %8213, %v9681_v10   ;;  %v10311_v10 = vpop.permute.xlu1 %6655 }
 0xc18   : > { %6628 = vperm.xlu0 %8214, %v9656_v38  }
 0xc19   : > { %6673 = vperm.xlu1 %8213, %v9726_v37  }
 0xc1c   : > { %6658 = vperm.xlu0 %8214, %v9731_v6  }
 0xc1d   : > { %6601 = vperm.xlu1 %8213, %v9583_v61  }
 0xc20   : > { %6586 = vperm.xlu0 %8214, %v10522_v28  }
 0xc21   : > { %6631 = vperm.xlu1 %8213, %v10523_v53  }
 0xc24   : > { %6616 = vperm.xlu0 %8214, %v10524_v0   ;;  %v10534_v0 = vld [vmem:[#allocation3_spill] sm:$0xff] }
 0xc28   : > { %6646 = vperm.xlu0 %8214, %v10525_v26   ;;  %v6885_v26 = vsub.s32 %v6882_v1, %v10534_v0 }
 0xc32   : > { %v6377_v36 = vpop.permute.xlu0 %6376  ;;  %v6384_v38 = vpop.permute.xlu1 %6383 }
 0xc36   : > { %v6398_v59 = vpop.permute.xlu0 %6397  ;;  %v6391_v37 = vpop.permute.xlu1 %6390 }
 0xc3a   : > { %v6412_v43 = vpop.permute.xlu0 %6411  ;;  %v6405_v6 = vpop.permute.xlu1 %6404 }
 0xc3e   : > { %v6426_v2 = vpop.permute.xlu0 %6425  ;;  %v6419_v40 = vpop.permute.xlu1 %6418 }
 0xc7b   : > { %v6348_v61 = vpop.xlane.xlu0 %6347 }
 0xc7c   : > { %v6435_v32 = vmin.f32 %v6348_v61, %v6377_v36 }
 0xc7d   : > { %v6351_v3 = vpop.xlane.xlu1 %6350 }
 0xc7e   : > { %6452 = vperm.xlu1 %8213, %v6435_v32   ;;  %v6436_v55 = vmin.f32 %v6351_v3, %v6384_v38 }
 0xc7f   : > { %v6354_v27 = vpop.xlane.xlu0 %6353 }
 0xc80   : > { %v6437_v35 = vmin.f32 %v6354_v27, %v6391_v37  ;;  %6455 = vperm.xlu0 %8214, %v6436_v55  }
 0xc81   : > { %v6357_v54 = vpop.xlane.xlu1 %6356 }
 0xc82   : > { %6458 = vperm.xlu1 %8213, %v6437_v35   ;;  %v6438_v57 = vmin.f32 %v6357_v54, %v6398_v59 }
 0xc83   : > { %v6360_v18 = vpop.xlane.xlu0 %6359 }
 0xc84   : > { %v6439_v16 = vmin.f32 %v6360_v18, %v6405_v6  ;;  %6461 = vperm.xlu0 %8214, %v6438_v57  }
 0xc85   : > { %v6363_v29 = vpop.xlane.xlu1 %6362 }
 0xc86   : > { %6464 = vperm.xlu1 %8213, %v6439_v16   ;;  %v6440_v8 = vmin.f32 %v6363_v29, %v6412_v43 }
 0xc87   : > { %v6366_v51 = vpop.xlane.xlu0 %6365 }
 0xc88   : > { %v6441_v34 = vmin.f32 %v6366_v51, %v6419_v40  ;;  %6467 = vperm.xlu0 %8214, %v6440_v8  }
 0xc89   : > { %v6369_v19 = vpop.xlane.xlu1 %6368 }
 0xc8a   : > { %6470 = vperm.xlu1 %8213, %v6441_v34   ;;  %v6442_v45 = vmin.f32 %v6369_v19, %v6426_v2  ;;  %v6809_v34 = vrot.slane %v10311_v10, %v10528_v39 }
 0xc8c   : > { %6473 = vperm.xlu0 %8214, %v6442_v45  }
 0xc8d   : > { %v6584_v31 = vpop.permute.xlu1 %6583 }
 0xc8e   : > { %6661 = vperm.xlu1 %8213, %v10526_v63   ;;  %v6713_v41 = vrot.slane %v6584_v31, %v10528_v39  ;;  %v10535_v31 = vld [vmem:[#allocation14_spill] sm:$0xff] }
 0xc8f   : > { %v10314_v22 = vpop.permute.xlu0 %6670 }
 0xc90   : > { %6676 = vperm.xlu0 %8214, %v10527_v11   ;;  %v6844_v28 = vsel %vm4800_vm14, %v6713_v41, %v10533_v7  ;;  %v6789_v11 = vrot.slane %v10309_v25, %v10528_v39  ;;  %v6829_v10 = vrot.slane %v10314_v22, %v10528_v39 }
 0xc91   : > { %v6614_v15 = vpop.permute.xlu1 %6613 }
 0xc92   : > { %v6753_v52 = vrot.slane %v6614_v15, %v10528_v39 }
 0xc93   : > { %v6599_v20 = vpop.permute.xlu0 %6598 }
 0xc94   : > { %v6733_v56 = vrot.slane %v6599_v20, %v10528_v39  ;;  %v6852_v53 = vsel %vm4800_vm14, %v6753_v52, %v6851_v50  ;;  %v6863_v20 = vsel %vm4797_vm13, %v6809_v34, %v10535_v31 }
 0xc95   : > { %v10317_v12 = vpop.permute.xlu1 %6643 }
 0xc96   : > { %v6848_v24 = vsel %vm4800_vm14, %v6733_v56, %v10530_v46  ;;  %v8441_v56 = vmov 1934713408   ;;  %v6793_v62 = vrot.slane %v10317_v12, %v10528_v39 }
 0xc97   : > { %v6629_v47 = vpop.permute.xlu0 %6628 }
 0xc98   : > { %v6773_v8 = vrot.slane %v6629_v47, %v10528_v39 }
 0xc99   : > { %v10319_v30 = vpop.permute.xlu1 %6673 }
 0xc9a   : > { %v6856_v47 = vsel %vm4800_vm14, %v6773_v8, %v10536_v5  ;;  %v6833_v25 = vrot.slane %v10319_v30, %v10528_v39 }
 0xc9b   : > { %v6659_v23 = vpop.permute.xlu0 %6658 }
 0xc9c   : > { %v6813_v19 = vrot.slane %v6659_v23, %v10528_v39 }
 0xc9d   : > { %v6602_v14 = vpop.permute.xlu1 %6601 }
 0xc9e   : > { %v6737_v9 = vrot.slane %v6602_v14, %v10528_v39  ;;  %v6864_v23 = vsel %vm4800_vm14, %v6813_v19, %v6863_v20 }
 0xc9f   : > { %v6587_v33 = vpop.permute.xlu0 %6586 }
 0xca0   : > { %v6717_v48 = vrot.slane %v6587_v33, %v10528_v39  ;;  %v6849_v21 = vsel %vm4803_vm15, %v6737_v9, %v6848_v24  ;;  %v6945_v33 = vunpack.c.l.s4 %v8441_v56  ;;  %v10537_v9 = vld [vmem:[#allocation13_spill] sm:$0xff]  ;;  %v10538_v24 = vld [vmem:[#allocation15_spill] sm:$0xff]  ;;  %v8446_v56 = vmov 1966171168  }
 0xca1   : > { %v6878_v4 = vcombine.low %v10532_v17, %v6849_v21  ;;  %v6879_v42 = vcombine.high %v10532_v17, %v6849_v21  ;;  %v6632_v35 = vpop.permute.xlu1 %6631  ;;  %v6859_v46 = vsel %vm4797_vm13, %v6789_v11, %v10537_v9 }
 0xca2   : > { %v6845_v36 = vsel %vm4803_vm15, %v6717_v48, %v6844_v28  ;;  %v6777_v45 = vrot.slane %v6632_v35, %v10528_v39  ;;  %v6867_v48 = vsel %vm4797_vm13, %v6829_v10, %v10538_v24  ;;  %v6946_v21 = vunpack.c.0.s8 %v6945_v33 }
 0xca3   : > { %v6617_v44 = vpop.permute.xlu0 %6616  ;;  %v6886_v43 = vrot.slane %v6878_v4, %v6885_v26  ;;  %v6893_v6 = vrot.slane %v6879_v42, %v6885_v26  ;;  %v6860_v30 = vsel %vm4800_vm14, %v6793_v62, %v6859_v46  ;;  %v7025_v33 = vunpack.c.l.s4 %v8446_v56 }
 0xca4   : > { %v6757_v49 = vrot.slane %v6617_v44, %v10528_v39  ;;  %v6857_v60 = vsel %vm4803_vm15, %v6777_v45, %v6856_v47  ;;  %v6868_v44 = vsel %vm4800_vm14, %v6833_v25, %v6867_v48  ;;  %v6949_v42 = vsub.s32 %v6946_v21, %v10534_v0 }
 0xca5   : > { %v7026_v25 = vunpack.c.0.s8 %v7025_v33 }
 0xca6   : > { %v6853_v38 = vsel %vm4803_vm15, %v6757_v49, %v6852_v53 }
 0xca7   : > { %v6894_v59 = vcombine.low %v6845_v36, %v6853_v38  ;;  %v6895_v37 = vcombine.high %v6845_v36, %v6853_v38  ;;  %v6647_v55 = vpop.permute.xlu0 %6646 }
 0xca8   : > { %v6797_v41 = vrot.slane %v6647_v55, %v10528_v39 }
 0xca9   : > { %v6902_v2 = vrot.slane %v6894_v59, %v6885_v26  ;;  %v6909_v61 = vrot.slane %v6895_v37, %v6885_v26 }
 0xcaa   : > { %v6861_v13 = vsel %vm4803_vm15, %v6797_v41, %v6860_v30  ;;  %v7029_v41 = vsub.s32 %v7026_v25, %v10534_v0 }
 0xcab   : > { %v6942_v40 = vcombine.low %v6886_v43, %v6902_v2  ;;  %v6943_v32 = vcombine.high %v6886_v43, %v6902_v2  ;;  %v6958_v27 = vcombine.low %v6893_v6, %v6909_v61 }
 0xcad   : > { %v6957_v37 = vrot.slane %v6943_v32, %v6949_v42  ;;  %v6950_v43 = vrot.slane %v6942_v40, %v6949_v42  ;;  %v6965_v61 = vrot.slane %v6958_v27, %v6949_v42 }
 0xcfd   : > { %v10342_v3 = vpop.permute.xlu1 %6452 }
 0xcfe   : > { %v6478_v40 = vrot.slane %v10342_v3, %v10528_v39 }
 0xcff   : > { %v10346_v16 = vpop.permute.xlu0 %6455 }
 0xd01   : > { %v10344_v18 = vpop.permute.xlu1 %6458 }
 0xd03   : > { %v10350_v57 = vpop.permute.xlu0 %6461 }
 0xd04   : > { %v6490_v27 = vrot.slane %v10350_v57, %v10528_v39 }
 0xd05   : > { %v10348_v54 = vpop.permute.xlu1 %6464 }
 0xd07   : > { %v10356_v29 = vpop.permute.xlu0 %6467 }
 0xd08   : > { %v6498_v11 = vrot.slane %v10356_v29, %v10528_v39  ;;  %v10539_v29 = vld [vmem:[#allocation20_spill] sm:$0xff] }
 0xd09   : > { %v10352_v51 = vpop.permute.xlu1 %6470 }
 0xd0b   : > { %v10366_v58 = vpop.permute.xlu0 %6473 }
 0xd0c   : > { %v6506_v57 = vrot.slane %v10366_v58, %v10528_v39 }
 0xd0d   : > { %v6662_v63 = vpop.permute.xlu1 %6661 }
 0xd0e   : > { %v6817_v15 = vrot.slane %v6662_v63, %v10528_v39  ;;  %v6486_v63 = vrot.slane %v10344_v18, %v10528_v39  ;;  %v6502_v18 = vrot.slane %v10352_v51, %v10528_v39 }
 0xd0f   : > { %v6677_v1 = vpop.permute.xlu0 %6676 }
 0xd10   : > { %v6865_v14 = vsel %vm4803_vm15, %v6817_v15, %v6864_v23  ;;  %v6837_v12 = vrot.slane %v6677_v1, %v10528_v39 }
 0xd11   : > { %v6910_v22 = vcombine.low %v6857_v60, %v6865_v14  ;;  %v6911_v52 = vcombine.high %v6857_v60, %v6865_v14 }
 0xd12   : > { %v6869_v50 = vsel %vm4803_vm15, %v6837_v12, %v6868_v44 }
 0xd13   : > { %v6926_v17 = vcombine.low %v6861_v13, %v6869_v50  ;;  %v6927_v4 = vcombine.high %v6861_v13, %v6869_v50  ;;  %v6918_v49 = vrot.slane %v6910_v22, %v6885_v26  ;;  %v6925_v7 = vrot.slane %v6911_v52, %v6885_v26 }
 0xd15   : > { %v6934_v28 = vrot.slane %v6926_v17, %v6885_v26  ;;  %v6941_v53 = vrot.slane %v6927_v4, %v6885_v26  ;;  %v6482_v26 = vrot.slane %v10346_v16, %v10528_v39  ;;  %v6494_v16 = vrot.slane %v10348_v54, %v10528_v39 }
 0xd17   : > { %v6966_v36 = vcombine.low %v6918_v49, %v6934_v28  ;;  %v6967_v38 = vcombine.high %v6918_v49, %v6934_v28  ;;  %v6982_v59 = vcombine.low %v6925_v7, %v6941_v53  ;;  %v6507_v32 = vsel %vm4794_vm12, %v6482_v26, %v6478_v40 }
 0xd18   : > { %v6508_v31 = vsel %vm4797_vm13, %v6486_v63, %v6507_v32 }
 0xd19   : > { %v6981_v6 = vrot.slane %v6967_v38, %v6949_v42  ;;  %v6974_v2 = vrot.slane %v6966_v36, %v6949_v42  ;;  %v6989_v35 = vrot.slane %v6982_v59, %v6949_v42  ;;  %v6509_v20 = vsel %vm4800_vm14, %v6490_v27, %v6508_v31 }
 0xd1a   : > { %v6510_v3 = vsel %vm4803_vm15, %v6494_v16, %v6509_v20 }
 0xd1b   : > { %v6992_v55 = vcombine.low %v6957_v37, %v6981_v6  ;;  %v6991_v34 = vcombine.high %v6950_v43, %v6974_v2  ;;  %v6994_v8 = vcombine.low %v6965_v61, %v6989_v35  ;;  %v6993_v19 = vcombine.high %v6957_v37, %v6981_v6 }
 0xd1c   : > { %v6990_v45 = vcombine.low %v6950_v43, %v6974_v2  ;;  %v6511_v15 = vsel %vm4806_vm2, %v6498_v11, %v6510_v3 }
 0xd1d   : > { %7000 = vrot.lane.b32.xlu0 %v6992_v55, %s8442_s24  ;;  %6996 = vrot.lane.b32.xlu1 %v6991_v34, %s8443_s0  ;;  %v6512_v10 = vsel %vm4809_vm3, %v6502_v18, %v6511_v15 }
 0xd1e   : > { %v6513_v5 = vsel %vm4812_vm6, %v6506_v57, %v6512_v10 }
 0xd1f   : > { %v6515_v47 = vsel %vm4858_vm8, %v6513_v5, -inf }
 0xd21   : > { %7008 = vrot.lane.b32.xlu0 %v6994_v8, %s8438_s4  ;;  %7004 = vrot.lane.b32.xlu1 %v6993_v19, %s8444_s21  ;;  %s8445_s4 = smov 40  }
 0xd45   : > { %6516 = vmax.xlane.f32.xlu1 %v6515_v47 }
 0xd56   : > { %7015 = vrot.lane.b32.xlu1 %v10539_v29, %s8445_s4 }
 0xd8f   : > { %v6997_v54 = vpop.permute.xlu1 %6996  ;;  %v7001_v23 = vpop.permute.xlu0 %7000 }
 0xd90   : > { %v7011_v58 = vsel %vm4970_vm7, %v6990_v45, %v6997_v54 }
 0xd91   : > { %v7012_v39 = vsel %vm832_vm1, %v7011_v58, %v7001_v23  ;;  %vm7080_vm1 = vcmask 368640  }
 0xd93   : > { %v7005_v62 = vpop.permute.xlu1 %7004  ;;  %v7009_v60 = vpop.permute.xlu0 %7008 }
 0xd94   : > { %v7013_v14 = vsel %vm1327_vm4, %v7012_v39, %v7005_v62 }
 0xd95   : > { %v7014_v52 = vsel %vm1838_vm5, %v7013_v14, %v7009_v60 }
 0xdd2   : > { %v6517_v51 = vpop.xlane.xlu1 %6516 }
 0xdd6   : > { %v7016_v22 = vpop.permute.xlu1 %7015 }
 0xdd7   : > { %v7019_v1 = vsel %vm7018_vm9, %v7014_v52, %v7016_v22 }
 0xdd8   : > { %v7021_v9 = vsel %vm7020_vm10, %v7019_v1, %v6517_v51 }
 0xdd9   : > { %v7023_v46 = vcombine.high %v7021_v9, %v7021_v9  ;;  %v7030_v24 = vrot.slane %v7021_v9, %v7029_v41 }
 0xddb   : > { %v7037_v48 = vrot.slane %v7023_v46, %v7029_v41  ;;  %v7038_v12 = vcombine.high %v7030_v24, %v7030_v24  ;;  %v7046_v21 = vrot.slane %v7030_v24, %v7029_v41 }
 0xddd   : > { %v7039_v30 = vcombine.high %v7037_v48, %v7037_v48  ;;  %v7053_v44 = vrot.slane %v7037_v48, %v7029_v41  ;;  %v7060_v13 = vrot.slane %v7038_v12, %v7029_v41  ;;  %v7068_v50 = vcombine.high %v7046_v21, %v7046_v21  ;;  %7081 = vst.msk [vmem:[%s782_s17] sm:$0x1] %vm7080_vm1, %v7046_v21 }
 0xddf   : > { %v7067_v0 = vrot.slane %v7039_v30, %v7029_v41  ;;  %v7069_v17 = vcombine.high %v7053_v44, %v7053_v44  ;;  %v7070_v4 = vcombine.high %v7060_v13, %v7060_v13  ;;  %7082 = vst.msk [vmem:[%s782_s17 + $0x1] sm:$0x1] %vm7080_vm1, %v7060_v13  ;;  %7083 = vst.msk [vmem:[%s782_s17 + $0x2] sm:$0x1] %vm7080_vm1, %v7068_v50 }
 0xde0   : > { %7085 = vst.msk [vmem:[%s782_s17 + $0x4] sm:$0x1] %vm7080_vm1, %v7053_v44 }
 0xde1   : > { %v7071_v42 = vcombine.high %v7067_v0, %v7067_v0  ;;  %7084 = vst.msk [vmem:[%s782_s17 + $0x3] sm:$0x1] %vm7080_vm1, %v7070_v4  ;;  %7086 = vst.msk [vmem:[%s782_s17 + $0x5] sm:$0x1] %vm7080_vm1, %v7067_v0 }
 0xde2   : > { %7087 = vst.msk [vmem:[%s782_s17 + $0x6] sm:$0x1] %vm7080_vm1, %v7069_v17 }
 0xde3   : > { %7088 = vst.msk [vmem:[%s782_s17 + $0x7] sm:$0x1] %vm7080_vm1, %v7071_v42 }
 0xde4 PF: > { %s32_s23 = sadd.s32 1, %s8433_s23  }
 0xde5   : > { %p29_p4 = scmp.ge.s32.totalorder %s32_s23, 4  }
 0xde7   :  { %31 = sbr.rel (!%p29_p4) target bundleno = 6 (0x6), region = 153 }

</bundles_post_ra>
